<compile_context>
chip_gen: v7x
topology: tpu7x:2x2x1
jax: 0.10.0
libtpu: 0.0.40
codegen_flags: <defaults>
</compile_context>

<pallas_src>
import functools
import math

import jax
import jax.numpy as jnp
from jax.experimental import pallas as pl
from jax.experimental.pallas import tpu as pltpu

LANES = 128          # TPU vreg lane width; N and H are padded to this.
NEG_INF = -1e9


def _round_up(x, m):
    return (x + m - 1) // m * m


# -----------------------------------------------------------------------------
# Pallas kernel: one batch-tile of the PpoNetwork forward.
# -----------------------------------------------------------------------------
def ppo_kernel(
    x_ref,        # [BB, NP, D]    f32   node features (zero padded)
    valid_ref,    # [BB, NP]       f32   1.0 = real node, 0.0 = padding
    amask_ref,    # [BB, NP, NP]   int8  1 = attention blocked (attn|pad)
    we_ref,       # [D,  HP]       bf16  embedding
    be_ref,       # [1,  HP]       f32
    wqkv_ref,     # [HP, 3*HP]     bf16  fused (wq | wk | wv)
    wo_ref,       # [HP, HP]       bf16  attention output projection
    bo_ref,       # [1,  HP]       f32
    wp_ref,       # [1,  HP]       f32   policy head (per-node logit)
    wval_ref,     # [1,  HP]       f32   value head
    bhead_ref,    # [2]            f32   SMEM scalars: (bp, bval)
    pi_ref,       # out [BB, NP]   f32   lane-dense padded policy
    v_ref,        # out [BB, 128]  f32   value broadcast across lanes
    *,
    scale,        # static: 1/sqrt(true hidden size)
):
    BB, NP, D = x_ref.shape
    HP = we_ref.shape[1]

    # --- shared projections: flatten batch*nodes into the MXU row dimension --
    x = x_ref[...].reshape(BB * NP, D).astype(jnp.bfloat16)
    h = jnp.dot(x, we_ref[...], preferred_element_type=jnp.float32)
    h = jnp.maximum(h + be_ref[...], 0.0)                          # [BB*NP, HP]

    qkv = jnp.dot(h.astype(jnp.bfloat16), wqkv_ref[...],
                  preferred_element_type=jnp.float32)              # [BB*NP, 3HP]
    q = qkv[:, 0:HP].reshape(BB, NP, HP)
    k = qkv[:, HP:2 * HP].reshape(BB, NP, HP)
    w = qkv[:, 2 * HP:3 * HP].reshape(BB, NP, HP)

    # --- masked single-head self-attention --------------------------------
    # The host already folded attn_mask | key_padding | tile-padding into the
    # int8 blocked-mask, so a single where() applies the full mask.
    s = jnp.einsum("bnk,bmk->bnm",
                   q.astype(jnp.bfloat16), k.astype(jnp.bfloat16),
                   preferred_element_type=jnp.float32) * scale      # [BB,NP,NP]
    s = jnp.where(amask_ref[...] != 0, NEG_INF, s)
    s = s - jnp.max(s, axis=-1, keepdims=True)
    e = jnp.exp(s)
    denom = jnp.maximum(jnp.sum(e, axis=-1, keepdims=True), 1e-30)  # NaN guard
    attn = e * pl.reciprocal(denom, approx=True)

    ctx = jnp.einsum("bnm,bmk->bnk",
                     attn.astype(jnp.bfloat16), w.astype(jnp.bfloat16),
                     preferred_element_type=jnp.float32)           # [BB,NP,HP]

    out = jnp.dot(ctx.reshape(BB * NP, HP).astype(jnp.bfloat16), wo_ref[...],
                  preferred_element_type=jnp.float32)
    out = jnp.maximum(out + bo_ref[...], 0.0)
    outb = out.reshape(BB, NP, HP)                                 # [BB,NP,HP]

    # --- policy head: per-node logit -> masked softmax over nodes ------------
    # (lane-reduce runs on the XLU, a free slot here; the result lands
    #  nodes-on-lanes so the pi store is a full unmasked 128-lane vst.)
    valid = valid_ref[...]                                         # [BB, NP]
    logits = jnp.sum(outb * wp_ref[...][None], axis=-1) + bhead_ref[0]  # [BB,NP]
    logits = jnp.where(valid > 0.5, logits, NEG_INF)
    logits = logits - jnp.max(logits, axis=-1, keepdims=True)
    el = jnp.exp(logits)
    pdenom = jnp.maximum(jnp.sum(el, axis=-1, keepdims=True), 1e-30)
    pi = el * pl.reciprocal(pdenom, approx=True)
    pi_ref[...] = pi.astype(pi_ref.dtype)

    # --- value head: masked mean-pool -> linear (by linearity of the pool) ---
    vc = jnp.sum(outb * wval_ref[...][None], axis=-1)              # [BB, NP]
    nvalid = jnp.maximum(jnp.sum(valid, axis=-1, keepdims=True), 1.0)
    val = jnp.sum(vc * valid, axis=-1, keepdims=True) * pl.reciprocal(
        nvalid, approx=True) + bhead_ref[1]                        # [BB, 1]
    v_ref[...] = jnp.broadcast_to(val, (BB, v_ref.shape[1])).astype(v_ref.dtype)


# -----------------------------------------------------------------------------
# Wrapper: host-side padding / mask prep (cheap glue) + pallas_call.
# -----------------------------------------------------------------------------
@functools.partial(jax.jit, static_argnames=("hidden",))
def ppo_forward(nodes, key_padding_mask, attn_mask, packed, *, hidden):
    """nodes:[B,N,D] f32, key_padding_mask:[B,N] bool (True=pad),
    attn_mask:[B,N,N] bool (True=blocked).  Returns (pi:[B,N], v:[B,1])."""
    B, N, D = nodes.shape
    NP = _round_up(N, LANES)
    BB = 8 if B >= 8 else B            # batch tile; block == full dims if B < 8
    BP = _round_up(B, BB)
    f32 = jnp.float32

    # Pad once on the host; padded slots are marked invalid / blocked.
    x = jnp.zeros((BP, NP, D), f32).at[:B, :N, :].set(nodes.astype(f32))
    valid = jnp.zeros((BP, NP), f32).at[:B, :N].set(
        (~key_padding_mask).astype(f32))
    blocked = attn_mask | key_padding_mask[:, None, :]
    amask = jnp.ones((BP, NP, NP), jnp.int8).at[:B, :N, :N].set(
        blocked.astype(jnp.int8))

    kern = functools.partial(ppo_kernel, scale=1.0 / math.sqrt(hidden))

    def tile3(shape):
        return pl.BlockSpec(shape, lambda i: (i, 0, 0))

    def tile2(shape):
        return pl.BlockSpec(shape, lambda i: (i, 0))

    def resident(shape):                       # weights: constant index map
        return pl.BlockSpec(shape, lambda i: (0, 0))

    in_specs = [
        tile3((BB, NP, D)),                    # x
        tile2((BB, NP)),                       # valid
        tile3((BB, NP, NP)),                   # amask (int8)
        resident(packed["we"].shape),
        resident(packed["be"].shape),
        resident(packed["wqkv"].shape),
        resident(packed["wo"].shape),
        resident(packed["bo"].shape),
        resident(packed["wp"].shape),
        resident(packed["wval"].shape),
        pl.BlockSpec(memory_space=pltpu.MemorySpace.SMEM),   # (bp, bval) scalars
    ]
    out_specs = [tile2((BB, NP)), tile2((BB, LANES))]
    out_shape = (jax.ShapeDtypeStruct((BP, NP), f32),
                 jax.ShapeDtypeStruct((BP, LANES), f32))

    pi_pad, v_pad = pl.pallas_call(
        kern,
        grid=(BP // BB,),
        in_specs=in_specs,
        out_specs=out_specs,
        out_shape=out_shape,
        compiler_params=pltpu.CompilerParams(
            dimension_semantics=("parallel",),
            vmem_limit_bytes=32 * 1024 * 1024),
    )(x, valid, amask,
      packed["we"], packed["be"], packed["wqkv"], packed["wo"], packed["bo"],
      packed["wp"], packed["wval"], packed["bhead"])

    return pi_pad[:B, :N], v_pad[:B, :1]


# -----------------------------------------------------------------------------
# Parameters: logical (f32, PyTorch-like) and packed (padded/fused, bf16 MXU).
# -----------------------------------------------------------------------------
def init_params(key, d_in, hidden):
    ks = jax.random.split(key, 9)

    def u(k, shape, fan_in):
        lim = 1.0 / math.sqrt(fan_in)
        return jax.random.uniform(k, shape, jnp.float32, -lim, lim)

    return {
        "we":   u(ks[0], (d_in, hidden), d_in),
        "be":   u(ks[1], (hidden,), d_in),
        "wq":   u(ks[2], (hidden, hidden), hidden),
        "wk":   u(ks[3], (hidden, hidden), hidden),
        "wv":   u(ks[4], (hidden, hidden), hidden),
        "wo":   u(ks[5], (hidden, hidden), hidden),
        "bo":   u(ks[6], (hidden,), hidden),
        "wp":   u(ks[7], (hidden,), hidden),
        "bp":   jnp.zeros((), jnp.float32),
        "wval": u(ks[8], (hidden,), hidden),
        "bval": jnp.zeros((), jnp.float32),
    }


def pack_params(p):
    """Pad hidden to 128 lanes, fuse QKV, cast matmul weights to bf16."""
    d_in, hidden = p["we"].shape
    hp = _round_up(hidden, LANES)
    f32, bf16 = jnp.float32, jnp.bfloat16

    def pad2(w, rows, cols):
        return jnp.zeros((rows, cols), f32).at[:w.shape[0], :w.shape[1]].set(w)

    wqkv = jnp.zeros((hp, 3 * hp), f32)
    wqkv = wqkv.at[:hidden, 0:hidden].set(p["wq"])
    wqkv = wqkv.at[:hidden, hp:hp + hidden].set(p["wk"])
    wqkv = wqkv.at[:hidden, 2 * hp:2 * hp + hidden].set(p["wv"])

    return {
        "we":    pad2(p["we"], d_in, hp).astype(bf16),
        "be":    pad2(p["be"][None, :], 1, hp),
        "wqkv":  wqkv.astype(bf16),
        "wo":    pad2(p["wo"], hp, hp).astype(bf16),
        "bo":    pad2(p["bo"][None, :], 1, hp),
        "wp":    pad2(p["wp"][None, :], 1, hp),
        "wval":  pad2(p["wval"][None, :], 1, hp),
        "bhead": jnp.stack([p["bp"], p["bval"]]).astype(f32),
    }


# -----------------------------------------------------------------------------
# Pure-JAX reference (f32) for a loose numerical check.
# -----------------------------------------------------------------------------
def ppo_reference(nodes, kpm, am, p):
    hidden = p["we"].shape[1]
    x = nodes.astype(jnp.float32)
    h = jax.nn.relu(jnp.einsum("bnd,dh->bnh", x, p["we"]) + p["be"])
    q = jnp.einsum("bnh,hk->bnk", h, p["wq"])
    k = jnp.einsum("bnh,hk->bnk", h, p["wk"])
    w = jnp.einsum("bnh,hk->bnk", h, p["wv"])
    s = jnp.einsum("bnk,bmk->bnm", q, k) / math.sqrt(hidden)
    s = jnp.where(am | kpm[:, None, :], NEG_INF, s)
    attn = jax.nn.softmax(s, axis=-1)
    ctx = jnp.einsum("bnm,bmk->bnk", attn, w)
    out = jax.nn.relu(jnp.einsum("bnk,kh->bnh", ctx, p["wo"]) + p["bo"])
    valid = (~kpm).astype(jnp.float32)
    logits = jnp.einsum("bnh,h->bn", out, p["wp"]) + p["bp"]
    logits = jnp.where(valid > 0.5, logits, NEG_INF)
    pi = jax.nn.softmax(logits, axis=-1)
    nvalid = jnp.maximum(valid.sum(-1, keepdims=True), 1.0)
    pooled = (out * valid[..., None]).sum(1) / nvalid
    val = pooled @ p["wval"][:, None] + p["bval"]
    return pi, val


if __name__ == "__main__":
    B, N, D, H = 2, 8, 16, 32
    key = jax.random.PRNGKey(0)
    k_nodes, k_params = jax.random.split(key)

    nodes = jax.random.normal(k_nodes, (B, N, D), jnp.float32)
    # Last two node slots of sample 1 are padding.
    key_padding_mask = jnp.zeros((B, N), jnp.bool_).at[1, N - 2:].set(True)
    # No additional structural attention restrictions (all-False = allow all).
    attn_mask = jnp.zeros((B, N, N), jnp.bool_)

    params = init_params(k_params, D, H)
    packed = pack_params(params)

    pi, v = ppo_forward(nodes, key_padding_mask, attn_mask, packed, hidden=H)
    jax.block_until_ready((pi, v))

    assert pi.shape == (B, N) and v.shape == (B, 1)
    assert bool(jnp.all(jnp.isfinite(pi))) and bool(jnp.all(jnp.isfinite(v)))
    # pi rows are probability distributions with (near-)zero mass on padding.
    assert jnp.allclose(jnp.sum(pi, axis=-1), 1.0, atol=1e-2)
    assert float(jnp.max(pi[1, N - 2:])) < 1e-6

    # Loose numerical check vs. f32 reference (kernel uses bf16 MXU operands
    # and approximate reciprocals).
    ref_pi, ref_v = ppo_reference(nodes, key_padding_mask, attn_mask, params)
    assert jnp.allclose(pi, ref_pi, atol=5e-2)
    assert jnp.allclose(v, ref_v, atol=5e-2)

    print("KERNEL_OK")
</pallas_src>

<mosaic_0001>
module attributes {stable_mosaic.version = 11 : i64} {
  func.func @ppo_kernel(%arg0: i32, %arg1: memref<2x128x16xf32, #tpu.memory_space<vmem>>, %arg2: memref<2x128xf32, #tpu.memory_space<vmem>>, %arg3: memref<2x128x128xi8, #tpu.memory_space<vmem>>, %arg4: memref<16x128xbf16, #tpu.memory_space<vmem>>, %arg5: memref<1x128xf32, #tpu.memory_space<vmem>>, %arg6: memref<128x384xbf16, #tpu.memory_space<vmem>>, %arg7: memref<128x128xbf16, #tpu.memory_space<vmem>>, %arg8: memref<1x128xf32, #tpu.memory_space<vmem>>, %arg9: memref<1x128xf32, #tpu.memory_space<vmem>>, %arg10: memref<1x128xf32, #tpu.memory_space<vmem>>, %arg11: memref<2xf32, #tpu.memory_space<smem>>, %arg12: memref<2x128xf32, #tpu.memory_space<vmem>>, %arg13: memref<2x128xf32, #tpu.memory_space<vmem>>) attributes {dimension_semantics = [#tpu.dimension_semantics<parallel>], iteration_bounds = array<i64: 1>, scalar_prefetch = 0 : i64, scratch_operands = 0 : i64, tpu.core_type = #tpu.core_type<tc>, window_params = [{transform_indices = @transform_0, window_bounds = array<i64: 2, 128, 16>}, {transform_indices = @transform_1, window_bounds = array<i64: 2, 128>}, {transform_indices = @transform_2, window_bounds = array<i64: 2, 128, 128>}, {pipeline_mode = #tpu.pipeline_mode<synchronous>, transform_indices = @transform_3, window_bounds = array<i64: 16, 128>}, {pipeline_mode = #tpu.pipeline_mode<synchronous>, transform_indices = @transform_4, window_bounds = array<i64: 1, 128>}, {pipeline_mode = #tpu.pipeline_mode<synchronous>, transform_indices = @transform_5, window_bounds = array<i64: 128, 384>}, {pipeline_mode = #tpu.pipeline_mode<synchronous>, transform_indices = @transform_6, window_bounds = array<i64: 128, 128>}, {pipeline_mode = #tpu.pipeline_mode<synchronous>, transform_indices = @transform_7, window_bounds = array<i64: 1, 128>}, {pipeline_mode = #tpu.pipeline_mode<synchronous>, transform_indices = @transform_8, window_bounds = array<i64: 1, 128>}, {pipeline_mode = #tpu.pipeline_mode<synchronous>, transform_indices = @transform_9, window_bounds = array<i64: 1, 128>}, {transform_indices = @transform_10, window_bounds = array<i64: 2>}, {transform_indices = @transform_11, window_bounds = array<i64: 2, 128>}, {transform_indices = @transform_12, window_bounds = array<i64: 2, 128>}]} {
    %c0 = arith.constant 0 : index
    %c0_0 = arith.constant 0 : index
    %c0_1 = arith.constant 0 : index
    %0 = vector.load %arg1[%c0, %c0_0, %c0_1] : memref<2x128x16xf32, #tpu.memory_space<vmem>>, vector<2x128x16xf32>
    %1 = vector.shape_cast %0 : vector<2x128x16xf32> to vector<256x16xf32>
    %2 = arith.truncf %1 : vector<256x16xf32> to vector<256x16xbf16>
    %c0_2 = arith.constant 0 : index
    %c0_3 = arith.constant 0 : index
    %3 = vector.load %arg4[%c0_2, %c0_3] : memref<16x128xbf16, #tpu.memory_space<vmem>>, vector<16x128xbf16>
    %cst = arith.constant dense<0.000000e+00> : vector<256x128xf32>
    %4 = tpu.matmul %2, %3, %cst {dimension_numbers = #tpu.dot_dimension_numbers<[1], [0], [0], [1], [0, 0, 1, 1], [], []>} : vector<256x16xbf16>, vector<16x128xbf16>, vector<256x128xf32> -> vector<256x128xf32>
    %c0_4 = arith.constant 0 : index
    %c0_5 = arith.constant 0 : index
    %5 = vector.load %arg5[%c0_4, %c0_5] : memref<1x128xf32, #tpu.memory_space<vmem>>, vector<1x128xf32>
    %6 = vector.broadcast %5 : vector<1x128xf32> to vector<256x128xf32>
    %7 = arith.addf %4, %6 : vector<256x128xf32>
    %cst_6 = arith.constant 0.000000e+00 : f32
    %8 = vector.broadcast %cst_6 : f32 to vector<256x128xf32>
    %9 = arith.maximumf %7, %8 : vector<256x128xf32>
    %10 = arith.truncf %9 : vector<256x128xf32> to vector<256x128xbf16>
    %c0_7 = arith.constant 0 : index
    %c0_8 = arith.constant 0 : index
    %11 = vector.load %arg6[%c0_7, %c0_8] : memref<128x384xbf16, #tpu.memory_space<vmem>>, vector<128x384xbf16>
    %cst_9 = arith.constant dense<0.000000e+00> : vector<256x384xf32>
    %12 = tpu.matmul %10, %11, %cst_9 {dimension_numbers = #tpu.dot_dimension_numbers<[1], [0], [0], [1], [0, 0, 1, 1], [], []>} : vector<256x128xbf16>, vector<128x384xbf16>, vector<256x384xf32> -> vector<256x384xf32>
    %13 = vector.extract_strided_slice %12 {offsets = [0, 0], sizes = [256, 128], strides = [1, 1]} : vector<256x384xf32> to vector<256x128xf32>
    %14 = vector.shape_cast %13 : vector<256x128xf32> to vector<2x128x128xf32>
    %15 = vector.extract_strided_slice %12 {offsets = [0, 128], sizes = [256, 128], strides = [1, 1]} : vector<256x384xf32> to vector<256x128xf32>
    %16 = vector.shape_cast %15 : vector<256x128xf32> to vector<2x128x128xf32>
    %17 = vector.extract_strided_slice %12 {offsets = [0, 256], sizes = [256, 128], strides = [1, 1]} : vector<256x384xf32> to vector<256x128xf32>
    %18 = vector.shape_cast %17 : vector<256x128xf32> to vector<2x128x128xf32>
    %19 = arith.truncf %14 : vector<2x128x128xf32> to vector<2x128x128xbf16>
    %20 = arith.truncf %16 : vector<2x128x128xf32> to vector<2x128x128xbf16>
    "tpu.trace_start"() <{level = 10 : i32, message = "bnk,bmk->bnm"}> : () -> ()
    %cst_10 = arith.constant dense<0.000000e+00> : vector<2x128x128xf32>
    %21 = tpu.matmul %19, %20, %cst_10 {dimension_numbers = #tpu.dot_dimension_numbers<[2], [2], [1], [1], [0, 0, 0, 1, 1, 1], [0], [0]>} : vector<2x128x128xbf16>, vector<2x128x128xbf16>, vector<2x128x128xf32> -> vector<2x128x128xf32>
    "tpu.trace_stop"() : () -> ()
    %cst_11 = arith.constant 0.176776692 : f32
    %22 = vector.broadcast %cst_11 : f32 to vector<2x128x128xf32>
    %23 = arith.mulf %21, %22 : vector<2x128x128xf32>
    %c0_12 = arith.constant 0 : index
    %c0_13 = arith.constant 0 : index
    %c0_14 = arith.constant 0 : index
    %24 = vector.load %arg3[%c0_12, %c0_13, %c0_14] : memref<2x128x128xi8, #tpu.memory_space<vmem>>, vector<2x128x128xi8>
    %c0_i8 = arith.constant 0 : i8
    %25 = vector.broadcast %c0_i8 : i8 to vector<2x128x128xi8>
    %26 = arith.cmpi ne, %24, %25 : vector<2x128x128xi8>
    %cst_15 = arith.constant -1.000000e+09 : f32
    %27 = vector.broadcast %cst_15 : f32 to vector<2x128x128xf32>
    %28 = arith.select %26, %27, %23 : vector<2x128x128xi1>, vector<2x128x128xf32>
    %cst_16 = arith.constant dense<0xFF800000> : vector<2x128xf32>
    %29 = vector.multi_reduction <maximumf>, %28, %cst_16 [2] : vector<2x128x128xf32> to vector<2x128xf32>
    %30 = vector.shape_cast %29 : vector<2x128xf32> to vector<2x128x1xf32>
    %31 = vector.broadcast %30 : vector<2x128x1xf32> to vector<2x128x128xf32>
    %32 = arith.subf %28, %31 : vector<2x128x128xf32>
    %33 = math.exp %32 : vector<2x128x128xf32>
    %cst_17 = arith.constant dense<0.000000e+00> : vector<2x128xf32>
    %34 = vector.multi_reduction <add>, %33, %cst_17 [2] : vector<2x128x128xf32> to vector<2x128xf32>
    %35 = vector.shape_cast %34 : vector<2x128xf32> to vector<2x128x1xf32>
    %cst_18 = arith.constant 1.000000e-30 : f32
    %36 = vector.broadcast %cst_18 : f32 to vector<2x128x1xf32>
    %37 = arith.maximumf %35, %36 : vector<2x128x1xf32>
    %38 = tpu.reciprocal %37 {approx = true} : vector<2x128x1xf32> -> vector<2x128x1xf32>
    %39 = vector.broadcast %38 : vector<2x128x1xf32> to vector<2x128x128xf32>
    %40 = arith.mulf %33, %39 : vector<2x128x128xf32>
    %41 = arith.truncf %40 : vector<2x128x128xf32> to vector<2x128x128xbf16>
    %42 = arith.truncf %18 : vector<2x128x128xf32> to vector<2x128x128xbf16>
    "tpu.trace_start"() <{level = 10 : i32, message = "bnm,bmk->bnk"}> : () -> ()
    %cst_19 = arith.constant dense<0.000000e+00> : vector<2x128x128xf32>
    %43 = tpu.matmul %41, %42, %cst_19 {dimension_numbers = #tpu.dot_dimension_numbers<[2], [1], [1], [2], [0, 0, 0, 1, 1, 2], [0], [0]>} : vector<2x128x128xbf16>, vector<2x128x128xbf16>, vector<2x128x128xf32> -> vector<2x128x128xf32>
    "tpu.trace_stop"() : () -> ()
    %44 = vector.shape_cast %43 : vector<2x128x128xf32> to vector<256x128xf32>
    %45 = arith.truncf %44 : vector<256x128xf32> to vector<256x128xbf16>
    %c0_20 = arith.constant 0 : index
    %c0_21 = arith.constant 0 : index
    %46 = vector.load %arg7[%c0_20, %c0_21] : memref<128x128xbf16, #tpu.memory_space<vmem>>, vector<128x128xbf16>
    %cst_22 = arith.constant dense<0.000000e+00> : vector<256x128xf32>
    %47 = tpu.matmul %45, %46, %cst_22 {dimension_numbers = #tpu.dot_dimension_numbers<[1], [0], [0], [1], [0, 0, 1, 1], [], []>} : vector<256x128xbf16>, vector<128x128xbf16>, vector<256x128xf32> -> vector<256x128xf32>
    %c0_23 = arith.constant 0 : index
    %c0_24 = arith.constant 0 : index
    %48 = vector.load %arg8[%c0_23, %c0_24] : memref<1x128xf32, #tpu.memory_space<vmem>>, vector<1x128xf32>
    %49 = vector.broadcast %48 : vector<1x128xf32> to vector<256x128xf32>
    %50 = arith.addf %47, %49 : vector<256x128xf32>
    %cst_25 = arith.constant 0.000000e+00 : f32
    %51 = vector.broadcast %cst_25 : f32 to vector<256x128xf32>
    %52 = arith.maximumf %50, %51 : vector<256x128xf32>
    %53 = vector.shape_cast %52 : vector<256x128xf32> to vector<2x128x128xf32>
    %c0_26 = arith.constant 0 : index
    %c0_27 = arith.constant 0 : index
    %54 = vector.load %arg2[%c0_26, %c0_27] : memref<2x128xf32, #tpu.memory_space<vmem>>, vector<2x128xf32>
    %c0_28 = arith.constant 0 : index
    %c0_29 = arith.constant 0 : index
    %55 = vector.load %arg9[%c0_28, %c0_29] : memref<1x128xf32, #tpu.memory_space<vmem>>, vector<1x128xf32>
    %56 = vector.shape_cast %55 : vector<1x128xf32> to vector<1x1x128xf32>
    %57 = vector.broadcast %56 : vector<1x1x128xf32> to vector<2x128x128xf32>
    %58 = arith.mulf %53, %57 : vector<2x128x128xf32>
    %cst_30 = arith.constant dense<0.000000e+00> : vector<2x128xf32>
    %59 = vector.multi_reduction <add>, %58, %cst_30 [2] : vector<2x128x128xf32> to vector<2x128xf32>
    %c0_31 = arith.constant 0 : index
    %60 = memref.load %arg11[%c0_31] : memref<2xf32, #tpu.memory_space<smem>>
    %61 = vector.broadcast %60 : f32 to vector<2x128xf32>
    %62 = arith.addf %59, %61 : vector<2x128xf32>
    %cst_32 = arith.constant 5.000000e-01 : f32
    %63 = vector.broadcast %cst_32 : f32 to vector<2x128xf32>
    %64 = arith.cmpf ogt, %54, %63 : vector<2x128xf32>
    %cst_33 = arith.constant -1.000000e+09 : f32
    %65 = vector.broadcast %cst_33 : f32 to vector<2x128xf32>
    %66 = arith.select %64, %62, %65 : vector<2x128xi1>, vector<2x128xf32>
    %cst_34 = arith.constant dense<0xFF800000> : vector<2xf32>
    %67 = vector.multi_reduction <maximumf>, %66, %cst_34 [1] : vector<2x128xf32> to vector<2xf32>
    %68 = vector.shape_cast %67 : vector<2xf32> to vector<2x1xf32>
    %69 = vector.broadcast %68 : vector<2x1xf32> to vector<2x128xf32>
    %70 = arith.subf %66, %69 : vector<2x128xf32>
    %71 = math.exp %70 : vector<2x128xf32>
    %cst_35 = arith.constant dense<0.000000e+00> : vector<2xf32>
    %72 = vector.multi_reduction <add>, %71, %cst_35 [1] : vector<2x128xf32> to vector<2xf32>
    %73 = vector.shape_cast %72 : vector<2xf32> to vector<2x1xf32>
    %cst_36 = arith.constant 1.000000e-30 : f32
    %74 = vector.broadcast %cst_36 : f32 to vector<2x1xf32>
    %75 = arith.maximumf %73, %74 : vector<2x1xf32>
    %76 = tpu.reciprocal %75 {approx = true} : vector<2x1xf32> -> vector<2x1xf32>
    %77 = vector.broadcast %76 : vector<2x1xf32> to vector<2x128xf32>
    %78 = arith.mulf %71, %77 : vector<2x128xf32>
    %c0_37 = arith.constant 0 : index
    %c0_38 = arith.constant 0 : index
    %79 = vector.load %arg12[%c0_37, %c0_38] : memref<2x128xf32, #tpu.memory_space<vmem>>, vector<2x128xf32>
    tpu.vector_store %arg12[%c0_37, %c0_38], %78 {strides = array<i32>} : memref<2x128xf32, #tpu.memory_space<vmem>>, vector<2x128xf32>,
    %c0_39 = arith.constant 0 : index
    %c0_40 = arith.constant 0 : index
    %80 = vector.load %arg10[%c0_39, %c0_40] : memref<1x128xf32, #tpu.memory_space<vmem>>, vector<1x128xf32>
    %81 = vector.shape_cast %80 : vector<1x128xf32> to vector<1x1x128xf32>
    %82 = vector.broadcast %81 : vector<1x1x128xf32> to vector<2x128x128xf32>
    %83 = arith.mulf %53, %82 : vector<2x128x128xf32>
    %cst_41 = arith.constant dense<0.000000e+00> : vector<2x128xf32>
    %84 = vector.multi_reduction <add>, %83, %cst_41 [2] : vector<2x128x128xf32> to vector<2x128xf32>
    %cst_42 = arith.constant dense<0.000000e+00> : vector<2xf32>
    %85 = vector.multi_reduction <add>, %54, %cst_42 [1] : vector<2x128xf32> to vector<2xf32>
    %86 = vector.shape_cast %85 : vector<2xf32> to vector<2x1xf32>
    %cst_43 = arith.constant 1.000000e+00 : f32
    %87 = vector.broadcast %cst_43 : f32 to vector<2x1xf32>
    %88 = arith.maximumf %86, %87 : vector<2x1xf32>
    %89 = arith.mulf %84, %54 : vector<2x128xf32>
    %cst_44 = arith.constant dense<0.000000e+00> : vector<2xf32>
    %90 = vector.multi_reduction <add>, %89, %cst_44 [1] : vector<2x128xf32> to vector<2xf32>
    %91 = vector.shape_cast %90 : vector<2xf32> to vector<2x1xf32>
    %92 = tpu.reciprocal %88 {approx = true} : vector<2x1xf32> -> vector<2x1xf32>
    %93 = arith.mulf %91, %92 : vector<2x1xf32>
    %c1 = arith.constant 1 : index
    %94 = memref.load %arg11[%c1] : memref<2xf32, #tpu.memory_space<smem>>
    %95 = vector.broadcast %94 : f32 to vector<2x1xf32>
    %96 = arith.addf %93, %95 : vector<2x1xf32>
    %97 = vector.shape_cast %96 : vector<2x1xf32> to vector<2x1xf32>
    %98 = vector.broadcast %97 : vector<2x1xf32> to vector<2x128xf32>
    %c0_45 = arith.constant 0 : index
    %c0_46 = arith.constant 0 : index
    %99 = vector.load %arg13[%c0_45, %c0_46] : memref<2x128xf32, #tpu.memory_space<vmem>>, vector<2x128xf32>
    tpu.vector_store %arg13[%c0_45, %c0_46], %98 {strides = array<i32>} : memref<2x128xf32, #tpu.memory_space<vmem>>, vector<2x128xf32>,
    return
  }
  func.func @transform_0(%arg0: i32) -> (i32, i32, i32) {
    %c0_i32 = arith.constant 0 : i32
    %c0_i32_0 = arith.constant 0 : i32
    %c0_i32_1 = arith.constant 0 : i32
    return %arg0, %c0_i32, %c0_i32_0 : i32, i32, i32
  }
  func.func @transform_1(%arg0: i32) -> (i32, i32) {
    %c0_i32 = arith.constant 0 : i32
    %c0_i32_0 = arith.constant 0 : i32
    return %arg0, %c0_i32 : i32, i32
  }
  func.func @transform_2(%arg0: i32) -> (i32, i32, i32) {
    %c0_i32 = arith.constant 0 : i32
    %c0_i32_0 = arith.constant 0 : i32
    %c0_i32_1 = arith.constant 0 : i32
    return %arg0, %c0_i32, %c0_i32_0 : i32, i32, i32
  }
  func.func @transform_3(%arg0: i32) -> (i32, i32) {
    %c0_i32 = arith.constant 0 : i32
    %c0_i32_0 = arith.constant 0 : i32
    %c0_i32_1 = arith.constant 0 : i32
    return %c0_i32, %c0_i32_0 : i32, i32
  }
  func.func @transform_4(%arg0: i32) -> (i32, i32) {
    %c0_i32 = arith.constant 0 : i32
    %c0_i32_0 = arith.constant 0 : i32
    %c0_i32_1 = arith.constant 0 : i32
    return %c0_i32, %c0_i32_0 : i32, i32
  }
  func.func @transform_5(%arg0: i32) -> (i32, i32) {
    %c0_i32 = arith.constant 0 : i32
    %c0_i32_0 = arith.constant 0 : i32
    %c0_i32_1 = arith.constant 0 : i32
    return %c0_i32, %c0_i32_0 : i32, i32
  }
  func.func @transform_6(%arg0: i32) -> (i32, i32) {
    %c0_i32 = arith.constant 0 : i32
    %c0_i32_0 = arith.constant 0 : i32
    %c0_i32_1 = arith.constant 0 : i32
    return %c0_i32, %c0_i32_0 : i32, i32
  }
  func.func @transform_7(%arg0: i32) -> (i32, i32) {
    %c0_i32 = arith.constant 0 : i32
    %c0_i32_0 = arith.constant 0 : i32
    %c0_i32_1 = arith.constant 0 : i32
    return %c0_i32, %c0_i32_0 : i32, i32
  }
  func.func @transform_8(%arg0: i32) -> (i32, i32) {
    %c0_i32 = arith.constant 0 : i32
    %c0_i32_0 = arith.constant 0 : i32
    %c0_i32_1 = arith.constant 0 : i32
    return %c0_i32, %c0_i32_0 : i32, i32
  }
  func.func @transform_9(%arg0: i32) -> (i32, i32) {
    %c0_i32 = arith.constant 0 : i32
    %c0_i32_0 = arith.constant 0 : i32
    %c0_i32_1 = arith.constant 0 : i32
    return %c0_i32, %c0_i32_0 : i32, i32
  }
  func.func @transform_10(%arg0: i32) -> i32 {
    %c0_i32 = arith.constant 0 : i32
    %c0_i32_0 = arith.constant 0 : i32
    return %c0_i32 : i32
  }
  func.func @transform_11(%arg0: i32) -> (i32, i32) {
    %c0_i32 = arith.constant 0 : i32
    %c0_i32_0 = arith.constant 0 : i32
    return %arg0, %c0_i32 : i32, i32
  }
  func.func @transform_12(%arg0: i32) -> (i32, i32) {
    %c0_i32 = arith.constant 0 : i32
    %c0_i32_0 = arith.constant 0 : i32
    return %arg0, %c0_i32 : i32, i32
  }
}

</mosaic_0001>

<bundles_post_ra>
// kernel: ppo_forward.1
= control target key start
LH: loop header
LB: loop body
LE: loop exit
PB: predicated region body
PF: predicated region fallthrough
CT: control target
= control target key end

     0   :  { %18 = vsyncpa [#allocation4], 0  ;;  %s5388_s0 = inlined_call_operand.vmem [shape: f32[2,128,16], index: 0, kind: input, shape index: {}]   ;;  %s5389_s1 = inlined_call_operand.vmem [shape: f32[2,128], index: 1, kind: input, shape index: {}]   ;;  %s5390_s2 = inlined_call_operand.vmem [shape: s8[2,128,128], index: 2, kind: input, shape index: {}]   ;;  %s5391_s3 = inlined_call_operand.vmem [shape: bf16[16,128], index: 3, kind: input, shape index: {}]   ;;  %s5392_s4 = inlined_call_operand.vmem [shape: f32[1,128], index: 4, kind: input, shape index: {}]   ;;  %s5393_s5 = inlined_call_operand.vmem [shape: bf16[128,384], index: 5, kind: input, shape index: {}]   ;;  %s5394_s6 = inlined_call_operand.vmem [shape: bf16[128,128], index: 6, kind: input, shape index: {}]   ;;  %s5395_s7 = inlined_call_operand.vmem [shape: f32[1,128], index: 7, kind: input, shape index: {}]   ;;  %s5396_s8 = inlined_call_operand.vmem [shape: f32[1,128], index: 8, kind: input, shape index: {}]   ;;  %s5397_s9 = inlined_call_operand.vmem [shape: f32[1,128], index: 9, kind: input, shape index: {}]   ;;  %s5398_s10 = inlined_call_operand.vmem [shape: f32[2], index: 10, kind: input, shape index: {}]   ;;  %s5399_s11 = inlined_call_operand.hbm [shape: f32[2,128], index: 11, kind: output, shape index: {0}]   ;;  %s5400_s12 = inlined_call_operand.vmem [shape: f32[2,128], index: 12, kind: output, shape index: {1}]  }
   0x1   :  { %19 = vsyncpa [#allocation3], 0  ;;  %s46_s23 = sshll.u32 %s5398_s10, 4  ;;  %s47_s23 = int_to_ptr.vmem [resolvable:$true] %s46_s23 }
   0x2   :  { %s3881_s24 = scalar_lea.vmem %s47_s23, 16  ;;  %p3886_p1 = scmp.lt.s32.totalorder %s47_s23, %s47_s23 }
   0x3   :  { %p3882_p0 = scmp.ne.s32.totalorder %s47_s23, %s3881_s24  ;;  %p3887_p2 = scmp.lt.s32.totalorder %s3881_s24, %s3881_s24 }
   0x5   :  { %p3888_p3 = por %p3887_p2, %p3886_p1 }
   0x7   :  { %p3889_p4 = pnand %p3888_p3, %p3882_p0 }
   0x9   :  { %3892 = shalt.err (!%p3889_p4)
}
   0xa   :  { %s3919_s25 = smov [#allocation2]  }
   0xb   :  { %49 = dma.vmem_to_smem %s47_s23, 16, %s3919_s25, [#allocation4]  }
   0xc   :  { %3915 = dma.done.wait [#allocation4], 16  }
   0xd   :  { %3916 = vsyncadd [#allocation4], 4294967280 }
   0xe   :  { %53 = sfence }
   0xf   :  { %v3705_v0 = vld [vmem:[%s5391_s3] sm:$0xff]   ;;  %v58_v2 = vld [vmem:[%s5388_s0 + $0x8] sm:$0xff]  ;;  %vm120_vm0 = vcmask 130048   ;;  %v59_v3 = vld [vmem:[%s5388_s0 + $0x10] sm:$0xff]  ;;  %s3921_s14 = smov [#allocation5]  }
  0x10   :  { %v57_v1 = vld [vmem:[%s5388_s0] sm:$0xff]  ;;  %3440 = vmatprep.subr.bf16.mxu0 %v3705_v0  ;;  %v60_v5 = vld [vmem:[%s5388_s0 + $0x18] sm:$0xff]  ;;  %v62_v7 = vld [vmem:[%s5388_s0 + $0x28] sm:$0xff]  ;;  %3698 = vmatprep.subr.bf16.mxu1 %v3705_v0 }
  0x11   :  { %v89_v4 = vpack.c.bf16 %v58_v2, %v57_v1  ;;  %v61_v6 = vld [vmem:[%s5388_s0 + $0x20] sm:$0xff]  ;;  %3441 = vmatpush3.bf16.msra.mxu0 %v3705_v0  ;;  %v90_v8 = vpack.c.bf16 %v60_v5, %v59_v3  ;;  %3699 = vmatpush3.bf16.msra.mxu1 %v3705_v0  ;;  %v63_v10 = vld [vmem:[%s5388_s0 + $0x30] sm:$0xff]  ;;  %v64_v11 = vld [vmem:[%s5388_s0 + $0x38] sm:$0xff] }
  0x12   :  { %v91_v9 = vpack.c.bf16 %v62_v7, %v61_v6  ;;  %v73_v12 = vld [vmem:[%s5388_s0 + $0x80] sm:$0xff]  ;;  %v74_v13 = vld [vmem:[%s5388_s0 + $0x88] sm:$0xff]  ;;  %v75_v15 = vld [vmem:[%s5388_s0 + $0x90] sm:$0xff]  ;;  %v92_v23 = vpack.c.bf16 %v64_v11, %v63_v10 }
  0x13   :  { %3442 = vmatprep.mubr.msk.bf16.mxu0 %vm120_vm0, %v89_v4  ;;  %v97_v14 = vpack.c.bf16 %v74_v13, %v73_v12  ;;  %v76_v16 = vld [vmem:[%s5388_s0 + $0x98] sm:$0xff]  ;;  %v77_v17 = vld [vmem:[%s5388_s0 + $0xa0] sm:$0xff]  ;;  %v66_v19 = vld [vmem:[%s5388_s0 + $0x48] sm:$0xff] }
  0x14   :  { %3443 = vmatmul.mubr.msk.bf16.vlgmr.msra.gmra.mrb[0].mxu0 %vm120_vm0, %v90_v8  ;;  %v65_v18 = vld [vmem:[%s5388_s0 + $0x40] sm:$0xff]  ;;  %v98_v20 = vpack.c.bf16 %v76_v16, %v75_v15  ;;  %v78_v21 = vld [vmem:[%s5388_s0 + $0xa8] sm:$0xff]  ;;  %v79_v24 = vld [vmem:[%s5388_s0 + $0xb0] sm:$0xff] }
  0x15   :  { %3446 = vmatprep.mubr.msk.bf16.mxu0 %vm120_vm0, %v91_v9  ;;  %3458 = vmatprep.mubr.msk.bf16.mxu1 %vm120_vm0, %v97_v14  ;;  %v99_v22 = vpack.c.bf16 %v78_v21, %v77_v17  ;;  %v80_v25 = vld [vmem:[%s5388_s0 + $0xb8] sm:$0xff]  ;;  %v93_v26 = vpack.c.bf16 %v66_v19, %v65_v18  ;;  %v81_v27 = vld [vmem:[%s5388_s0 + $0xc0] sm:$0xff]  ;;  %v82_v28 = vld [vmem:[%s5388_s0 + $0xc8] sm:$0xff]  ;;  %v3920_v9 = vmov 0  }
  0x16   :  { %3459 = vmatmul.mubr.msk.bf16.vlgmr.msra.gmra.mrb[0].mxu1 %vm120_vm0, %v98_v20  ;;  %v3706_v29 = vld [vmem:[%s5393_s5] ss:$12 sps:$4 sm:$0xff]   ;;  %v3708_v30 = vld [vmem:[%s5393_s5 + $0x4] ss:$12 sps:$4 sm:$0xff]   ;;  %v68_v32 = vld [vmem:[%s5388_s0 + $0x58] sm:$0xff]  ;;  %v100_v36 = vpack.c.bf16 %v80_v25, %v79_v24  ;;  %v101_v38 = vpack.c.bf16 %v82_v28, %v81_v27  ;;  %3704 = vset.pattern.permute.xlu0 %v3920_v9 }
  0x17   :  { %3462 = vmatprep.mubr.msk.bf16.mxu1 %vm120_vm0, %v99_v22  ;;  %v67_v31 = vld [vmem:[%s5388_s0 + $0x50] sm:$0xff]  ;;  %v69_v34 = vld [vmem:[%s5388_s0 + $0x60] sm:$0xff]  ;;  %v70_v35 = vld [vmem:[%s5388_s0 + $0x68] sm:$0xff]  ;;  %538 = vmatprep.subr.bf16.mxu1 %v3708_v30 }
  0x18   :  { %v3709_v33 = vld [vmem:[%s5393_s5 + $0x8] ss:$12 sps:$4 sm:$0xff]   ;;  %v3710_v37 = vld [vmem:[%s5393_s5 + $0x18] ss:$12 sps:$4 sm:$0xff]   ;;  %539 = vmatpush1.bf16.msra.mxu1 %v3706_v29  ;;  %v3713_v40 = vld [vmem:[%s5393_s5 + $0x20] ss:$12 sps:$4 sm:$0xff]   ;;  %v94_v44 = vpack.c.bf16 %v68_v32, %v67_v31  ;;  %v95_v47 = vpack.c.bf16 %v70_v35, %v69_v34  ;;  %3703 = vset.pattern.permute.xlu1 %v3920_v9 }
  0x19   :  { %v3712_v39 = vld [vmem:[%s5393_s5 + $0x1c] ss:$12 sps:$4 sm:$0xff]   ;;  %3474 = vmatprep.subr.bf16.mxu0 %v3709_v33  ;;  %v83_v41 = vld [vmem:[%s5388_s0 + $0xd0] sm:$0xff]  ;;  %v85_v45 = vld [vmem:[%s5388_s0 + $0xe0] sm:$0xff] }
  0x1a   :  { %v84_v42 = vld [vmem:[%s5388_s0 + $0xd8] sm:$0xff]  ;;  %3475 = vmatpush3.bf16.msra.mxu0 %v3709_v33  ;;  %540 = vmatprep.subr.bf16.mxu1 %v3712_v39  ;;  %v3716_v43 = vld [vmem:[%s5393_s5 + $0x34] ss:$12 sps:$4 sm:$0xff]   ;;  %v86_v48 = vld [vmem:[%s5388_s0 + $0xe8] sm:$0xff] }
  0x1b   :  { %3476 = vmatprep.subr.bf16.mxu0 %v3713_v40  ;;  %v3717_v46 = vld [vmem:[%s5393_s5 + $0x38] ss:$12 sps:$4 sm:$0xff]   ;;  %v3714_v49 = vld [vmem:[%s5393_s5 + $0x30] ss:$12 sps:$4 sm:$0xff]   ;;  %v102_v53 = vpack.c.bf16 %v84_v42, %v83_v41  ;;  %v103_v55 = vpack.c.bf16 %v86_v48, %v85_v45  ;;  %v3718_v56 = vld [vmem:[%s5393_s5 + $0x48] ss:$12 sps:$4 sm:$0xff]  }
  0x1c   :  { %3447 = vmatmul.mubr.msk.bf16.gmra.mrb[4].mxu0 %vm120_vm0, %v92_v23  ;;  %541 = vmatpush1.bf16.msra.mxu1 %v3710_v37  ;;  %v3720_v50 = vld [vmem:[%s5393_s5 + $0x4c] ss:$12 sps:$4 sm:$0xff]   ;;  %v71_v51 = vld [vmem:[%s5388_s0 + $0x70] sm:$0xff]  ;;  %v3728_v63 = vld [vmem:[%s5393_s5 + $0x7c] ss:$12 sps:$4 sm:$0xff]  }
  0x1d   :  { %3450 = vmatprep.mubr.msk.bf16.mxu0 %vm120_vm0, %v93_v26  ;;  %542 = vmatprep.subr.bf16.mxu1 %v3716_v43  ;;  %v72_v52 = vld [vmem:[%s5388_s0 + $0x78] sm:$0xff]  ;;  %v3724_v57 = vld [vmem:[%s5393_s5 + $0x64] ss:$12 sps:$4 sm:$0xff]   ;;  %v3722_v60 = vld [vmem:[%s5393_s5 + $0x60] ss:$12 sps:$4 sm:$0xff]  }
  0x1e   :  { %3463 = vmatmul.mubr.msk.bf16.gmra.mrb[4].mxu1 %vm120_vm0, %v100_v36  ;;  %3477 = vmatpush3.bf16.msra.mxu0 %v3713_v40  ;;  %v3721_v54 = vld [vmem:[%s5393_s5 + $0x50] ss:$12 sps:$4 sm:$0xff]   ;;  %v3725_v61 = vld [vmem:[%s5393_s5 + $0x68] ss:$12 sps:$4 sm:$0xff]   ;;  %v96_v62 = vpack.c.bf16 %v72_v52, %v71_v51  ;;  %v3729_v0 = vld [vmem:[%s5393_s5 + $0x80] ss:$12 sps:$4 sm:$0xff]  }
  0x1f   :  { %3466 = vmatprep.mubr.msk.bf16.mxu1 %vm120_vm0, %v101_v38  ;;  %3478 = vmatprep.subr.bf16.mxu0 %v3717_v46  ;;  %v87_v58 = vld [vmem:[%s5388_s0 + $0xf0] sm:$0xff]  ;;  %v88_v59 = vld [vmem:[%s5388_s0 + $0xf8] sm:$0xff]  ;;  %v4183_v10 = vld [vmem:[%s5392_s4] ss:$0 sm:$0xff] }
  0x20   :  { %543 = vmatpush1.bf16.msra.mxu1 %v3714_v49  ;;  %v3726_v1 = vld [vmem:[%s5393_s5 + $0x78] ss:$12 sps:$4 sm:$0xff]   ;;  %v104_v2 = vpack.c.bf16 %v88_v59, %v87_v58  ;;  %v3732_v3 = vld [vmem:[%s5393_s5 + $0x94] ss:$12 sps:$4 sm:$0xff]   ;;  %v3730_v4 = vld [vmem:[%s5393_s5 + $0x90] ss:$12 sps:$4 sm:$0xff]  }
  0x21   :  { %544 = vmatprep.subr.bf16.mxu1 %v3720_v50  ;;  %v3733_v5 = vld [vmem:[%s5393_s5 + $0x98] ss:$12 sps:$4 sm:$0xff]   ;;  %v3734_v7 = vld [vmem:[%s5393_s5 + $0xa8] ss:$12 sps:$4 sm:$0xff]   ;;  %v3737_v8 = vld [vmem:[%s5393_s5 + $0xb0] ss:$12 sps:$4 sm:$0xff]  }
  0x22   :  { %3479 = vmatpush3.bf16.msra.mxu0 %v3717_v46  ;;  %v3736_v6 = vld [vmem:[%s5393_s5 + $0xac] ss:$12 sps:$4 sm:$0xff]  }
  0x23   :  { %3480 = vmatprep.subr.bf16.mxu0 %v3721_v54 }
  0x24   :  { %3451 = vmatmul.mubr.msk.bf16.gmra.mrb[8].mxu0 %vm120_vm0, %v94_v44  ;;  %545 = vmatpush1.bf16.msra.mxu1 %v3718_v56 }
  0x25   :  { %3454 = vmatprep.mubr.msk.bf16.mxu0 %vm120_vm0, %v95_v47  ;;  %546 = vmatprep.subr.bf16.mxu1 %v3724_v57 }
  0x26   :  { %3467 = vmatmul.mubr.msk.bf16.gmra.mrb[8].mxu1 %vm120_vm0, %v102_v53  ;;  %3481 = vmatpush3.bf16.msra.mxu0 %v3721_v54 }
  0x27   :  { %3470 = vmatprep.mubr.msk.bf16.mxu1 %vm120_vm0, %v103_v55  ;;  %3482 = vmatprep.subr.bf16.mxu0 %v3725_v61 }
  0x28   :  { %547 = vmatpush1.bf16.msra.mxu1 %v3722_v60 }
  0x29   :  { %548 = vmatprep.subr.bf16.mxu1 %v3728_v63 }
  0x2a   :  { %3483 = vmatpush3.bf16.msra.mxu0 %v3725_v61 }
  0x2b   :  { %3484 = vmatprep.subr.bf16.mxu0 %v3729_v0 }
  0x2c   :  { %3455 = vmatmul.mubr.msk.bf16.gmra.mrb[12].mxu0 %vm120_vm0, %v96_v62  ;;  %549 = vmatpush1.bf16.msra.mxu1 %v3726_v1 }
  0x2d   :  { %550 = vmatprep.subr.bf16.mxu1 %v3732_v3 }
  0x2e   :  { %3471 = vmatmul.mubr.msk.bf16.gmra.mrb[12].mxu1 %vm120_vm0, %v104_v2  ;;  %3485 = vmatpush3.bf16.msra.mxu0 %v3729_v0 }
  0x2f   :  { %3486 = vmatprep.subr.bf16.mxu0 %v3733_v5  ;;  %570 = vmatprep.mubr.bf16.mxu1 %v3920_v9 }
  0x30   :  { %551 = vmatpush1.bf16.msra.mxu1 %v3730_v4 }
  0x31   :  { %552 = vmatprep.subr.bf16.mxu1 %v3736_v6 }
  0x32   :  { %3487 = vmatpush3.bf16.msra.mxu0 %v3733_v5 }
  0x33   :  { %3488 = vmatprep.subr.bf16.mxu0 %v3737_v8 }
  0x34   :  { %553 = vmatpush1.bf16.msra.mxu1 %v3734_v7 }
  0x36   :  { %3489 = vmatpush3.bf16.msra.mxu0 %v3737_v8 }
  0xe7   :  { %v3444_v11 = vpop.f32.mrb[0].mxu0 }
  0xe8   :  { %v212_v12 = vadd.f32 %v3444_v11, %v4183_v10  ;;  %v203_v13 = vpop.f32.mrb[1].mxu0 }
  0xe9   :  { %v204_v14 = vadd.f32 %v4183_v10, %v203_v13  ;;  %v3445_v15 = vpop.f32.mrb[2].mxu0  ;;  %v3460_v19 = vpop.f32.mrb[0].mxu1 }
  0xea   :  { %v215_v16 = vadd.f32 %v3445_v15, %v4183_v10  ;;  %v206_v17 = vpop.f32.mrb[3].mxu0  ;;  %v332_v20 = vmax.f32 %v212_v12, 0.0  ;;  %v276_v22 = vadd.f32 %v3460_v19, %v4183_v10  ;;  %v267_v23 = vpop.f32.mrb[1].mxu1 }
  0xeb   :  { %v207_v18 = vadd.f32 %v4183_v10, %v206_v17  ;;  %v330_v24 = vmax.f32 %v204_v14, 0.0  ;;  %v268_v26 = vadd.f32 %v4183_v10, %v267_v23  ;;  %v3461_v27 = vpop.f32.mrb[2].mxu1 }
  0xec   :  { %v333_v21 = vmax.f32 %v215_v16, 0.0  ;;  %v348_v29 = vmax.f32 %v276_v22, 0.0  ;;  %v279_v30 = vadd.f32 %v3461_v27, %v4183_v10  ;;  %v270_v31 = vpop.f32.mrb[3].mxu1 }
  0xed   :  { %v331_v25 = vmax.f32 %v207_v18, 0.0  ;;  %v346_v34 = vmax.f32 %v268_v26, 0.0  ;;  %v271_v35 = vadd.f32 %v4183_v10, %v270_v31 }
  0xee   :  { %v363_v28 = vpack.c.bf16 %v333_v21, %v332_v20  ;;  %v349_v38 = vmax.f32 %v279_v30, 0.0 }
  0xef   :  { %v362_v32 = vpack.c.bf16 %v331_v25, %v330_v24  ;;  %v3448_v33 = vpop.f32.mrb[4].mxu0  ;;  %v347_v41 = vmax.f32 %v271_v35, 0.0 }
  0xf0   :  { %v228_v36 = vadd.f32 %v3448_v33, %v4183_v10  ;;  %v219_v37 = vpop.f32.mrb[5].mxu0  ;;  %v4197_v45 = vpack.c.bf16 %v349_v38, %v348_v29 }
  0xf1   :  { %v220_v39 = vadd.f32 %v4183_v10, %v219_v37  ;;  %571 = vmatmul.mubr.bf16.vlgmr.msra.gmra.mrb[16].mxu1 %v362_v32  ;;  %3490 = vmatprep.mubr.bf16.mxu0 %v362_v32  ;;  %v3449_v40 = vpop.f32.mrb[6].mxu0  ;;  %v4200_v48 = vpack.c.bf16 %v347_v41, %v346_v34  ;;  %v3464_v49 = vpop.f32.mrb[4].mxu1 }
  0xf2   :  { %v336_v42 = vmax.f32 %v228_v36, 0.0  ;;  %v231_v43 = vadd.f32 %v3449_v40, %v4183_v10  ;;  %3491 = vmatmul.mubr.bf16.vlgmr.msra.gmra.mrb[16].mxu0 %v363_v28  ;;  %v222_v44 = vpop.f32.mrb[7].mxu0  ;;  %580 = vmatprep.mubr.bf16.mxu1 %v3920_v9  ;;  %v292_v51 = vadd.f32 %v3464_v49, %v4183_v10  ;;  %v283_v52 = vpop.f32.mrb[5].mxu1 }
  0xf3   :  { %v334_v46 = vmax.f32 %v220_v39, 0.0  ;;  %v223_v47 = vadd.f32 %v4183_v10, %v222_v44  ;;  %v284_v54 = vadd.f32 %v4183_v10, %v283_v52  ;;  %v3465_v55 = vpop.f32.mrb[6].mxu1 }
  0xf4   :  { %v337_v50 = vmax.f32 %v231_v43, 0.0  ;;  %v352_v57 = vmax.f32 %v292_v51, 0.0  ;;  %v295_v58 = vadd.f32 %v3465_v55, %v4183_v10  ;;  %v286_v59 = vpop.f32.mrb[7].mxu1 }
  0xf5   :  { %v335_v53 = vmax.f32 %v223_v47, 0.0  ;;  %v350_v62 = vmax.f32 %v284_v54, 0.0  ;;  %v287_v63 = vadd.f32 %v4183_v10, %v286_v59 }
  0xf6   :  { %v4204_v56 = vpack.c.bf16 %v337_v50, %v336_v42  ;;  %v353_v2 = vmax.f32 %v295_v58, 0.0 }
  0xf7   :  { %v364_v60 = vpack.c.bf16 %v335_v53, %v334_v46  ;;  %v3452_v61 = vpop.f32.mrb[8].mxu0  ;;  %v351_v5 = vmax.f32 %v287_v63, 0.0 }
  0xf8   :  { %v244_v0 = vadd.f32 %v3452_v61, %v4183_v10  ;;  %v235_v1 = vpop.f32.mrb[9].mxu0  ;;  %v4213_v11 = vpack.c.bf16 %v353_v2, %v352_v57 }
  0xf9   :  { %581 = vmatmul.mubr.bf16.gmra.mrb[20].mxu1 %v363_v28  ;;  %3494 = vmatprep.mubr.bf16.mxu0 %v364_v60  ;;  %v236_v3 = vadd.f32 %v4183_v10, %v235_v1  ;;  %v3453_v4 = vpop.f32.mrb[10].mxu0  ;;  %v4216_v14 = vpack.c.bf16 %v351_v5, %v350_v62  ;;  %v3468_v15 = vpop.f32.mrb[8].mxu1 }
  0xfa   :  { %3495 = vmatmul.mubr.bf16.gmra.mrb[20].mxu0 %v4204_v56  ;;  %v340_v6 = vmax.f32 %v244_v0, 0.0  ;;  %590 = vmatprep.mubr.bf16.mxu1 %v3920_v9  ;;  %v247_v7 = vadd.f32 %v3453_v4, %v4183_v10  ;;  %v238_v8 = vpop.f32.mrb[11].mxu0  ;;  %v308_v17 = vadd.f32 %v3468_v15, %v4183_v10  ;;  %v299_v18 = vpop.f32.mrb[9].mxu1 }
  0xfb   :  { %v338_v12 = vmax.f32 %v236_v3, 0.0  ;;  %v239_v13 = vadd.f32 %v4183_v10, %v238_v8  ;;  %v300_v20 = vadd.f32 %v4183_v10, %v299_v18  ;;  %v3469_v21 = vpop.f32.mrb[10].mxu1 }
  0xfc   :  { %v341_v16 = vmax.f32 %v247_v7, 0.0  ;;  %v356_v23 = vmax.f32 %v308_v17, 0.0  ;;  %v311_v24 = vadd.f32 %v3469_v21, %v4183_v10  ;;  %v302_v25 = vpop.f32.mrb[11].mxu1 }
  0xfd   :  { %v339_v19 = vmax.f32 %v239_v13, 0.0  ;;  %v354_v28 = vmax.f32 %v300_v20, 0.0  ;;  %v303_v29 = vadd.f32 %v4183_v10, %v302_v25 }
  0xfe   :  { %v367_v22 = vpack.c.bf16 %v341_v16, %v340_v6  ;;  %v357_v32 = vmax.f32 %v311_v24, 0.0 }
  0xff   :  { %v366_v26 = vpack.c.bf16 %v339_v19, %v338_v12  ;;  %v3456_v27 = vpop.f32.mrb[12].mxu0  ;;  %v355_v35 = vmax.f32 %v303_v29, 0.0 }
 0x100   :  { %v260_v30 = vadd.f32 %v3456_v27, %v4183_v10  ;;  %v251_v31 = vpop.f32.mrb[13].mxu0  ;;  %v375_v39 = vpack.c.bf16 %v357_v32, %v356_v23 }
 0x101   :  { %591 = vmatmul.mubr.bf16.gmra.mrb[24].mxu1 %v364_v60  ;;  %3498 = vmatprep.mubr.bf16.mxu0 %v366_v26  ;;  %v252_v33 = vadd.f32 %v4183_v10, %v251_v31  ;;  %v3457_v34 = vpop.f32.mrb[14].mxu0  ;;  %v374_v42 = vpack.c.bf16 %v355_v35, %v354_v28  ;;  %v3472_v43 = vpop.f32.mrb[12].mxu1 }
 0x102   :  { %600 = vmatprep.mubr.bf16.mxu1 %v3920_v9  ;;  %3499 = vmatmul.mubr.bf16.gmra.mrb[24].mxu0 %v367_v22  ;;  %v344_v36 = vmax.f32 %v260_v30, 0.0  ;;  %v263_v37 = vadd.f32 %v3457_v34, %v4183_v10  ;;  %v254_v38 = vpop.f32.mrb[15].mxu0  ;;  %v324_v46 = vadd.f32 %v3472_v43, %v4183_v10  ;;  %v315_v47 = vpop.f32.mrb[13].mxu1 }
 0x103   :  { %v342_v40 = vmax.f32 %v252_v33, 0.0  ;;  %v255_v41 = vadd.f32 %v4183_v10, %v254_v38  ;;  %v316_v50 = vadd.f32 %v4183_v10, %v315_v47  ;;  %v3473_v51 = vpop.f32.mrb[14].mxu1 }
 0x104   :  { %v345_v44 = vmax.f32 %v263_v37, 0.0  ;;  %v360_v53 = vmax.f32 %v324_v46, 0.0  ;;  %v327_v54 = vadd.f32 %v3473_v51, %v4183_v10  ;;  %v318_v55 = vpop.f32.mrb[15].mxu1 }
 0x105   :  { %v343_v49 = vmax.f32 %v255_v41, 0.0  ;;  %v358_v58 = vmax.f32 %v316_v50, 0.0  ;;  %v319_v59 = vadd.f32 %v4183_v10, %v318_v55 }
 0x106   :  { %v369_v52 = vpack.c.bf16 %v345_v44, %v344_v36  ;;  %v361_v60 = vmax.f32 %v327_v54, 0.0 }
 0x107   :  { %v368_v57 = vpack.c.bf16 %v343_v49, %v342_v40  ;;  %v359_v61 = vmax.f32 %v319_v59, 0.0 }
 0x108   :  { %v377_v62 = vpack.c.bf16 %v361_v60, %v360_v53 }
 0x109   :  { %601 = vmatmul.mubr.bf16.gmra.mrb[28].mxu1 %v4204_v56  ;;  %3502 = vmatprep.mubr.bf16.mxu0 %v368_v57  ;;  %v376_v63 = vpack.c.bf16 %v359_v61, %v358_v58 }
 0x10a   :  { %610 = vmatprep.mubr.bf16.mxu1 %v3920_v9  ;;  %3503 = vmatmul.mubr.bf16.gmra.mrb[28].mxu0 %v369_v52 }
 0x10b   :  { %3506 = vmatprep.mubr.bf16.mxu0 %v4200_v48 }
 0x111   :  { %611 = vmatmul.mubr.bf16.gmra.mrb[32].mxu1 %v366_v26 }
 0x112   :  { %620 = vmatprep.mubr.bf16.mxu1 %v3920_v9  ;;  %3507 = vmatmul.mubr.bf16.gmra.mrb[32].mxu0 %v4197_v45 }
 0x113   :  { %3510 = vmatprep.mubr.bf16.mxu0 %v4216_v14 }
 0x119   :  { %621 = vmatmul.mubr.bf16.gmra.mrb[36].mxu1 %v367_v22 }
 0x11a   :  { %630 = vmatprep.mubr.bf16.mxu1 %v3920_v9  ;;  %3511 = vmatmul.mubr.bf16.gmra.mrb[36].mxu0 %v4213_v11 }
 0x11b   :  { %3514 = vmatprep.mubr.bf16.mxu0 %v374_v42 }
 0x121   :  { %631 = vmatmul.mubr.bf16.gmra.mrb[40].mxu1 %v368_v57 }
 0x122   :  { %640 = vmatprep.mubr.bf16.mxu1 %v3920_v9  ;;  %3515 = vmatmul.mubr.bf16.gmra.mrb[40].mxu0 %v375_v39 }
 0x123   :  { %3518 = vmatprep.mubr.bf16.mxu0 %v376_v63 }
 0x129   :  { %641 = vmatmul.mubr.bf16.gmra.mrb[44].mxu1 %v369_v52 }
 0x12a   :  { %650 = vmatprep.mubr.bf16.mxu1 %v3920_v9  ;;  %3519 = vmatmul.mubr.bf16.gmra.mrb[44].mxu0 %v377_v62 }
 0x131   :  { %651 = vmatmul.mubr.bf16.gmra.mrb[48].mxu1 %v4200_v48 }
 0x132   :  { %660 = vmatprep.mubr.bf16.mxu1 %v3920_v9 }
 0x139   :  { %661 = vmatmul.mubr.bf16.gmra.mrb[52].mxu1 %v4197_v45 }
 0x13a   :  { %670 = vmatprep.mubr.bf16.mxu1 %v3920_v9 }
 0x141   :  { %671 = vmatmul.mubr.bf16.gmra.mrb[56].mxu1 %v4216_v14 }
 0x142   :  { %680 = vmatprep.mubr.bf16.mxu1 %v3920_v9 }
 0x149   :  { %681 = vmatmul.mubr.bf16.gmra.mrb[60].mxu1 %v4213_v11 }
 0x14a   :  { %690 = vmatprep.mubr.bf16.mxu1 %v3920_v9 }
 0x151   :  { %691 = vmatmul.mubr.bf16.gmra.mrb[64].mxu1 %v374_v42 }
 0x152   :  { %700 = vmatprep.mubr.bf16.mxu1 %v3920_v9 }
 0x159   :  { %701 = vmatmul.mubr.bf16.gmra.mrb[68].mxu1 %v375_v39 }
 0x15a   :  { %710 = vmatprep.mubr.bf16.mxu1 %v3920_v9 }
 0x161   :  { %711 = vmatmul.mubr.bf16.gmra.mrb[72].mxu1 %v376_v63 }
 0x162   :  { %720 = vmatprep.mubr.bf16.mxu1 %v3920_v9 }
 0x169   :  { %721 = vmatmul.mubr.bf16.gmra.mrb[76].mxu1 %v377_v62 }
 0x1c4   :  { %v572_v10 = vpop.f32.mrb[16].mxu1 }
 0x1c5   :  { %v574_v45 = vpop.f32.mrb[17].mxu1  ;;  %v3492_v48 = vpop.f32.mrb[16].mxu0 }
 0x1c6   :  { %v576_v56 = vpop.f32.mrb[18].mxu1  ;;  %v765_v0 = vpop.f32.mrb[17].mxu0 }
 0x1c7   :  { %v892_v1 = vpack.c.bf16 %v576_v56, %v572_v10  ;;  %v578_v2 = vpop.f32.mrb[19].mxu1  ;;  %v3493_v3 = vpop.f32.mrb[18].mxu0 }
 0x1c8   :  { %v908_v4 = vpack.c.bf16 %v578_v2, %v574_v45  ;;  %v4252_v5 = vpack.c.bf16 %v3493_v3, %v3492_v48  ;;  %v768_v6 = vpop.f32.mrb[19].mxu0 }
 0x1c9   :  { %v4254_v7 = vpack.c.bf16 %v768_v6, %v765_v0  ;;  %3538 = vmatprep.mubr.bf16.mxu0 %v892_v1 }
 0x1ca   :  { %3522 = vmatprep.subr.bf16.mxu0 %v908_v4 }
 0x1cb   :  { %3523 = vmatpush3.bf16.xpose.msra.mxu0 %v908_v4 }
 0x1cc   :  { %v4256_v8 = vpop.f32.mrb[20].mxu1 }
 0x1cd   :  { %v584_v11 = vpop.f32.mrb[21].mxu1  ;;  %v3496_v12 = vpop.f32.mrb[20].mxu0 }
 0x1ce   :  { %v4258_v13 = vpop.f32.mrb[22].mxu1  ;;  %v781_v14 = vpop.f32.mrb[21].mxu0 }
 0x1cf   :  { %v893_v15 = vpack.c.bf16 %v4258_v13, %v4256_v8  ;;  %v588_v16 = vpop.f32.mrb[23].mxu1  ;;  %v3497_v17 = vpop.f32.mrb[22].mxu0 }
 0x1d0   :  { %v909_v18 = vpack.c.bf16 %v588_v16, %v584_v11  ;;  %v4262_v19 = vpack.c.bf16 %v3497_v17, %v3496_v12  ;;  %v784_v20 = vpop.f32.mrb[23].mxu0 }
 0x1d1   :  { %v4264_v21 = vpack.c.bf16 %v784_v20, %v781_v14 }
 0x1d2   :  { %3524 = vmatprep.subr.bf16.mxu0 %v909_v18 }
 0x1d3   :  { %3525 = vmatpush3.bf16.xpose.msra.mxu0 %v909_v18 }
 0x1d4   :  { %v4266_v22 = vpop.f32.mrb[24].mxu1 }
 0x1d5   :  { %v594_v23 = vpop.f32.mrb[25].mxu1  ;;  %v3500_v24 = vpop.f32.mrb[24].mxu0 }
 0x1d6   :  { %v4268_v25 = vpop.f32.mrb[26].mxu1  ;;  %v797_v26 = vpop.f32.mrb[25].mxu0 }
 0x1d7   :  { %v894_v27 = vpack.c.bf16 %v4268_v25, %v4266_v22  ;;  %v598_v28 = vpop.f32.mrb[27].mxu1  ;;  %v3501_v29 = vpop.f32.mrb[26].mxu0 }
 0x1d8   :  { %v910_v30 = vpack.c.bf16 %v598_v28, %v594_v23  ;;  %v4272_v31 = vpack.c.bf16 %v3501_v29, %v3500_v24  ;;  %v800_v32 = vpop.f32.mrb[27].mxu0 }
 0x1d9   :  { %v4274_v33 = vpack.c.bf16 %v800_v32, %v797_v26 }
 0x1da   :  { %3526 = vmatprep.subr.bf16.mxu0 %v910_v30 }
 0x1db   :  { %3527 = vmatpush3.bf16.xpose.msra.mxu0 %v910_v30 }
 0x1dc   :  { %v4276_v34 = vpop.f32.mrb[28].mxu1 }
 0x1dd   :  { %v604_v35 = vpop.f32.mrb[29].mxu1  ;;  %v3504_v36 = vpop.f32.mrb[28].mxu0 }
 0x1de   :  { %v4278_v37 = vpop.f32.mrb[30].mxu1  ;;  %v813_v38 = vpop.f32.mrb[29].mxu0 }
 0x1df   :  { %v895_v39 = vpack.c.bf16 %v4278_v37, %v4276_v34  ;;  %v608_v40 = vpop.f32.mrb[31].mxu1  ;;  %v3505_v41 = vpop.f32.mrb[30].mxu0 }
 0x1e0   :  { %v911_v42 = vpack.c.bf16 %v608_v40, %v604_v35  ;;  %v4282_v43 = vpack.c.bf16 %v3505_v41, %v3504_v36  ;;  %v816_v44 = vpop.f32.mrb[31].mxu0 }
 0x1e1   :  { %v4284_v46 = vpack.c.bf16 %v816_v44, %v813_v38 }
 0x1e2   :  { %3528 = vmatprep.subr.bf16.mxu0 %v911_v42 }
 0x1e3   :  { %3529 = vmatpush3.bf16.xpose.msra.mxu0 %v911_v42 }
 0x1e4   :  { %v4286_v47 = vpop.f32.mrb[32].mxu1 }
 0x1e5   :  { %v614_v49 = vpop.f32.mrb[33].mxu1  ;;  %v3508_v50 = vpop.f32.mrb[32].mxu0 }
 0x1e6   :  { %v4288_v51 = vpop.f32.mrb[34].mxu1  ;;  %v829_v52 = vpop.f32.mrb[33].mxu0 }
 0x1e7   :  { %v896_v53 = vpack.c.bf16 %v4288_v51, %v4286_v47  ;;  %v618_v54 = vpop.f32.mrb[35].mxu1  ;;  %v3509_v55 = vpop.f32.mrb[34].mxu0 }
 0x1e8   :  { %v912_v57 = vpack.c.bf16 %v618_v54, %v614_v49  ;;  %v4292_v58 = vpack.c.bf16 %v3509_v55, %v3508_v50  ;;  %v832_v59 = vpop.f32.mrb[35].mxu0 }
 0x1e9   :  { %v4294_v60 = vpack.c.bf16 %v832_v59, %v829_v52 }
 0x1ea   :  { %3530 = vmatprep.subr.bf16.mxu0 %v912_v57 }
 0x1eb   :  { %3531 = vmatpush3.bf16.xpose.msra.mxu0 %v912_v57 }
 0x1ec   :  { %v4296_v61 = vpop.f32.mrb[36].mxu1 }
 0x1ed   :  { %v624_v62 = vpop.f32.mrb[37].mxu1  ;;  %v3512_v63 = vpop.f32.mrb[36].mxu0 }
 0x1ee   :  { %v4298_v10 = vpop.f32.mrb[38].mxu1  ;;  %v845_v45 = vpop.f32.mrb[37].mxu0 }
 0x1ef   :  { %v897_v48 = vpack.c.bf16 %v4298_v10, %v4296_v61  ;;  %v628_v56 = vpop.f32.mrb[39].mxu1  ;;  %v3513_v0 = vpop.f32.mrb[38].mxu0 }
 0x1f0   :  { %v913_v1 = vpack.c.bf16 %v628_v56, %v624_v62  ;;  %v4302_v2 = vpack.c.bf16 %v3513_v0, %v3512_v63  ;;  %v848_v3 = vpop.f32.mrb[39].mxu0 }
 0x1f1   :  { %v4304_v4 = vpack.c.bf16 %v848_v3, %v845_v45 }
 0x1f2   :  { %3532 = vmatprep.subr.bf16.mxu0 %v913_v1 }
 0x1f3   :  { %3533 = vmatpush3.bf16.xpose.msra.mxu0 %v913_v1 }
 0x1f4   :  { %v4306_v6 = vpop.f32.mrb[40].mxu1 }
 0x1f5   :  { %v634_v11 = vpop.f32.mrb[41].mxu1  ;;  %v3516_v12 = vpop.f32.mrb[40].mxu0 }
 0x1f6   :  { %v4308_v14 = vpop.f32.mrb[42].mxu1  ;;  %v861_v16 = vpop.f32.mrb[41].mxu0 }
 0x1f7   :  { %v898_v17 = vpack.c.bf16 %v4308_v14, %v4306_v6  ;;  %v638_v18 = vpop.f32.mrb[43].mxu1  ;;  %v3517_v20 = vpop.f32.mrb[42].mxu0 }
 0x1f8   :  { %v914_v23 = vpack.c.bf16 %v638_v18, %v634_v11  ;;  %v4312_v24 = vpack.c.bf16 %v3517_v20, %v3516_v12  ;;  %v864_v26 = vpop.f32.mrb[43].mxu0 }
 0x1f9   :  { %v4314_v28 = vpack.c.bf16 %v864_v26, %v861_v16 }
 0x1fa   :  { %3534 = vmatprep.subr.bf16.mxu0 %v914_v23 }
 0x1fb   :  { %3535 = vmatpush3.bf16.xpose.msra.mxu0 %v914_v23 }
 0x1fc   :  { %v4316_v29 = vpop.f32.mrb[44].mxu1 }
 0x1fd   :  { %v644_v30 = vpop.f32.mrb[45].mxu1  ;;  %v3520_v32 = vpop.f32.mrb[44].mxu0 }
 0x1fe   :  { %v646_v35 = vpop.f32.mrb[46].mxu1  ;;  %v877_v36 = vpop.f32.mrb[45].mxu0 }
 0x1ff   :  { %v899_v38 = vpack.c.bf16 %v646_v35, %v4316_v29  ;;  %v648_v40 = vpop.f32.mrb[47].mxu1  ;;  %v3521_v41 = vpop.f32.mrb[46].mxu0 }
 0x200   :  { %v915_v42 = vpack.c.bf16 %v648_v40, %v644_v30  ;;  %v4319_v44 = vpack.c.bf16 %v3521_v41, %v3520_v32  ;;  %v880_v49 = vpop.f32.mrb[47].mxu0 }
 0x201   :  { %v4321_v50 = vpack.c.bf16 %v880_v49, %v877_v36 }
 0x202   :  { %3536 = vmatprep.subr.bf16.mxu0 %v915_v42 }
 0x203   :  { %3537 = vmatpush3.bf16.xpose.msra.mxu0 %v915_v42 }
 0x204   :  { %v652_v52 = vpop.f32.mrb[48].mxu1  ;;  %3586 = vmatprep.subr.bf16.mxu0 %v4254_v7 }
 0x205   :  { %v654_v54 = vpop.f32.mrb[49].mxu1 }
 0x206   :  { %v656_v55 = vpop.f32.mrb[50].mxu1 }
 0x207   :  { %v900_v57 = vpack.c.bf16 %v656_v55, %v652_v52  ;;  %v658_v59 = vpop.f32.mrb[51].mxu1 }
 0x208   :  { %v916_v62 = vpack.c.bf16 %v658_v59, %v654_v54  ;;  %v1152_v54 = vld [vmem:[%s5390_s2 + $0x10] sm:$0xff] }
 0x209   :  { %3570 = vmatprep.mubr.bf16.mxu1 %v900_v57  ;;  %vm1160_vm5 = vnez %v1152_v54 }
 0x20a   :  { %3539 = vmatmul.mubr.bf16.vlgmr.msra.gmra.mrb[48].mxu0 %v893_v15  ;;  %3554 = vmatprep.subr.bf16.mxu1 %v916_v62 }
 0x20b   :  { %3542 = vmatprep.mubr.bf16.mxu0 %v894_v27  ;;  %3555 = vmatpush3.bf16.xpose.msra.mxu1 %v916_v62 }
 0x20c   :  { %3587 = vmatpush3.bf16.msra.mxu0 %v4254_v7  ;;  %v4331_v63 = vpop.f32.mrb[52].mxu1 }
 0x20d   :  { %3588 = vmatprep.subr.bf16.mxu0 %v4252_v5  ;;  %v664_v45 = vpop.f32.mrb[53].mxu1 }
 0x20e   :  { %v4334_v56 = vpop.f32.mrb[54].mxu1 }
 0x20f   :  { %v901_v0 = vpack.c.bf16 %v4334_v56, %v4331_v63  ;;  %v668_v8 = vpop.f32.mrb[55].mxu1 }
 0x210   :  { %v917_v13 = vpack.c.bf16 %v668_v8, %v664_v45  ;;  %3589 = vmatpush3.bf16.msra.mxu0 %v4252_v5 }
 0x211   :  { %3590 = vmatprep.subr.bf16.mxu0 %v4264_v21 }
 0x212   :  { %3543 = vmatmul.mubr.bf16.gmra.mrb[52].mxu0 %v895_v39  ;;  %3556 = vmatprep.subr.bf16.mxu1 %v917_v13 }
 0x213   :  { %3546 = vmatprep.mubr.bf16.mxu0 %v896_v53  ;;  %3557 = vmatpush3.bf16.xpose.msra.mxu1 %v917_v13 }
 0x214   :  { %3591 = vmatpush3.bf16.msra.mxu0 %v4264_v21  ;;  %v4347_v7 = vpop.f32.mrb[56].mxu1 }
 0x215   :  { %3592 = vmatprep.subr.bf16.mxu0 %v4262_v19  ;;  %v674_v15 = vpop.f32.mrb[57].mxu1 }
 0x216   :  { %v676_v5 = vpop.f32.mrb[58].mxu1 }
 0x217   :  { %v902_v22 = vpack.c.bf16 %v676_v5, %v4347_v7  ;;  %v678_v25 = vpop.f32.mrb[59].mxu1 }
 0x218   :  { %v918_v27 = vpack.c.bf16 %v678_v25, %v674_v15  ;;  %3593 = vmatpush3.bf16.msra.mxu0 %v4262_v19  ;;  %v1153_v15 = vld [vmem:[%s5390_s2 + $0x18] sm:$0xff] }
 0x219   :  { %3594 = vmatprep.subr.bf16.mxu0 %v4274_v33  ;;  %vm1161_vm8 = vnez %v1153_v15 }
 0x21a   :  { %3547 = vmatmul.mubr.bf16.gmra.mrb[56].mxu0 %v897_v48  ;;  %3558 = vmatprep.subr.bf16.mxu1 %v918_v27 }
 0x21b   :  { %3550 = vmatprep.mubr.bf16.mxu0 %v898_v17  ;;  %3559 = vmatpush3.bf16.xpose.msra.mxu1 %v918_v27 }
 0x21c   :  { %3595 = vmatpush3.bf16.msra.mxu0 %v4274_v33  ;;  %v682_v21 = vpop.f32.mrb[60].mxu1 }
 0x21d   :  { %3596 = vmatprep.subr.bf16.mxu0 %v4272_v31  ;;  %v684_v34 = vpop.f32.mrb[61].mxu1 }
 0x21e   :  { %v686_v37 = vpop.f32.mrb[62].mxu1 }
 0x21f   :  { %v903_v39 = vpack.c.bf16 %v686_v37, %v682_v21  ;;  %v688_v47 = vpop.f32.mrb[63].mxu1 }
 0x220   :  { %v919_v51 = vpack.c.bf16 %v688_v47, %v684_v34  ;;  %3597 = vmatpush3.bf16.msra.mxu0 %v4272_v31 }
 0x221   :  { %3598 = vmatprep.subr.bf16.mxu0 %v4284_v46 }
 0x222   :  { %3551 = vmatmul.mubr.bf16.gmra.mrb[60].mxu0 %v899_v38  ;;  %3560 = vmatprep.subr.bf16.mxu1 %v919_v51 }
 0x223   :  { %3561 = vmatpush3.bf16.xpose.msra.mxu1 %v919_v51 }
 0x224   :  { %3599 = vmatpush3.bf16.msra.mxu0 %v4284_v46  ;;  %v692_v19 = vpop.f32.mrb[64].mxu1 }
 0x225   :  { %3600 = vmatprep.subr.bf16.mxu0 %v4282_v43  ;;  %v694_v33 = vpop.f32.mrb[65].mxu1 }
 0x226   :  { %v696_v53 = vpop.f32.mrb[66].mxu1 }
 0x227   :  { %v904_v61 = vpack.c.bf16 %v696_v53, %v692_v19  ;;  %v698_v10 = vpop.f32.mrb[67].mxu1 }
 0x228   :  { %v920_v48 = vpack.c.bf16 %v698_v10, %v694_v33  ;;  %3601 = vmatpush3.bf16.msra.mxu0 %v4282_v43 }
 0x22a   :  { %3562 = vmatprep.subr.bf16.mxu1 %v920_v48 }
 0x22b   :  { %3563 = vmatpush3.bf16.xpose.msra.mxu1 %v920_v48  ;;  %v4410_v48 = vsel %vm1161_vm8, 16843009, %v3920_v9 }
 0x22c   :  { %v702_v31 = vpop.f32.mrb[68].mxu1 }
 0x22d   :  { %v704_v1 = vpop.f32.mrb[69].mxu1 }
 0x22e   :  { %v706_v3 = vpop.f32.mrb[70].mxu1 }
 0x22f   :  { %v905_v6 = vpack.c.bf16 %v706_v3, %v702_v31  ;;  %v708_v11 = vpop.f32.mrb[71].mxu1 }
 0x230   :  { %v921_v12 = vpack.c.bf16 %v708_v11, %v704_v1 }
 0x232   :  { %3564 = vmatprep.subr.bf16.mxu1 %v921_v12 }
 0x233   :  { %3565 = vmatpush3.bf16.xpose.msra.mxu1 %v921_v12 }
 0x234   :  { %v712_v46 = vpop.f32.mrb[72].mxu1 }
 0x235   :  { %v714_v14 = vpop.f32.mrb[73].mxu1 }
 0x236   :  { %v716_v16 = vpop.f32.mrb[74].mxu1 }
 0x237   :  { %v906_v17 = vpack.c.bf16 %v716_v16, %v712_v46  ;;  %v718_v18 = vpop.f32.mrb[75].mxu1 }
 0x238   :  { %v922_v20 = vpack.c.bf16 %v718_v18, %v714_v14 }
 0x23a   :  { %3566 = vmatprep.subr.bf16.mxu1 %v922_v20 }
 0x23b   :  { %3567 = vmatpush3.bf16.xpose.msra.mxu1 %v922_v20 }
 0x23c   :  { %v722_v23 = vpop.f32.mrb[76].mxu1 }
 0x23d   :  { %v724_v43 = vpop.f32.mrb[77].mxu1 }
 0x23e   :  { %v726_v26 = vpop.f32.mrb[78].mxu1 }
 0x23f   :  { %v907_v29 = vpack.c.bf16 %v726_v26, %v722_v23  ;;  %v728_v30 = vpop.f32.mrb[79].mxu1  ;;  %v1186_v26 = vunpack.c.0.s8 %v4410_v48 }
 0x240   :  { %v923_v32 = vpack.c.bf16 %v728_v30, %v724_v43 }
 0x242   :  { %3568 = vmatprep.subr.bf16.mxu1 %v923_v32 }
 0x243   :  { %3569 = vmatpush3.bf16.xpose.msra.mxu1 %v923_v32 }
 0x244   :  { %3618 = vmatprep.subr.bf16.mxu1 %v4294_v60 }
 0x24a   :  { %3571 = vmatmul.mubr.bf16.vlgmr.msra.gmra.mrb[80].mxu1 %v901_v0  ;;  %v1168_v0 = vsel %vm1160_vm5, 16843009, %v3920_v9 }
 0x24b   :  { %3574 = vmatprep.mubr.bf16.mxu1 %v902_v22  ;;  %3619 = vmatpush3.bf16.msra.mxu1 %v4294_v60  ;;  %v1182_v21 = vunpack.c.0.s8 %v1168_v0  ;;  %v1184_v10 = vunpack.c.2.s8 %v1168_v0 }
 0x24c   :  { %3620 = vmatprep.subr.bf16.mxu1 %v4292_v58 }
 0x24f   :  { %3621 = vmatpush3.bf16.msra.mxu1 %v4292_v58  ;;  %v1150_v58 = vld [vmem:[%s5390_s2] sm:$0xff] }
 0x250   :  { %3622 = vmatprep.subr.bf16.mxu1 %v4304_v4  ;;  %vm1158_vm1 = vnez %v1150_v58 }
 0x251   :  { %v1166_v60 = vsel %vm1158_vm1, 16843009, %v3920_v9 }
 0x252   :  { %3575 = vmatmul.mubr.bf16.gmra.mrb[84].mxu1 %v903_v39  ;;  %v1175_v40 = vunpack.c.1.s8 %v1166_v60  ;;  %v1183_v39 = vunpack.c.1.s8 %v1168_v0 }
 0x253   :  { %3578 = vmatprep.mubr.bf16.mxu1 %v904_v61  ;;  %3623 = vmatpush3.bf16.msra.mxu1 %v4304_v4  ;;  %v1174_v4 = vunpack.c.0.s8 %v1166_v60  ;;  %v1222_v61 = vpack.c.b16 %v1182_v21, %v1182_v21 }
 0x254   :  { %3624 = vmatprep.subr.bf16.mxu1 %v4302_v2  ;;  %v1224_v11 = vpack.c.b16 %v1183_v39, %v1183_v39 }
 0x255   :  { %v1206_v36 = vpack.c.b16 %v1174_v4, %v1174_v4  ;;  %v1223_v58 = vpack.c.b8 %v1222_v61, %v1222_v61 }
 0x257   :  { %3625 = vmatpush3.bf16.msra.mxu1 %v4302_v2  ;;  %v1176_v2 = vunpack.c.2.s8 %v1166_v60  ;;  %vm4454_vm1 = vnez %v1223_v58 }
 0x258   :  { %3626 = vmatprep.subr.bf16.mxu1 %v4314_v28 }
 0x259   :  { %v1210_v35 = vpack.c.b16 %v1176_v2, %v1176_v2 }
 0x25a   :  { %3579 = vmatmul.mubr.bf16.gmra.mrb[88].mxu1 %v905_v6 }
 0x25b   :  { %3627 = vmatpush3.bf16.msra.mxu1 %v4314_v28  ;;  %3582 = vmatprep.mubr.bf16.mxu1 %v906_v17  ;;  %v1177_v28 = vunpack.c.3.s8 %v1166_v60  ;;  %v1211_v42 = vpack.c.b8 %v1210_v35, %v1210_v35  ;;  %v1185_v17 = vunpack.c.3.s8 %v1168_v0  ;;  %v1226_v60 = vpack.c.b16 %v1184_v10, %v1184_v10 }
 0x25c   :  { %3628 = vmatprep.subr.bf16.mxu1 %v4312_v24 }
 0x25d   :  { %v1212_v38 = vpack.c.b16 %v1177_v28, %v1177_v28  ;;  %vm1272_vm3 = vnez %v1211_v42  ;;  %v1187_v28 = vunpack.c.1.s8 %v4410_v48  ;;  %v1230_v42 = vpack.c.b16 %v1186_v26, %v1186_v26 }
 0x25e   :  { %v1304_v45 = vsel %vm1272_vm3, 16843009, %v3920_v9 }
 0x25f   :  { %3629 = vmatpush3.bf16.msra.mxu1 %v4312_v24  ;;  %v1151_v24 = vld [vmem:[%s5390_s2 + $0x8] sm:$0xff]  ;;  %v1213_v49 = vpack.c.b8 %v1212_v38, %v1212_v38  ;;  %v1336_v5 = vunpack.c.0.s8 %v1304_v45  ;;  %v1231_v15 = vpack.c.b8 %v1230_v42, %v1230_v42 }
 0x260   :  { %3630 = vmatprep.subr.bf16.mxu1 %v4321_v50  ;;  %vm1159_vm2 = vnez %v1151_v24  ;;  %v1225_v24 = vpack.c.b8 %v1224_v11, %v1224_v11 }
 0x261   :  { %v1167_v41 = vsel %vm1159_vm2, 16843009, %v3920_v9  ;;  %vm1273_vm6 = vnez %v1213_v49  ;;  %vm4401_vm9 = vcmp.ne.s32.totalorder %v1336_v5, 0  ;;  %vm1282_vm8 = vnez %v1231_v15 }
 0x262   :  { %3583 = vmatmul.mubr.bf16.gmra.mrb[92].mxu1 %v907_v29  ;;  %v1178_v52 = vunpack.c.0.s8 %v1167_v41  ;;  %v1179_v55 = vunpack.c.1.s8 %v1167_v41  ;;  %v1180_v57 = vunpack.c.2.s8 %v1167_v41  ;;  %v1181_v63 = vunpack.c.3.s8 %v1167_v41 }
 0x263   :  { %3631 = vmatpush3.bf16.msra.mxu1 %v4321_v50  ;;  %v1208_v50 = vpack.c.b16 %v1175_v40, %v1175_v40  ;;  %v1305_v13 = vsel %vm1273_vm6, 16843009, %v3920_v9  ;;  %vm1279_vm2 = vnez %v1225_v24 }
 0x264   :  { %3632 = vmatprep.subr.bf16.mxu1 %v4319_v44  ;;  %v1214_v62 = vpack.c.b16 %v1178_v52, %v1178_v52  ;;  %v1216_v56 = vpack.c.b16 %v1179_v55, %v1179_v55  ;;  %v1218_v7 = vpack.c.b16 %v1180_v57, %v1180_v57  ;;  %v1220_v25 = vpack.c.b16 %v1181_v63, %v1181_v63 }
 0x265   :  { %v1209_v59 = vpack.c.b8 %v1208_v50, %v1208_v50  ;;  %v1337_v37 = vunpack.c.0.s8 %v1305_v13  ;;  %v1227_v50 = vpack.c.b8 %v1226_v60, %v1226_v60  ;;  %v1188_v52 = vunpack.c.2.s8 %v4410_v48 }
 0x266   :  { %v1215_v22 = vpack.c.b8 %v1214_v62, %v1214_v62  ;;  %v1217_v27 = vpack.c.b8 %v1216_v56, %v1216_v56  ;;  %v1219_v51 = vpack.c.b8 %v1218_v7, %v1218_v7  ;;  %v1221_v33 = vpack.c.b8 %v1220_v25, %v1220_v25 }
 0x267   :  { %3633 = vmatpush3.bf16.msra.mxu1 %v4319_v44  ;;  %v1207_v44 = vpack.c.b8 %v1206_v36, %v1206_v36  ;;  %vm1271_vm7 = vnez %v1209_v59  ;;  %vm4416_vm13 = vcmp.ne.s32.totalorder %v1337_v37, 0  ;;  %v1228_v36 = vpack.c.b16 %v1185_v17, %v1185_v17 }
 0x268   :  { %v1303_v47 = vsel %vm1271_vm7, 16843009, %v3920_v9  ;;  %vm1274_vm10 = vnez %v1215_v22  ;;  %vm4405_vm11 = vnez %v1217_v27  ;;  %vm4421_vm14 = vnez %v1219_v51 }
 0x269   :  { %vm1270_vm4 = vnez %v1207_v44  ;;  %v1335_v6 = vunpack.c.0.s8 %v1303_v47  ;;  %v1306_v14 = vsel %vm1274_vm10, 16843009, %v3920_v9  ;;  %v1307_v23 = vsel %vm4405_vm11, 16843009, %v3920_v9 }
 0x26a   :  { %v1302_v8 = vsel %vm1270_vm4, 16843009, %v3920_v9  ;;  %vm4428_vm15 = vnez %v1221_v33  ;;  %v1338_v35 = vunpack.c.0.s8 %v1306_v14  ;;  %v1339_v38 = vunpack.c.0.s8 %v1307_v23 }
 0x26b   :  { %v1334_v34 = vunpack.c.0.s8 %v1302_v8  ;;  %vm1367_vm0 = vcmp.ne.s32.totalorder %v1335_v6, 0  ;;  %v1308_v40 = vsel %vm4421_vm14, 16843009, %v3920_v9  ;;  %v1309_v41 = vsel %vm4428_vm15, 16843009, %v3920_v9 }
 0x26c   :  { %v1232_v57 = vpack.c.b16 %v1187_v28, %v1187_v28  ;;  %vm4463_vm3 = vcmp.ne.s32.totalorder %v1338_v35, 0  ;;  %v1340_v63 = vunpack.c.0.s8 %v1308_v40  ;;  %v1229_v45 = vpack.c.b8 %v1228_v36, %v1228_v36 }
 0x26d   :  { %vm4412_vm12 = vcmp.ne.s32.totalorder %v1334_v34, 0  ;;  %v1189_v56 = vunpack.c.3.s8 %v4410_v48  ;;  %v1341_v13 = vunpack.c.0.s8 %v1309_v41  ;;  %v1310_v7 = vsel %vm4454_vm1, 16843009, %v3920_v9 }
 0x26e   :  { %vm1371_vm4 = vcmp.ne.s32.totalorder %v1339_v38, 0  ;;  %v1311_v22 = vsel %vm1279_vm2, 16843009, %v3920_v9  ;;  %vm1280_vm5 = vnez %v1227_v50  ;;  %v1234_v25 = vpack.c.b16 %v1188_v52, %v1188_v52 }
 0x26f   :  { %v1233_v37 = vpack.c.b8 %v1232_v57, %v1232_v57  ;;  %vm1372_vm6 = vcmp.ne.s32.totalorder %v1340_v63, 0  ;;  %v1342_v39 = vunpack.c.0.s8 %v1310_v7  ;;  %vm1281_vm7 = vnez %v1229_v45  ;;  %v1154_v63 = vld [vmem:[%s5390_s2 + $0x20] sm:$0xff] }
 0x270   :  { %v1236_v47 = vpack.c.b16 %v1189_v56, %v1189_v56  ;;  %v1312_v33 = vsel %vm1280_vm5, 16843009, %v3920_v9  ;;  %v1343_v53 = vunpack.c.0.s8 %v1311_v22  ;;  %v1235_v61 = vpack.c.b8 %v1234_v25, %v1234_v25 }
 0x271   :  { %vm1283_vm10 = vnez %v1233_v37  ;;  %vm1374_vm11 = vcmp.ne.s32.totalorder %v1342_v39, 0  ;;  %v1344_v3 = vunpack.c.0.s8 %v1312_v33  ;;  %v1314_v6 = vsel %vm1282_vm8, 16843009, %v3920_v9 }
 0x272   :  { %v1237_v11 = vpack.c.b8 %v1236_v47, %v1236_v47  ;;  %v1346_v26 = vunpack.c.0.s8 %v1314_v6  ;;  %vm1162_vm5 = vnez %v1154_v63 }
 0x273   :  { %vm1376_vm14 = vcmp.ne.s32.totalorder %v1344_v3, 0  ;;  %v1170_v56 = vsel %vm1162_vm5, 16843009, %v3920_v9 }
 0x274   :  { %vm1285_vm15 = vnez %v1237_v11  ;;  %vm1378_vm1 = vcmp.ne.s32.totalorder %v1346_v26, 0  ;;  %v1191_v7 = vunpack.c.1.s8 %v1170_v56  ;;  %v1193_v22 = vunpack.c.3.s8 %v1170_v56 }
 0x275   :  { %v1317_v28 = vsel %vm1285_vm15, 16843009, %v3920_v9 }
 0x276   :  { %v1349_v49 = vunpack.c.0.s8 %v1317_v28  ;;  %v1240_v25 = vpack.c.b16 %v1191_v7, %v1191_v7  ;;  %v1244_v47 = vpack.c.b16 %v1193_v22, %v1193_v22 }
 0x278   :  { %v1241_v33 = vpack.c.b8 %v1240_v25, %v1240_v25 }
 0x2dd   :  { %v3540_v31 = vpop.f32.mrb[48].mxu0 }
 0x2de   :  { %v1120_v12 = vmul.f32 0.17677669, %v3540_v31  ;;  %v958_v46 = vpop.f32.mrb[49].mxu0  ;;  %v1313_v31 = vsel %vm1281_vm7, 16843009, %v3920_v9 }
 0x2df   :  { %v1118_v18 = vmul.f32 0.17677669, %v958_v46  ;;  %v3541_v20 = vpop.f32.mrb[50].mxu0  ;;  %v1345_v17 = vunpack.c.0.s8 %v1313_v31 }
 0x2e0   :  { %v1121_v29 = vmul.f32 0.17677669, %v3541_v20  ;;  %v961_v30 = vpop.f32.mrb[51].mxu0  ;;  %v4435_v32 = vsel %vm4401_vm9, -1e+09, %v1120_v12  ;;  %vm1373_vm9 = vcmp.ne.s32.totalorder %v1341_v13, 0  ;;  %v1192_v13 = vunpack.c.2.s8 %v1170_v56 }
 0x2e1   :  { %v1119_v2 = vmul.f32 0.17677669, %v961_v30  ;;  %1434 = vmax.xlane.f32.xlu1 %v4435_v32  ;;  %v4440_v4 = vsel %vm4412_vm12, -1e+09, %v1118_v18  ;;  %vm1375_vm12 = vcmp.ne.s32.totalorder %v1343_v53, 0 }
 0x2e2   :  { %1430 = vmax.xlane.f32.xlu0 %v4440_v4  ;;  %v4452_v44 = vsel %vm4416_vm13, -1e+09, %v1121_v29  ;;  %v1315_v18 = vsel %vm1283_vm10, 16843009, %v3920_v9  ;;  %vm1284_vm13 = vnez %v1235_v61  ;;  %vm1287_vm10 = vnez %v1241_v33 }
 0x2e3   :  { %v4460_v55 = vsel %vm1367_vm0, -1e+09, %v1119_v2  ;;  %v1316_v58 = vsel %vm1284_vm13, 16843009, %v3920_v9  ;;  %vm1377_vm0 = vcmp.ne.s32.totalorder %v1345_v17, 0  ;;  %v1347_v60 = vunpack.c.0.s8 %v1315_v18 }
 0x2e4   :  { %v1348_v36 = vunpack.c.0.s8 %v1316_v58  ;;  %v1319_v17 = vsel %vm1287_vm10, 16843009, %v3920_v9 }
 0x2e5   :  { %1436 = vmax.xlane.f32.xlu1 %v4452_v44  ;;  %v3544_v54 = vpop.f32.mrb[52].mxu0  ;;  %vm1379_vm2 = vcmp.ne.s32.totalorder %v1347_v60, 0 }
 0x2e6   :  { %1432 = vmax.xlane.f32.xlu0 %v4460_v55  ;;  %v974_v59 = vpop.f32.mrb[53].mxu0  ;;  %v1124_v27 = vmul.f32 0.17677669, %v3544_v54 }
 0x2e7   :  { %v1122_v0 = vmul.f32 0.17677669, %v974_v59  ;;  %v3545_v8 = vpop.f32.mrb[54].mxu0 }
 0x2e8   :  { %v977_v5 = vpop.f32.mrb[55].mxu0  ;;  %v1125_v51 = vmul.f32 0.17677669, %v3545_v8  ;;  %v4481_v48 = vsel %vm1372_vm6, -1e+09, %v1124_v27  ;;  %v1190_v8 = vunpack.c.0.s8 %v1170_v56 }
 0x2e9   :  { %v1123_v21 = vmul.f32 0.17677669, %v977_v5  ;;  %v4474_v34 = vsel %vm4463_vm3, -1e+09, %v1122_v0  ;;  %vm1380_vm3 = vcmp.ne.s32.totalorder %v1348_v36, 0  ;;  %v1155_v0 = vld [vmem:[%s5390_s2 + $0x28] sm:$0xff]  ;;  %v1242_v5 = vpack.c.b16 %v1192_v13, %v1192_v13 }
 0x2ea   :  { %1438 = vmax.xlane.f32.xlu0 %v4474_v34  ;;  %v4486_v14 = vsel %vm1373_vm9, -1e+09, %v1125_v51  ;;  %vm1163_vm6 = vnez %v1155_v0  ;;  %v1238_v15 = vpack.c.b16 %v1190_v8, %v1190_v8 }
 0x2eb   :  { %v4477_v19 = vsel %vm1371_vm4, -1e+09, %v1123_v21  ;;  %vm1381_vm4 = vcmp.ne.s32.totalorder %v1349_v49, 0  ;;  %v1171_v27 = vsel %vm1163_vm6, 16843009, %v3920_v9  ;;  %v1156_v21 = vld [vmem:[%s5390_s2 + $0x30] sm:$0xff]  ;;  %v1243_v39 = vpack.c.b8 %v1242_v5, %v1242_v5 }
 0x2ec   :  { %1440 = vmax.xlane.f32.xlu1 %v4477_v19  ;;  %v1239_v37 = vpack.c.b8 %v1238_v15, %v1238_v15  ;;  %v1194_v51 = vunpack.c.0.s8 %v1171_v27  ;;  %v1195_v53 = vunpack.c.1.s8 %v1171_v27  ;;  %vm1164_vm7 = vnez %v1156_v21 }
 0x2ed   :  { %v3548_v10 = vpop.f32.mrb[56].mxu0  ;;  %v1196_v61 = vunpack.c.2.s8 %v1171_v27  ;;  %vm1288_vm9 = vnez %v1243_v39  ;;  %v1172_v3 = vsel %vm1164_vm7, 16843009, %v3920_v9 }
 0x2ee   :  { %1442 = vmax.xlane.f32.xlu0 %v4481_v48  ;;  %v990_v1 = vpop.f32.mrb[57].mxu0  ;;  %v1128_v20 = vmul.f32 0.17677669, %v3548_v10  ;;  %vm1286_vm8 = vnez %v1239_v37  ;;  %v1245_v10 = vpack.c.b8 %v1244_v47, %v1244_v47  ;;  %v1246_v31 = vpack.c.b16 %v1194_v51, %v1194_v51 }
 0x2ef   :  { %v1126_v12 = vmul.f32 0.17677669, %v990_v1  ;;  %v3549_v46 = vpop.f32.mrb[58].mxu0  ;;  %v1197_v1 = vunpack.c.3.s8 %v1171_v27  ;;  %v1248_v6 = vpack.c.b16 %v1195_v53, %v1195_v53  ;;  %v1318_v11 = vsel %vm1286_vm8, 16843009, %v3920_v9 }
 0x2f0   :  { %1444 = vmax.xlane.f32.xlu1 %v4486_v14  ;;  %v993_v16 = vpop.f32.mrb[59].mxu0  ;;  %v1129_v29 = vmul.f32 0.17677669, %v3549_v46  ;;  %v4497_v24 = vsel %vm1376_vm14, -1e+09, %v1128_v20  ;;  %v1250_v46 = vpack.c.b16 %v1196_v61, %v1196_v61  ;;  %v1247_v18 = vpack.c.b8 %v1246_v31, %v1246_v31 }
 0x2f1   :  { %v1127_v23 = vmul.f32 0.17677669, %v993_v16  ;;  %v4490_v43 = vsel %vm1374_vm11, -1e+09, %v1126_v12  ;;  %v1320_v12 = vsel %vm1288_vm9, 16843009, %v3920_v9  ;;  %vm1289_vm11 = vnez %v1245_v10 }
 0x2f2   :  { %1446 = vmax.xlane.f32.xlu0 %v4490_v43  ;;  %v4501_v41 = vsel %vm1377_vm0, -1e+09, %v1129_v29  ;;  %v1157_v16 = vld [vmem:[%s5390_s2 + $0x38] sm:$0xff]  ;;  %v1198_v20 = vunpack.c.0.s8 %v1172_v3  ;;  %v1199_v26 = vunpack.c.1.s8 %v1172_v3  ;;  %v1352_v29 = vunpack.c.0.s8 %v1320_v12  ;;  %s3244_s2 = sshll.u32 %s3921_s14, 4  ;;  %s3245_s2 = int_to_ptr.vmem [resolvable:$true] %s3244_s2 }
 0x2f3   :  { %v4493_v30 = vsel %vm1375_vm12, -1e+09, %v1127_v23  ;;  %v1252_v23 = vpack.c.b16 %v1197_v1, %v1197_v1  ;;  %v1249_v58 = vpack.c.b8 %v1248_v6, %v1248_v6  ;;  %vm1165_vm12 = vnez %v1157_v16  ;;  %s3893_s15 = scalar_lea.vmem %s3245_s2, 32  ;;  %p3898_p6 = scmp.lt.s32.totalorder %s3245_s2, %s3245_s2 }
 0x2f4   :  { %1448 = vmax.xlane.f32.xlu1 %v4493_v30  ;;  %v1350_v60 = vunpack.c.0.s8 %v1318_v11  ;;  %v1321_v28 = vsel %vm1289_vm11, 16843009, %v3920_v9  ;;  %vm4535_vm13 = vnez %v1247_v18  ;;  %v1200_v49 = vunpack.c.2.s8 %v1172_v3  ;;  %p3894_p5 = scmp.ne.s32.totalorder %s3245_s2, %s3893_s15  ;;  %p3899_p7 = scmp.lt.s32.totalorder %s3893_s15, %s3893_s15 }
 0x2f5   :  { %v3552_v2 = vpop.f32.mrb[60].mxu0  ;;  %vm4542_vm14 = vcmp.ne.s32.totalorder %v1352_v29, 0  ;;  %v1353_v63 = vunpack.c.0.s8 %v1321_v28  ;;  %vm1291_vm15 = vnez %v1249_v58  ;;  %v1201_v7 = vunpack.c.3.s8 %v1172_v3 }
 0x2f6   :  { %1450 = vmax.xlane.f32.xlu0 %v4497_v24  ;;  %v1006_v35 = vpop.f32.mrb[61].mxu0  ;;  %v1132_v50 = vmul.f32 0.17677669, %v3552_v2  ;;  %v1351_v2 = vunpack.c.0.s8 %v1319_v17  ;;  %vm4546_vm0 = vcmp.ne.s32.totalorder %v1350_v60, 0  ;;  %v1322_v22 = vsel %vm4535_vm13, 16843009, %v3920_v9  ;;  %p3900_p8 = por %p3899_p7, %p3898_p6 }
 0x2f7   :  { %v1130_v38 = vmul.f32 0.17677669, %v1006_v35  ;;  %v3553_v40 = vpop.f32.mrb[62].mxu0  ;;  %v1251_v35 = vpack.c.b8 %v1250_v46, %v1250_v46  ;;  %v1323_v37 = vsel %vm1291_vm15, 16843009, %v3920_v9  ;;  %v1258_v51 = vpack.c.b16 %v1200_v49, %v1200_v49 }
 0x2f8   :  { %1452 = vmax.xlane.f32.xlu1 %v4501_v41  ;;  %v1009_v42 = vpop.f32.mrb[63].mxu0  ;;  %v1133_v57 = vmul.f32 0.17677669, %v3553_v40  ;;  %v4510_v62 = vsel %vm1380_vm3, -1e+09, %v1132_v50  ;;  %v1253_v40 = vpack.c.b8 %v1252_v23, %v1252_v23  ;;  %v1354_v1 = vunpack.c.0.s8 %v1322_v22  ;;  %p3901_p9 = pnand %p3900_p8, %p3894_p5 }
 0x2f9   :  { %v1131_v52 = vmul.f32 0.17677669, %v1009_v42  ;;  %v4504_v54 = vsel %vm1378_vm1, -1e+09, %v1130_v38  ;;  %v1254_v38 = vpack.c.b16 %v1198_v20, %v1198_v20  ;;  %v1256_v42 = vpack.c.b16 %v1199_v26, %v1199_v26 }
 0x2fa   :  { %1454 = vmax.xlane.f32.xlu0 %v4504_v54  ;;  %v4516_v45 = vsel %vm1381_vm4, -1e+09, %v1133_v57  ;;  %v4540_v50 = vsel %vm1165_vm12, 16843009, %v3920_v9  ;;  %vm4550_vm1 = vcmp.ne.s32.totalorder %v1351_v2, 0  ;;  %vm4563_vm3 = vnez %v1253_v40 }
 0x2fb   :  { %v4507_v59 = vsel %vm1379_vm2, -1e+09, %v1131_v52  ;;  %vm4554_vm2 = vnez %v1251_v35  ;;  %v1255_v25 = vpack.c.b8 %v1254_v38, %v1254_v38  ;;  %v1202_v27 = vunpack.c.0.s8 %v4540_v50 }
 0x2fc   :  { %1456 = vmax.xlane.f32.xlu1 %v4507_v59  ;;  %v1257_v47 = vpack.c.b8 %v1256_v42, %v1256_v42  ;;  %v1203_v10 = vunpack.c.1.s8 %v4540_v50  ;;  %vm4573_vm4 = vcmp.ne.s32.totalorder %v1353_v63, 0  ;;  %v1324_v3 = vsel %vm4554_vm2, 16843009, %v3920_v9 }
 0x2fd   :  { %v1260_v6 = vpack.c.b16 %v1201_v7, %v1201_v7  ;;  %vm1294_vm5 = vnez %v1255_v25  ;;  %v1262_v46 = vpack.c.b16 %v1202_v27, %v1202_v27  ;;  %v1355_v16 = vunpack.c.0.s8 %v1323_v37 }
 0x2fe   :  { %1458 = vmax.xlane.f32.xlu0 %v4510_v62  ;;  %v1325_v17 = vsel %vm4563_vm3, 16843009, %v3920_v9  ;;  %v1259_v18 = vpack.c.b8 %v1258_v51, %v1258_v51  ;;  %v1204_v20 = vunpack.c.2.s8 %v4540_v50  ;;  %v1356_v29 = vunpack.c.0.s8 %v1324_v3 }
 0x2ff   :  { %vm4593_vm6 = vnez %v1257_v47  ;;  %v1264_v60 = vpack.c.b16 %v1203_v10, %v1203_v10  ;;  %vm4598_vm7 = vcmp.ne.s32.totalorder %v1354_v1, 0  ;;  %v1326_v35 = vsel %vm1294_vm5, 16843009, %v3920_v9 }
 0x300   :  { %1460 = vmax.xlane.f32.xlu1 %v4516_v45  ;;  %v1261_v36 = vpack.c.b8 %v1260_v6, %v1260_v6  ;;  %v1205_v38 = vunpack.c.3.s8 %v4540_v50  ;;  %v1263_v57 = vpack.c.b8 %v1262_v46, %v1262_v46  ;;  %vm1387_vm8 = vcmp.ne.s32.totalorder %v1355_v16, 0 }
 0x301   :  { %vm1296_vm9 = vnez %v1259_v18  ;;  %v1266_v0 = vpack.c.b16 %v1204_v20, %v1204_v20  ;;  %v1265_v7 = vpack.c.b8 %v1264_v60, %v1264_v60  ;;  %vm1388_vm10 = vcmp.ne.s32.totalorder %v1356_v29, 0 }
 0x302   :  { %vm1297_vm11 = vnez %v1261_v36  ;;  %v1328_v27 = vsel %vm1296_vm9, 16843009, %v3920_v9  ;;  %vm1298_vm12 = vnez %v1263_v57  ;;  %vm2438_vm9 = vcmask 130112  }
 0x303   :  { %v1267_v37 = vpack.c.b8 %v1266_v0, %v1266_v0  ;;  %v1329_v51 = vsel %vm1297_vm11, 16843009, %v3920_v9  ;;  %v1330_v10 = vsel %vm1298_vm12, 16843009, %v3920_v9  ;;  %vm2452_vm11 = vcmask 261312  }
 0x304   :  { %v1361_v46 = vunpack.c.0.s8 %v1329_v51  ;;  %vm2459_vm12 = vcmask 326912  }
 0x31d   :  { %v3572_v52 = vpop.f32.mrb[80].mxu1 }
 0x31e   :  { %v1055_v56 = vpop.f32.mrb[81].mxu1  ;;  %v1136_v33 = vmul.f32 0.17677669, %v3572_v52  ;;  %v1357_v52 = vunpack.c.0.s8 %v1325_v17 }
 0x31f   :  { %v1134_v15 = vmul.f32 0.17677669, %v1055_v56  ;;  %v3573_v5 = vpop.f32.mrb[82].mxu1  ;;  %v1327_v56 = vsel %vm4593_vm6, 16843009, %v3920_v9 }
 0x320   :  { %v1058_v21 = vpop.f32.mrb[83].mxu1  ;;  %v1137_v11 = vmul.f32 0.17677669, %v3573_v5  ;;  %v4591_v26 = vsel %vm4542_vm14, -1e+09, %v1136_v33  ;;  %v1268_v5 = vpack.c.b16 %v1205_v38, %v1205_v38  ;;  %vm1389_vm13 = vcmp.ne.s32.totalorder %v1357_v52, 0 }
 0x321   :  { %v1135_v53 = vmul.f32 0.17677669, %v1058_v21  ;;  %v4569_v61 = vsel %vm4546_vm0, -1e+09, %v1134_v15  ;;  %v1358_v15 = vunpack.c.0.s8 %v1326_v35  ;;  %v1359_v21 = vunpack.c.0.s8 %v1327_v56 }
 0x322   :  { %1462 = vmax.xlane.f32.xlu0 %v4569_v61  ;;  %v4606_v49 = vsel %vm4573_vm4, -1e+09, %v1137_v11  ;;  %vm1299_vm14 = vnez %v1265_v7  ;;  %v1269_v31 = vpack.c.b8 %v1268_v5, %v1268_v5  ;;  %vm1393_vm4 = vcmp.ne.s32.totalorder %v1361_v46, 0 }
 0x323   :  { %v4582_v12 = vsel %vm4550_vm1, -1e+09, %v1135_v53  ;;  %vm1390_vm15 = vcmp.ne.s32.totalorder %v1358_v15, 0  ;;  %v1360_v53 = vunpack.c.0.s8 %v1328_v27  ;;  %vm1391_vm0 = vcmp.ne.s32.totalorder %v1359_v21, 0 }
 0x324   :  { %1464 = vmax.xlane.f32.xlu1 %v4582_v12  ;;  %v1331_v16 = vsel %vm1299_vm14, 16843009, %v3920_v9  ;;  %vm1300_vm1 = vnez %v1267_v37  ;;  %vm1301_vm3 = vnez %v1269_v31  ;;  %vm2473_vm14 = vcmask 458112  }
 0x325   :  { %v3576_v23 = vpop.f32.mrb[84].mxu1  ;;  %vm1392_vm2 = vcmp.ne.s32.totalorder %v1360_v53, 0  ;;  %v1332_v60 = vsel %vm1300_vm1, 16843009, %v3920_v9  ;;  %v1333_v36 = vsel %vm1301_vm3, 16843009, %v3920_v9 }
 0x326   :  { %1466 = vmax.xlane.f32.xlu0 %v4591_v26  ;;  %v1071_v2 = vpop.f32.mrb[85].mxu1  ;;  %v1140_v8 = vmul.f32 0.17677669, %v3576_v23  ;;  %v1362_v23 = vunpack.c.0.s8 %v1330_v10  ;;  %v1365_v56 = vunpack.c.0.s8 %v1333_v36  ;;  %vm2494_vm1 = vcmask 654912  }
 0x327   :  { %v1138_v40 = vmul.f32 0.17677669, %v1071_v2  ;;  %v3577_v42 = vpop.f32.mrb[86].mxu1  ;;  %v1363_v2 = vunpack.c.0.s8 %v1331_v16  ;;  %vm2508_vm3 = vcmask 786112  }
 0x328   :  { %1468 = vmax.xlane.f32.xlu1 %v4606_v49  ;;  %v1074_v63 = vpop.f32.mrb[87].mxu1  ;;  %v1141_v22 = vmul.f32 0.17677669, %v3577_v42  ;;  %v4621_v47 = vsel %vm1388_vm10, -1e+09, %v1140_v8  ;;  %vm1394_vm5 = vcmp.ne.s32.totalorder %v1362_v23, 0 }
 0x329   :  { %v1139_v50 = vmul.f32 0.17677669, %v1074_v63  ;;  %v4614_v13 = vsel %vm4598_vm7, -1e+09, %v1138_v40  ;;  %v1364_v40 = vunpack.c.0.s8 %v1332_v60  ;;  %vm1395_vm6 = vcmp.ne.s32.totalorder %v1363_v2, 0 }
 0x32a   :  { %1470 = vmax.xlane.f32.xlu0 %v4614_v13  ;;  %v4626_v6 = vsel %vm1389_vm13, -1e+09, %v1141_v22  ;;  %vm2445_vm10 = vcmask 195712   ;;  %vm2466_vm13 = vcmask 392512  }
 0x32b   :  { %v4617_v25 = vsel %vm1387_vm8, -1e+09, %v1139_v50  ;;  %vm1396_vm7 = vcmp.ne.s32.totalorder %v1364_v40, 0  ;;  %vm1397_vm8 = vcmp.ne.s32.totalorder %v1365_v56, 0 }
 0x32c   :  { %1472 = vmax.xlane.f32.xlu1 %v4617_v25 }
 0x32d   :  { %v3580_v39 = vpop.f32.mrb[88].mxu1 }
 0x32e   :  { %1474 = vmax.xlane.f32.xlu0 %v4621_v47  ;;  %v1087_v33 = vpop.f32.mrb[89].mxu1  ;;  %v1144_v17 = vmul.f32 0.17677669, %v3580_v39 }
 0x32f   :  { %v1142_v1 = vmul.f32 0.17677669, %v1087_v33  ;;  %v3581_v3 = vpop.f32.mrb[90].mxu1 }
 0x330   :  { %1476 = vmax.xlane.f32.xlu1 %v4626_v6  ;;  %v1090_v11 = vpop.f32.mrb[91].mxu1  ;;  %v1145_v29 = vmul.f32 0.17677669, %v3581_v3  ;;  %v4637_v35 = vsel %vm1392_vm2, -1e+09, %v1144_v17  ;;  %vm2501_vm2 = vcmask 720512  }
 0x331   :  { %v1143_v18 = vmul.f32 0.17677669, %v1090_v11  ;;  %v4630_v20 = vsel %vm1390_vm15, -1e+09, %v1142_v1  ;;  %vm2480_vm15 = vcmask 523712  }
 0x332   :  { %1478 = vmax.xlane.f32.xlu0 %v4630_v20  ;;  %v4641_v57 = vsel %vm1393_vm4, -1e+09, %v1145_v29  ;;  %vm2515_vm4 = vcmask 851712  }
 0x333   :  { %v4633_v58 = vsel %vm1391_vm0, -1e+09, %v1143_v18  ;;  %vm2487_vm0 = vcmask 589312  }
 0x334   :  { %1480 = vmax.xlane.f32.xlu1 %v4633_v58 }
 0x335   :  { %v3584_v28 = vpop.f32.mrb[92].mxu1 }
 0x336   :  { %1482 = vmax.xlane.f32.xlu0 %v4637_v35  ;;  %v1103_v38 = vpop.f32.mrb[93].mxu1  ;;  %v1148_v0 = vmul.f32 0.17677669, %v3584_v28 }
 0x337   :  { %v1146_v42 = vmul.f32 0.17677669, %v1103_v38  ;;  %v3585_v52 = vpop.f32.mrb[94].mxu1 }
 0x338   :  { %1484 = vmax.xlane.f32.xlu1 %v4641_v57  ;;  %v1106_v63 = vpop.f32.mrb[95].mxu1  ;;  %v1149_v9 = vmul.f32 0.17677669, %v3585_v52  ;;  %v4650_v15 = vsel %vm1396_vm7, -1e+09, %v1148_v0  ;;  %vm2536_vm7 = vcmask 1048512  }
 0x339   :  { %v1147_v8 = vmul.f32 0.17677669, %v1106_v63  ;;  %v4644_v50 = vsel %vm1394_vm5, -1e+09, %v1146_v42  ;;  %vm5403_vm5 = vcmask 917312  }
 0x33a   :  { %1486 = vmax.xlane.f32.xlu0 %v4644_v50  ;;  %v4653_v5 = vsel %vm1397_vm8, -1e+09, %v1149_v9  ;;  %vm2617_vm8 = vcmask 1041409  }
 0x33b   :  { %v4647_v7 = vsel %vm1395_vm6, -1e+09, %v1147_v8  ;;  %vm5404_vm6 = vcmask 982912  }
 0x33c   :  { %1488 = vmax.xlane.f32.xlu1 %v4647_v7 }
 0x33e   :  { %1490 = vmax.xlane.f32.xlu0 %v4650_v15 }
 0x340   :  { %1492 = vmax.xlane.f32.xlu1 %v4653_v5 }
 0x36e   :  { %v1435_v22 = vpop.xlane.xlu1 %1434 }
 0x36f   :  { %v1496_v27 = vsub.f32 %v4435_v32, %v1435_v22  ;;  %v1431_v21 = vpop.xlane.xlu0 %1430 }
 0x370   :  { %v1494_v37 = vsub.f32 %v4440_v4, %v1431_v21 }
 0x371   :  { %v1530_v33 = vmul.f32 1.442695, %v1496_v27 }
 0x372   :  { %v1526_v39 = vmul.f32 1.442695, %v1494_v37  ;;  %v1437_v51 = vpop.xlane.xlu1 %1436 }
 0x373   :  { %v1497_v53 = vsub.f32 %v4452_v44, %v1437_v51  ;;  %v1433_v10 = vpop.xlane.xlu0 %1432 }
 0x374   :  { %3746 = vpow2.f32 %v1526_v39  ;;  %v1495_v31 = vsub.f32 %v4460_v55, %v1433_v10 }
 0x375   :  { %3748 = vpow2.f32 %v1530_v33  ;;  %v1532_v3 = vmul.f32 1.442695, %v1497_v53 }
 0x376   :  { %v1528_v1 = vmul.f32 1.442695, %v1495_v31 }
 0x377   :  { %v1439_v11 = vpop.xlane.xlu0 %1438 }
 0x378   :  { %3750 = vpow2.f32 %v1528_v1  ;;  %v1498_v46 = vsub.f32 %v4474_v34, %v1439_v11 }
 0x379   :  { %v1441_v32 = vpop.xlane.xlu1 %1440  ;;  %3752 = vpow2.f32 %v1532_v3 }
 0x37a   :  { %v1534_v16 = vmul.f32 1.442695, %v1498_v46  ;;  %v1499_v4 = vsub.f32 %v4477_v19, %v1441_v32 }
 0x37b   :  { %v1443_v17 = vpop.xlane.xlu0 %1442 }
 0x37c   :  { %3754 = vpow2.f32 %v1534_v16  ;;  %v1536_v18 = vmul.f32 1.442695, %v1499_v4  ;;  %v1500_v44 = vsub.f32 %v4481_v48, %v1443_v17 }
 0x37d   :  { %v1445_v23 = vpop.xlane.xlu1 %1444 }
 0x37e   :  { %v4663_v29 = vpop.eup %3746  ;;  %v1538_v55 = vmul.f32 1.442695, %v1500_v44  ;;  %v1501_v60 = vsub.f32 %v4486_v14, %v1445_v23  ;;  %3756 = vpow2.f32 %v1536_v18 }
 0x37f   :  { %v1447_v2 = vpop.xlane.xlu0 %1446  ;;  %1590 = vadd.xlane.f32.xlu0 %v4663_v29  ;;  %v4668_v28 = vpop.eup %3748 }
 0x380   :  { %3758 = vpow2.f32 %v1538_v55  ;;  %v1540_v34 = vmul.f32 1.442695, %v1501_v60  ;;  %v1502_v19 = vsub.f32 %v4490_v43, %v1447_v2 }
 0x381   :  { %v1449_v36 = vpop.xlane.xlu1 %1448 }
 0x382   :  { %v4670_v38 = vpop.eup %3750  ;;  %v1542_v48 = vmul.f32 1.442695, %v1502_v19  ;;  %v1503_v40 = vsub.f32 %v4493_v30, %v1449_v36  ;;  %3760 = vpow2.f32 %v1540_v34 }
 0x383   :  { %v1451_v42 = vpop.xlane.xlu0 %1450  ;;  %1594 = vadd.xlane.f32.xlu0 %v4668_v28  ;;  %1592 = vadd.xlane.f32.xlu1 %v4670_v38  ;;  %v4676_v63 = vpop.eup %3752 }
 0x384   :  { %3762 = vpow2.f32 %v1542_v48  ;;  %v1544_v14 = vmul.f32 1.442695, %v1503_v40  ;;  %v1504_v52 = vsub.f32 %v4497_v24, %v1451_v42 }
 0x385   :  { %v1453_v43 = vpop.xlane.xlu1 %1452 }
 0x386   :  { %v4678_v56 = vpop.eup %3754  ;;  %v1546_v0 = vmul.f32 1.442695, %v1504_v52  ;;  %v1505_v8 = vsub.f32 %v4501_v41, %v1453_v43  ;;  %3764 = vpow2.f32 %v1544_v14 }
 0x387   :  { %v1455_v30 = vpop.xlane.xlu0 %1454  ;;  %1598 = vadd.xlane.f32.xlu0 %v4678_v56  ;;  %1596 = vadd.xlane.f32.xlu1 %v4676_v63 }
 0x388   :  { %3766 = vpow2.f32 %v1546_v0  ;;  %v1548_v9 = vmul.f32 1.442695, %v1505_v8  ;;  %v1506_v22 = vsub.f32 %v4504_v54, %v1455_v30  ;;  %v4684_v27 = vpop.eup %3756 }
 0x389   :  { %v1457_v24 = vpop.xlane.xlu1 %1456 }
 0x38a   :  { %v4686_v21 = vpop.eup %3758  ;;  %v1550_v37 = vmul.f32 1.442695, %v1506_v22  ;;  %v1507_v39 = vsub.f32 %v4507_v59, %v1457_v24  ;;  %3768 = vpow2.f32 %v1548_v9 }
 0x38b   :  { %v1459_v41 = vpop.xlane.xlu0 %1458  ;;  %1602 = vadd.xlane.f32.xlu0 %v4686_v21  ;;  %1600 = vadd.xlane.f32.xlu1 %v4684_v27 }
 0x38c   :  { %3770 = vpow2.f32 %v1550_v37  ;;  %v1552_v51 = vmul.f32 1.442695, %v1507_v39  ;;  %v1508_v33 = vsub.f32 %v4510_v62, %v1459_v41  ;;  %v4692_v53 = vpop.eup %3760 }
 0x38d   :  { %v1461_v54 = vpop.xlane.xlu1 %1460 }
 0x38e   :  { %v4694_v10 = vpop.eup %3762  ;;  %v1554_v31 = vmul.f32 1.442695, %v1508_v33  ;;  %v1509_v1 = vsub.f32 %v4516_v45, %v1461_v54  ;;  %3772 = vpow2.f32 %v1552_v51 }
 0x38f   :  { %1606 = vadd.xlane.f32.xlu0 %v4694_v10  ;;  %1604 = vadd.xlane.f32.xlu1 %v4692_v53 }
 0x390   :  { %3774 = vpow2.f32 %v1554_v31  ;;  %v1556_v59 = vmul.f32 1.442695, %v1509_v1  ;;  %v4699_v3 = vpop.eup %3764 }
 0x392   :  { %v4701_v11 = vpop.eup %3766  ;;  %3776 = vpow2.f32 %v1556_v59 }
 0x393   :  { %1610 = vadd.xlane.f32.xlu0 %v4701_v11  ;;  %1608 = vadd.xlane.f32.xlu1 %v4699_v3 }
 0x394   :  { %v4705_v62 = vpop.eup %3768 }
 0x396   :  { %v4707_v46 = vpop.eup %3770 }
 0x397   :  { %1614 = vadd.xlane.f32.xlu0 %v4707_v46  ;;  %1612 = vadd.xlane.f32.xlu1 %v4705_v62 }
 0x398   :  { %v4711_v45 = vpop.eup %3772 }
 0x39a   :  { %v4713_v32 = vpop.eup %3774 }
 0x39b   :  { %1618 = vadd.xlane.f32.xlu0 %v4713_v32  ;;  %1616 = vadd.xlane.f32.xlu1 %v4711_v45 }
 0x39c   :  { %v4717_v16 = vpop.eup %3776 }
 0x39f   :  { %1620 = vadd.xlane.f32.xlu1 %v4717_v16 }
 0x3af   :  { %v1463_v4 = vpop.xlane.xlu0 %1462 }
 0x3b0   :  { %v1510_v17 = vsub.f32 %v4569_v61, %v1463_v4 }
 0x3b1   :  { %v1465_v18 = vpop.xlane.xlu1 %1464 }
 0x3b2   :  { %v1558_v44 = vmul.f32 1.442695, %v1510_v17  ;;  %v1511_v23 = vsub.f32 %v4582_v12, %v1465_v18 }
 0x3b3   :  { %v1467_v55 = vpop.xlane.xlu0 %1466 }
 0x3b4   :  { %3778 = vpow2.f32 %v1558_v44  ;;  %v1560_v60 = vmul.f32 1.442695, %v1511_v23  ;;  %v1512_v2 = vsub.f32 %v4591_v26, %v1467_v55 }
 0x3b5   :  { %v1469_v34 = vpop.xlane.xlu1 %1468 }
 0x3b6   :  { %3780 = vpow2.f32 %v1560_v60  ;;  %v1562_v19 = vmul.f32 1.442695, %v1512_v2  ;;  %v1513_v36 = vsub.f32 %v4606_v49, %v1469_v34 }
 0x3b7   :  { %v1471_v48 = vpop.xlane.xlu0 %1470 }
 0x3b8   :  { %3782 = vpow2.f32 %v1562_v19  ;;  %v1564_v40 = vmul.f32 1.442695, %v1513_v36  ;;  %v1514_v42 = vsub.f32 %v4614_v13, %v1471_v48 }
 0x3b9   :  { %v1473_v61 = vpop.xlane.xlu1 %1472 }
 0x3ba   :  { %3784 = vpow2.f32 %v1564_v40  ;;  %v1566_v14 = vmul.f32 1.442695, %v1514_v42  ;;  %v1515_v12 = vsub.f32 %v4617_v25, %v1473_v61 }
 0x3bb   :  { %v1475_v52 = vpop.xlane.xlu0 %1474 }
 0x3bc   :  { %3786 = vpow2.f32 %v1566_v14  ;;  %v1568_v43 = vmul.f32 1.442695, %v1515_v12  ;;  %v1516_v26 = vsub.f32 %v4621_v47, %v1475_v52  ;;  %v3738_v12 = vld [vmem:[%s5394_s6] sm:$0xff]  }
 0x3bd   :  { %v1477_v0 = vpop.xlane.xlu1 %1476  ;;  %3650 = vmatprep.subr.bf16.mxu0 %v3738_v12 }
 0x3be   :  { %v4727_v8 = vpop.eup %3778  ;;  %3788 = vpow2.f32 %v1568_v43  ;;  %v1570_v49 = vmul.f32 1.442695, %v1516_v26  ;;  %v1517_v30 = vsub.f32 %v4626_v6, %v1477_v0 }
 0x3bf   :  { %v1479_v9 = vpop.xlane.xlu0 %1478  ;;  %1622 = vadd.xlane.f32.xlu0 %v4727_v8 }
 0x3c0   :  { %v4731_v13 = vpop.eup %3780  ;;  %3790 = vpow2.f32 %v1570_v49  ;;  %v1572_v22 = vmul.f32 1.442695, %v1517_v30  ;;  %v1518_v25 = vsub.f32 %v4630_v20, %v1479_v9 }
 0x3c1   :  { %v1481_v24 = vpop.xlane.xlu1 %1480  ;;  %1624 = vadd.xlane.f32.xlu1 %v4731_v13 }
 0x3c2   :  { %v4735_v47 = vpop.eup %3782  ;;  %3792 = vpow2.f32 %v1572_v22  ;;  %v1574_v37 = vmul.f32 1.442695, %v1518_v25  ;;  %v1519_v39 = vsub.f32 %v4633_v58, %v1481_v24 }
 0x3c3   :  { %v1483_v41 = vpop.xlane.xlu0 %1482  ;;  %1626 = vadd.xlane.f32.xlu0 %v4735_v47 }
 0x3c4   :  { %v4739_v6 = vpop.eup %3784  ;;  %3794 = vpow2.f32 %v1574_v37  ;;  %v1576_v51 = vmul.f32 1.442695, %v1519_v39  ;;  %v1520_v33 = vsub.f32 %v4637_v35, %v1483_v41 }
 0x3c5   :  { %v1485_v54 = vpop.xlane.xlu1 %1484  ;;  %1628 = vadd.xlane.f32.xlu1 %v4739_v6 }
 0x3c6   :  { %v4743_v20 = vpop.eup %3786  ;;  %3796 = vpow2.f32 %v1576_v51  ;;  %v1578_v31 = vmul.f32 1.442695, %v1520_v33  ;;  %v1521_v1 = vsub.f32 %v4641_v57, %v1485_v54 }
 0x3c7   :  { %1630 = vadd.xlane.f32.xlu0 %v4743_v20  ;;  %v1487_v58 = vpop.xlane.xlu0 %1486 }
 0x3c8   :  { %v4747_v59 = vpop.eup %3788  ;;  %3798 = vpow2.f32 %v1578_v31  ;;  %v1580_v4 = vmul.f32 1.442695, %v1521_v1  ;;  %v1522_v17 = vsub.f32 %v4644_v50, %v1487_v58 }
 0x3c9   :  { %1632 = vadd.xlane.f32.xlu1 %v4747_v59  ;;  %v1489_v35 = vpop.xlane.xlu1 %1488 }
 0x3ca   :  { %v4751_v18 = vpop.eup %3790  ;;  %3800 = vpow2.f32 %v1580_v4  ;;  %v1582_v44 = vmul.f32 1.442695, %v1522_v17  ;;  %v1523_v23 = vsub.f32 %v4647_v7, %v1489_v35 }
 0x3cb   :  { %1634 = vadd.xlane.f32.xlu0 %v4751_v18  ;;  %v1491_v57 = vpop.xlane.xlu0 %1490 }
 0x3cc   :  { %v4755_v55 = vpop.eup %3792  ;;  %3802 = vpow2.f32 %v1582_v44  ;;  %v1584_v60 = vmul.f32 1.442695, %v1523_v23  ;;  %v1524_v2 = vsub.f32 %v4650_v15, %v1491_v57 }
 0x3cd   :  { %1636 = vadd.xlane.f32.xlu1 %v4755_v55  ;;  %v1493_v50 = vpop.xlane.xlu1 %1492 }
 0x3ce   :  { %v4759_v34 = vpop.eup %3794  ;;  %3804 = vpow2.f32 %v1584_v60  ;;  %v1586_v19 = vmul.f32 1.442695, %v1524_v2  ;;  %v1525_v36 = vsub.f32 %v4653_v5, %v1493_v50 }
 0x3cf   :  { %1638 = vadd.xlane.f32.xlu0 %v4759_v34 }
 0x3d0   :  { %v4763_v7 = vpop.eup %3796  ;;  %3806 = vpow2.f32 %v1586_v19  ;;  %v1588_v48 = vmul.f32 1.442695, %v1525_v36 }
 0x3d1   :  { %1640 = vadd.xlane.f32.xlu1 %v4763_v7 }
 0x3d2   :  { %v4766_v40 = vpop.eup %3798  ;;  %3808 = vpow2.f32 %v1588_v48 }
 0x3d3   :  { %1642 = vadd.xlane.f32.xlu0 %v4766_v40 }
 0x3d4   :  { %v4769_v15 = vpop.eup %3800 }
 0x3d5   :  { %1644 = vadd.xlane.f32.xlu1 %v4769_v15 }
 0x3d6   :  { %v4772_v42 = vpop.eup %3802 }
 0x3d7   :  { %1646 = vadd.xlane.f32.xlu0 %v4772_v42 }
 0x3d8   :  { %v4775_v5 = vpop.eup %3804 }
 0x3d9   :  { %1648 = vadd.xlane.f32.xlu1 %v4775_v5 }
 0x3da   :  { %v4778_v61 = vpop.eup %3806 }
 0x3db   :  { %1650 = vadd.xlane.f32.xlu0 %v4778_v61 }
 0x3dc   :  { %v4781_v14 = vpop.eup %3808 }
 0x3dd   :  { %1652 = vadd.xlane.f32.xlu1 %v4781_v14 }
 0x40c   :  { %v1591_v52 = vpop.xlane.xlu0 %1590 }
 0x40d   :  { %v1654_v43 = vmax.f32 %v1591_v52, 1e-30 }
 0x40f   :  { %3810 = vrcp.f32 %v1654_v43 }
 0x410   :  { %v1595_v26 = vpop.xlane.xlu0 %1594  ;;  %v1593_v0 = vpop.xlane.xlu1 %1592 }
 0x411   :  { %v1655_v49 = vmax.f32 %v1593_v0, 1e-30  ;;  %v1656_v30 = vmax.f32 %v1595_v26, 1e-30  ;;  %v3739_v0 = vld [vmem:[%s5394_s6 + $0x8] sm:$0xff]  }
 0x413   :  { %3812 = vrcp.f32 %v1655_v49 }
 0x414   :  { %v1599_v9 = vpop.xlane.xlu0 %1598  ;;  %v1597_v22 = vpop.xlane.xlu1 %1596  ;;  %3814 = vrcp.f32 %v1656_v30 }
 0x415   :  { %v1657_v25 = vmax.f32 %v1597_v22, 1e-30  ;;  %v1658_v24 = vmax.f32 %v1599_v9, 1e-30 }
 0x417   :  { %3816 = vrcp.f32 %v1657_v25 }
 0x418   :  { %v1603_v37 = vpop.xlane.xlu0 %1602  ;;  %v1601_v39 = vpop.xlane.xlu1 %1600  ;;  %3818 = vrcp.f32 %v1658_v24 }
 0x419   :  { %v1659_v41 = vmax.f32 %v1601_v39, 1e-30  ;;  %v1660_v51 = vmax.f32 %v1603_v37, 1e-30  ;;  %v3811_v33 = vpop.eup %3810 }
 0x41a   :  { %v1718_v17 = vmul.f32 %v3811_v33, %v4663_v29 }
 0x41b   :  { %3820 = vrcp.f32 %v1659_v41  ;;  %v3740_v41 = vld [vmem:[%s5394_s6 + $0x10] sm:$0xff]  }
 0x41c   :  { %v1607_v54 = vpop.xlane.xlu0 %1606  ;;  %v1605_v31 = vpop.xlane.xlu1 %1604  ;;  %3822 = vrcp.f32 %v1660_v51 }
 0x41d   :  { %v1661_v1 = vmax.f32 %v1605_v31, 1e-30  ;;  %v3813_v58 = vpop.eup %3812  ;;  %v1662_v4 = vmax.f32 %v1607_v54, 1e-30 }
 0x41e   :  { %v1719_v35 = vmul.f32 %v3813_v58, %v4670_v38  ;;  %v3815_v44 = vpop.eup %3814 }
 0x41f   :  { %3824 = vrcp.f32 %v1661_v1  ;;  %v1720_v36 = vmul.f32 %v3815_v44, %v4668_v28  ;;  %v3741_v1 = vld [vmem:[%s5394_s6 + $0x18] sm:$0xff]  }
 0x420   :  { %v1611_v23 = vpop.xlane.xlu0 %1610  ;;  %v1609_v57 = vpop.xlane.xlu1 %1608  ;;  %v1750_v2 = vpack.c.bf16 %v1719_v35, %v1718_v17  ;;  %3826 = vrcp.f32 %v1662_v4  ;;  %v3742_v35 = vld [vmem:[%s5394_s6 + $0x20] sm:$0xff]  }
 0x421   :  { %v1663_v60 = vmax.f32 %v1609_v57, 1e-30  ;;  %v3817_v50 = vpop.eup %3816  ;;  %v1664_v19 = vmax.f32 %v1611_v23, 1e-30 }
 0x422   :  { %v1721_v48 = vmul.f32 %v3817_v50, %v4676_v63  ;;  %3602 = vmatprep.mubr.bf16.mxu0 %v1750_v2  ;;  %v3819_v52 = vpop.eup %3818 }
 0x423   :  { %3828 = vrcp.f32 %v1663_v60  ;;  %v1722_v9 = vmul.f32 %v3819_v52, %v4678_v56 }
 0x424   :  { %v1615_v43 = vpop.xlane.xlu0 %1614  ;;  %v1613_v29 = vpop.xlane.xlu1 %1612  ;;  %v1751_v38 = vpack.c.bf16 %v1721_v48, %v1720_v36  ;;  %3830 = vrcp.f32 %v1664_v19 }
 0x425   :  { %v1665_v26 = vmax.f32 %v1613_v29, 1e-30  ;;  %v3821_v49 = vpop.eup %3820  ;;  %v1666_v30 = vmax.f32 %v1615_v43, 1e-30 }
 0x426   :  { %3603 = vmatmul.mubr.bf16.vlgmr.msra.gmra.mrb[64].mxu0 %v1751_v38  ;;  %v1723_v28 = vmul.f32 %v3821_v49, %v4684_v27  ;;  %v3823_v63 = vpop.eup %3822 }
 0x427   :  { %3832 = vrcp.f32 %v1665_v26  ;;  %3651 = vmatpush3.bf16.msra.mxu0 %v3738_v12  ;;  %v1724_v56 = vmul.f32 %v3823_v63, %v4686_v21 }
 0x428   :  { %v1619_v22 = vpop.xlane.xlu0 %1618  ;;  %v1617_v25 = vpop.xlane.xlu1 %1616  ;;  %v1752_v39 = vpack.c.bf16 %v1723_v28, %v1722_v9  ;;  %3652 = vmatprep.subr.bf16.mxu0 %v3739_v0  ;;  %3834 = vrcp.f32 %v1666_v30 }
 0x429   :  { %v1668_v24 = vmax.f32 %v1619_v22, 1e-30  ;;  %v1667_v37 = vmax.f32 %v1617_v25, 1e-30  ;;  %v3825_v51 = vpop.eup %3824 }
 0x42a   :  { %3606 = vmatprep.mubr.bf16.mxu0 %v1752_v39  ;;  %v1725_v27 = vmul.f32 %v3825_v51, %v4692_v53  ;;  %v3827_v33 = vpop.eup %3826 }
 0x42b   :  { %3836 = vrcp.f32 %v1667_v37  ;;  %3653 = vmatpush3.bf16.msra.mxu0 %v3739_v0  ;;  %v1726_v4 = vmul.f32 %v3827_v33, %v4694_v10  ;;  %v3743_v10 = vld [vmem:[%s5394_s6 + $0x28] sm:$0xff]  }
 0x42c   :  { %v1621_v54 = vpop.xlane.xlu1 %1620  ;;  %3838 = vrcp.f32 %v1668_v24  ;;  %v1753_v31 = vpack.c.bf16 %v1725_v27, %v1724_v56  ;;  %3654 = vmatprep.subr.bf16.mxu0 %v3740_v41 }
 0x42d   :  { %v1669_v12 = vmax.f32 %v1621_v54, 1e-30  ;;  %v3829_v58 = vpop.eup %3828 }
 0x42e   :  { %3607 = vmatmul.mubr.bf16.gmra.mrb[68].mxu0 %v1753_v31  ;;  %v1727_v21 = vmul.f32 %v3829_v58, %v4699_v3  ;;  %v3831_v53 = vpop.eup %3830 }
 0x42f   :  { %3840 = vrcp.f32 %v1669_v12  ;;  %3655 = vmatpush3.bf16.msra.mxu0 %v3740_v41  ;;  %v1728_v23 = vmul.f32 %v3831_v53, %v4701_v11 }
 0x430   :  { %v1754_v17 = vpack.c.bf16 %v1727_v21, %v1726_v4  ;;  %3656 = vmatprep.subr.bf16.mxu0 %v3741_v1 }
 0x431   :  { %v3833_v44 = vpop.eup %3832 }
 0x432   :  { %3610 = vmatprep.mubr.bf16.mxu0 %v1754_v17  ;;  %v1729_v57 = vmul.f32 %v3833_v44, %v4705_v62  ;;  %v3835_v60 = vpop.eup %3834  ;;  %v3744_v62 = vld [vmem:[%s5394_s6 + $0x30] sm:$0xff]  }
 0x433   :  { %3657 = vmatpush3.bf16.msra.mxu0 %v3741_v1  ;;  %v1730_v19 = vmul.f32 %v3835_v60, %v4707_v46 }
 0x434   :  { %v1755_v2 = vpack.c.bf16 %v1729_v57, %v1728_v23  ;;  %3658 = vmatprep.subr.bf16.mxu0 %v3742_v35 }
 0x435   :  { %v3837_v3 = vpop.eup %3836 }
 0x436   :  { %v3839_v50 = vpop.eup %3838  ;;  %3611 = vmatmul.mubr.bf16.gmra.mrb[72].mxu0 %v1755_v2  ;;  %v1731_v36 = vmul.f32 %v3837_v3, %v4711_v45 }
 0x437   :  { %3659 = vmatpush3.bf16.msra.mxu0 %v3742_v35  ;;  %v1732_v52 = vmul.f32 %v3839_v50, %v4713_v32 }
 0x438   :  { %v1756_v11 = vpack.c.bf16 %v1731_v36, %v1730_v19  ;;  %3660 = vmatprep.subr.bf16.mxu0 %v3743_v10 }
 0x439   :  { %v3841_v48 = vpop.eup %3840 }
 0x43a   :  { %v1733_v43 = vmul.f32 %v3841_v48, %v4717_v16  ;;  %3614 = vmatprep.mubr.bf16.mxu0 %v1756_v11 }
 0x43b   :  { %3661 = vmatpush3.bf16.msra.mxu0 %v3743_v10 }
 0x43c   :  { %v1757_v29 = vpack.c.bf16 %v1733_v43, %v1732_v52  ;;  %3662 = vmatprep.subr.bf16.mxu0 %v3744_v62 }
 0x43e   :  { %3615 = vmatmul.mubr.bf16.gmra.mrb[76].mxu0 %v1757_v29 }
 0x43f   :  { %3663 = vmatpush3.bf16.msra.mxu0 %v3744_v62 }
 0x44c   :  { %v1623_v46 = vpop.xlane.xlu0 %1622 }
 0x44d   :  { %v1670_v45 = vmax.f32 %v1623_v46, 1e-30 }
 0x44e   :  { %v1625_v26 = vpop.xlane.xlu1 %1624 }
 0x44f   :  { %3842 = vrcp.f32 %v1670_v45  ;;  %v1671_v38 = vmax.f32 %v1625_v26, 1e-30 }
 0x450   :  { %v1627_v0 = vpop.xlane.xlu0 %1626 }
 0x451   :  { %3844 = vrcp.f32 %v1671_v38  ;;  %v1672_v49 = vmax.f32 %v1627_v0, 1e-30 }
 0x452   :  { %v1629_v30 = vpop.xlane.xlu1 %1628 }
 0x453   :  { %3846 = vrcp.f32 %v1672_v49  ;;  %v1673_v9 = vmax.f32 %v1629_v30, 1e-30 }
 0x454   :  { %v1631_v32 = vpop.xlane.xlu0 %1630 }
 0x455   :  { %3848 = vrcp.f32 %v1673_v9  ;;  %v1674_v16 = vmax.f32 %v1631_v32, 1e-30 }
 0x456   :  { %v1633_v28 = vpop.xlane.xlu1 %1632 }
 0x457   :  { %3850 = vrcp.f32 %v1674_v16  ;;  %v1675_v63 = vmax.f32 %v1633_v28, 1e-30 }
 0x458   :  { %v1635_v22 = vpop.xlane.xlu0 %1634 }
 0x459   :  { %v3843_v25 = vpop.eup %3842  ;;  %3852 = vrcp.f32 %v1675_v63  ;;  %v1676_v24 = vmax.f32 %v1635_v22, 1e-30 }
 0x45a   :  { %v1637_v37 = vpop.xlane.xlu1 %1636  ;;  %v1734_v56 = vmul.f32 %v3843_v25, %v4727_v8 }
 0x45b   :  { %v3845_v39 = vpop.eup %3844  ;;  %3854 = vrcp.f32 %v1676_v24  ;;  %v1677_v41 = vmax.f32 %v1637_v37, 1e-30 }
 0x45c   :  { %v1639_v51 = vpop.xlane.xlu0 %1638  ;;  %v1735_v27 = vmul.f32 %v3845_v39, %v4731_v13 }
 0x45d   :  { %v3847_v33 = vpop.eup %3846  ;;  %3856 = vrcp.f32 %v1677_v41  ;;  %v1678_v54 = vmax.f32 %v1639_v51, 1e-30 }
 0x45e   :  { %v1641_v12 = vpop.xlane.xlu1 %1640  ;;  %v1758_v31 = vpack.c.bf16 %v1735_v27, %v1734_v56  ;;  %v1736_v4 = vmul.f32 %v3847_v33, %v4735_v47 }
 0x45f   :  { %v3849_v1 = vpop.eup %3848  ;;  %3858 = vrcp.f32 %v1678_v54  ;;  %v1679_v58 = vmax.f32 %v1641_v12, 1e-30 }
 0x460   :  { %v1737_v21 = vmul.f32 %v3849_v1, %v4739_v6  ;;  %v1643_v53 = vpop.xlane.xlu0 %1642  ;;  %3634 = vmatprep.mubr.bf16.mxu1 %v1758_v31 }
 0x461   :  { %v3851_v17 = vpop.eup %3850  ;;  %3860 = vrcp.f32 %v1679_v58  ;;  %v1680_v35 = vmax.f32 %v1643_v53, 1e-30 }
 0x462   :  { %v1645_v8 = vpop.xlane.xlu1 %1644  ;;  %v1759_v44 = vpack.c.bf16 %v1737_v21, %v1736_v4  ;;  %v1738_v60 = vmul.f32 %v3851_v17, %v4743_v20 }
 0x463   :  { %v3853_v13 = vpop.eup %3852  ;;  %3862 = vrcp.f32 %v1680_v35  ;;  %v1681_v23 = vmax.f32 %v1645_v8, 1e-30 }
 0x464   :  { %v1647_v57 = vpop.xlane.xlu0 %1646  ;;  %3635 = vmatmul.mubr.bf16.vlgmr.msra.gmra.mrb[96].mxu1 %v1759_v44  ;;  %v1739_v2 = vmul.f32 %v3853_v13, %v4747_v59 }
 0x465   :  { %v3855_v10 = vpop.eup %3854  ;;  %3864 = vrcp.f32 %v1681_v23  ;;  %v1682_v47 = vmax.f32 %v1647_v57, 1e-30 }
 0x466   :  { %v1649_v6 = vpop.xlane.xlu1 %1648  ;;  %v1760_v3 = vpack.c.bf16 %v1739_v2, %v1738_v60  ;;  %v1740_v48 = vmul.f32 %v3855_v10, %v4751_v18 }
 0x467   :  { %v3857_v50 = vpop.eup %3856  ;;  %3866 = vrcp.f32 %v1682_v47  ;;  %v1683_v19 = vmax.f32 %v1649_v6, 1e-30 }
 0x468   :  { %v1651_v36 = vpop.xlane.xlu0 %1650  ;;  %3638 = vmatprep.mubr.bf16.mxu1 %v1760_v3  ;;  %v1741_v11 = vmul.f32 %v3857_v50, %v4755_v55 }
 0x469   :  { %v3859_v62 = vpop.eup %3858  ;;  %3868 = vrcp.f32 %v1683_v19  ;;  %v1684_v52 = vmax.f32 %v1651_v36, 1e-30 }
 0x46a   :  { %v1653_v20 = vpop.xlane.xlu1 %1652  ;;  %v1761_v43 = vpack.c.bf16 %v1741_v11, %v1740_v48  ;;  %v1742_v46 = vmul.f32 %v3859_v62, %v4759_v34 }
 0x46b   :  { %v3861_v59 = vpop.eup %3860  ;;  %3870 = vrcp.f32 %v1684_v52  ;;  %v1685_v29 = vmax.f32 %v1653_v20, 1e-30 }
 0x46c   :  { %3639 = vmatmul.mubr.bf16.gmra.mrb[100].mxu1 %v1761_v43  ;;  %v1743_v45 = vmul.f32 %v3861_v59, %v4763_v7 }
 0x46d   :  { %v3863_v26 = vpop.eup %3862  ;;  %3872 = vrcp.f32 %v1685_v29 }
 0x46e   :  { %v1762_v38 = vpack.c.bf16 %v1743_v45, %v1742_v46  ;;  %v1744_v18 = vmul.f32 %v3863_v26, %v4766_v40  ;;  %v3745_v40 = vld [vmem:[%s5394_s6 + $0x38] sm:$0xff]  }
 0x46f   :  { %v3865_v0 = vpop.eup %3864  ;;  %3664 = vmatprep.subr.bf16.mxu0 %v3745_v40 }
 0x470   :  { %3642 = vmatprep.mubr.bf16.mxu1 %v1762_v38  ;;  %v1745_v55 = vmul.f32 %v3865_v0, %v4769_v15  ;;  %3665 = vmatpush3.bf16.msra.mxu0 %v3745_v40  ;;  %v2427_v15 = vlaneseq }
 0x471   :  { %v3867_v49 = vpop.eup %3866 }
 0x472   :  { %v1763_v30 = vpack.c.bf16 %v1745_v55, %v1744_v18  ;;  %v1746_v32 = vmul.f32 %v3867_v49, %v4772_v42  ;;  %v4841_v42 = vshrl.u32 %v2427_v15, 7 }
 0x473   :  { %v3869_v9 = vpop.eup %3868 }
 0x474   :  { %3643 = vmatmul.mubr.bf16.gmra.mrb[104].mxu1 %v1763_v30  ;;  %v1747_v16 = vmul.f32 %v3869_v9, %v4775_v5  ;;  %v2256_v5 = vld [vmem:[%s5389_s1] sm:$0x3] }
 0x475   :  { %v3871_v34 = vpop.eup %3870 }
 0x476   :  { %v1764_v28 = vpack.c.bf16 %v1747_v16, %v1746_v32  ;;  %v1748_v63 = vmul.f32 %v3871_v34, %v4778_v61  ;;  %v2745_v61 = vsub.s32 0, %v4841_v42  ;;  %v4868_v32 = vld [vmem:[%s5395_s7] ss:$0 sm:$0xff] }
 0x477   :  { %v3873_v7 = vpop.eup %3872 }
 0x478   :  { %3646 = vmatprep.mubr.bf16.mxu1 %v1764_v28  ;;  %v1749_v22 = vmul.f32 %v3873_v7, %v4781_v14  ;;  %v2812_v14 = vsub.s32 1, %v4841_v42  ;;  %v2746_v24 = vrot.slane %v2256_v5, %v2745_v61  ;;  %v4874_v7 = vld [vmem:[%s5396_s8] ss:$0 sm:$0xff]  ;;  %s2360_s8 = sld [smem:[#allocation2]] }
 0x47a   :  { %v1765_v25 = vpack.c.bf16 %v1749_v22, %v1748_v63  ;;  %2752 = vbcast.lane.b32.xlu1 %v2746_v24, 264  ;;  %v4848_v37 = vrot.slane %v2256_v5, %v2812_v14  ;;  %2748 = vbcast.lane.b32.xlu0 %v2746_v24, 256 }
 0x47c   :  { %3647 = vmatmul.mubr.bf16.gmra.mrb[108].mxu1 %v1765_v25 }
 0x47e   :  { %2815 = vbcast.lane.b32.xlu1 %v4848_v37, 256  ;;  %2756 = vbcast.lane.b32.xlu0 %v2746_v24, 272 }
 0x482   :  { %2819 = vbcast.lane.b32.xlu1 %v4848_v37, 264  ;;  %2760 = vbcast.lane.b32.xlu0 %v2746_v24, 280 }
 0x486   :  { %2823 = vbcast.lane.b32.xlu1 %v4848_v37, 272  ;;  %2764 = vbcast.lane.b32.xlu0 %v2746_v24, 288 }
 0x48a   :  { %2827 = vbcast.lane.b32.xlu1 %v4848_v37, 280  ;;  %2768 = vbcast.lane.b32.xlu0 %v2746_v24, 296 }
 0x48e   :  { %2831 = vbcast.lane.b32.xlu1 %v4848_v37, 288  ;;  %2772 = vbcast.lane.b32.xlu0 %v2746_v24, 304 }
 0x492   :  { %2835 = vbcast.lane.b32.xlu1 %v4848_v37, 296  ;;  %2776 = vbcast.lane.b32.xlu0 %v2746_v24, 312 }
 0x496   :  { %2839 = vbcast.lane.b32.xlu1 %v4848_v37, 304  ;;  %2780 = vbcast.lane.b32.xlu0 %v2746_v24, 320 }
 0x49a   :  { %2843 = vbcast.lane.b32.xlu1 %v4848_v37, 312  ;;  %2784 = vbcast.lane.b32.xlu0 %v2746_v24, 328 }
 0x49e   :  { %2847 = vbcast.lane.b32.xlu1 %v4848_v37, 320  ;;  %2788 = vbcast.lane.b32.xlu0 %v2746_v24, 336 }
 0x4a2   :  { %2851 = vbcast.lane.b32.xlu1 %v4848_v37, 328  ;;  %2792 = vbcast.lane.b32.xlu0 %v2746_v24, 344 }
 0x4a6   :  { %2855 = vbcast.lane.b32.xlu1 %v4848_v37, 336  ;;  %2796 = vbcast.lane.b32.xlu0 %v2746_v24, 352 }
 0x4aa   :  { %2859 = vbcast.lane.b32.xlu1 %v4848_v37, 344  ;;  %2800 = vbcast.lane.b32.xlu0 %v2746_v24, 360 }
 0x4ae   :  { %2863 = vbcast.lane.b32.xlu1 %v4848_v37, 352  ;;  %2804 = vbcast.lane.b32.xlu0 %v2746_v24, 368 }
 0x4b2   :  { %2867 = vbcast.lane.b32.xlu1 %v4848_v37, 360  ;;  %2808 = vbcast.lane.b32.xlu0 %v2746_v24, 376  ;;  %v4882_v24 = vld [vmem:[%s5397_s9] ss:$0 sm:$0xff] }
 0x4b6   :  { %2871 = vbcast.lane.b32.xlu1 %v4848_v37, 368 }
 0x4f9   :  { %v3604_v39 = vpop.f32.mrb[64].mxu0 }
 0x4fa   :  { %v1816_v41 = vpop.f32.mrb[65].mxu0 }
 0x4fb   :  { %v3605_v51 = vpop.f32.mrb[66].mxu0 }
 0x4fc   :  { %v1977_v56 = vpack.c.bf16 %v3605_v51, %v3604_v39  ;;  %v1819_v27 = vpop.f32.mrb[67].mxu0 }
 0x4fd   :  { %v1976_v33 = vpack.c.bf16 %v1819_v27, %v1816_v41 }
 0x4ff   :  { %3666 = vmatprep.mubr.bf16.mxu0 %v1976_v33 }
 0x500   :  { %3667 = vmatmul.mubr.bf16.vlgmr.msra.gmra.mrb[80].mxu0 %v1977_v56 }
 0x501   :  { %v3608_v54 = vpop.f32.mrb[68].mxu0 }
 0x502   :  { %v1832_v12 = vpop.f32.mrb[69].mxu0 }
 0x503   :  { %v3609_v31 = vpop.f32.mrb[70].mxu0 }
 0x504   :  { %v1979_v1 = vpack.c.bf16 %v3609_v31, %v3608_v54  ;;  %v1835_v58 = vpop.f32.mrb[71].mxu0 }
 0x505   :  { %v1978_v4 = vpack.c.bf16 %v1835_v58, %v1832_v12 }
 0x507   :  { %3670 = vmatprep.mubr.bf16.mxu0 %v1978_v4 }
 0x508   :  { %3671 = vmatmul.mubr.bf16.gmra.mrb[84].mxu0 %v1979_v1 }
 0x509   :  { %v3612_v21 = vpop.f32.mrb[72].mxu0 }
 0x50a   :  { %v1848_v53 = vpop.f32.mrb[73].mxu0 }
 0x50b   :  { %v3613_v17 = vpop.f32.mrb[74].mxu0 }
 0x50c   :  { %v1981_v35 = vpack.c.bf16 %v3613_v17, %v3612_v21  ;;  %v1851_v8 = vpop.f32.mrb[75].mxu0 }
 0x50d   :  { %v1980_v44 = vpack.c.bf16 %v1851_v8, %v1848_v53 }
 0x50f   :  { %3674 = vmatprep.mubr.bf16.mxu0 %v1980_v44 }
 0x510   :  { %3675 = vmatmul.mubr.bf16.gmra.mrb[88].mxu0 %v1981_v35 }
 0x511   :  { %v3616_v13 = vpop.f32.mrb[76].mxu0 }
 0x512   :  { %v1864_v23 = vpop.f32.mrb[77].mxu0 }
 0x513   :  { %v3617_v57 = vpop.f32.mrb[78].mxu0 }
 0x514   :  { %v1983_v60 = vpack.c.bf16 %v3617_v57, %v3616_v13  ;;  %v1867_v2 = vpop.f32.mrb[79].mxu0 }
 0x515   :  { %v1982_v10 = vpack.c.bf16 %v1867_v2, %v1864_v23 }
 0x517   :  { %3678 = vmatprep.mubr.bf16.mxu0 %v1982_v10 }
 0x518   :  { %3679 = vmatmul.mubr.bf16.gmra.mrb[92].mxu0 %v1983_v60 }
 0x537   :  { %v3636_v47 = vpop.f32.mrb[96].mxu1 }
 0x538   :  { %v1913_v6 = vpop.f32.mrb[97].mxu1 }
 0x539   :  { %v3637_v3 = vpop.f32.mrb[98].mxu1 }
 0x53a   :  { %v1985_v50 = vpack.c.bf16 %v3637_v3, %v3636_v47  ;;  %v1916_v19 = vpop.f32.mrb[99].mxu1 }
 0x53b   :  { %v1984_v36 = vpack.c.bf16 %v1916_v19, %v1913_v6 }
 0x53d   :  { %3682 = vmatprep.mubr.bf16.mxu0 %v1984_v36 }
 0x53e   :  { %3683 = vmatmul.mubr.bf16.gmra.mrb[96].mxu0 %v1985_v50 }
 0x53f   :  { %v3640_v48 = vpop.f32.mrb[100].mxu1 }
 0x540   :  { %v1929_v11 = vpop.f32.mrb[101].mxu1 }
 0x541   :  { %v3641_v62 = vpop.f32.mrb[102].mxu1 }
 0x542   :  { %v1987_v52 = vpack.c.bf16 %v3641_v62, %v3640_v48  ;;  %v1932_v20 = vpop.f32.mrb[103].mxu1 }
 0x543   :  { %v1986_v43 = vpack.c.bf16 %v1932_v20, %v1929_v11 }
 0x545   :  { %3686 = vmatprep.mubr.bf16.mxu0 %v1986_v43 }
 0x546   :  { %3687 = vmatmul.mubr.bf16.gmra.mrb[100].mxu0 %v1987_v52 }
 0x547   :  { %v3644_v59 = vpop.f32.mrb[104].mxu1 }
 0x548   :  { %v1945_v29 = vpop.f32.mrb[105].mxu1 }
 0x549   :  { %v3645_v46 = vpop.f32.mrb[106].mxu1 }
 0x54a   :  { %v1989_v45 = vpack.c.bf16 %v3645_v46, %v3644_v59  ;;  %v1948_v26 = vpop.f32.mrb[107].mxu1 }
 0x54b   :  { %v1988_v38 = vpack.c.bf16 %v1948_v26, %v1945_v29 }
 0x54d   :  { %3690 = vmatprep.mubr.bf16.mxu0 %v1988_v38 }
 0x54e   :  { %3691 = vmatmul.mubr.bf16.gmra.mrb[104].mxu0 %v1989_v45 }
 0x54f   :  { %v3648_v0 = vpop.f32.mrb[108].mxu1 }
 0x550   :  { %v1961_v18 = vpop.f32.mrb[109].mxu1 }
 0x551   :  { %v3649_v55 = vpop.f32.mrb[110].mxu1 }
 0x552   :  { %v1991_v49 = vpack.c.bf16 %v3649_v55, %v3648_v0  ;;  %v1964_v30 = vpop.f32.mrb[111].mxu1 }
 0x553   :  { %v1990_v9 = vpack.c.bf16 %v1964_v30, %v1961_v18 }
 0x555   :  { %3694 = vmatprep.mubr.bf16.mxu0 %v1990_v9 }
 0x556   :  { %3695 = vmatmul.mubr.bf16.gmra.mrb[108].mxu0 %v1991_v49 }
 0x5d3   :  { %v3668_v16 = vpop.f32.mrb[80].mxu0 }
 0x5d4   :  { %v2106_v34 = vadd.f32 %v3668_v16, %v4868_v32  ;;  %v2097_v28 = vpop.f32.mrb[81].mxu0 }
 0x5d5   :  { %v3669_v63 = vpop.f32.mrb[82].mxu0  ;;  %v2098_v5 = vadd.f32 %v4868_v32, %v2097_v28 }
 0x5d6   :  { %v2226_v22 = vmax.f32 %v2106_v34, 0.0  ;;  %v2109_v25 = vadd.f32 %v3669_v63, %v4868_v32  ;;  %v2100_v40 = vpop.f32.mrb[83].mxu0 }
 0x5d7   :  { %v2101_v39 = vadd.f32 %v4868_v32, %v2100_v40  ;;  %v2224_v56 = vmax.f32 %v2098_v5, 0.0 }
 0x5d8   :  { %v2227_v61 = vmax.f32 %v2109_v25, 0.0  ;;  %v2266_v14 = vmul.f32 %v4874_v7, %v2226_v22  ;;  %v2644_v33 = vmul.f32 %v4882_v24, %v2226_v22 }
 0x5d9   :  { %v2225_v31 = vmax.f32 %v2101_v39, 0.0  ;;  %v2264_v58 = vmul.f32 %v4874_v7, %v2224_v56  ;;  %v2642_v35 = vmul.f32 %v4882_v24, %v2224_v56 }
 0x5da   :  { %2300 = vadd.xlane.f32.xlu0 %v2266_v14  ;;  %v2267_v41 = vmul.f32 %v4874_v7, %v2227_v61  ;;  %v2645_v12 = vmul.f32 %v4882_v24, %v2227_v61 }
 0x5db   :  { %v3672_v51 = vpop.f32.mrb[84].mxu0  ;;  %v2265_v21 = vmul.f32 %v4874_v7, %v2225_v31  ;;  %v2643_v23 = vmul.f32 %v4882_v24, %v2225_v31 }
 0x5dc   :  { %2302 = vadd.xlane.f32.xlu1 %v2267_v41  ;;  %v2113_v27 = vpop.f32.mrb[85].mxu0  ;;  %v2122_v4 = vadd.f32 %v3672_v51, %v4868_v32 }
 0x5dd   :  { %v3673_v54 = vpop.f32.mrb[86].mxu0  ;;  %v2114_v10 = vadd.f32 %v4868_v32, %v2113_v27  ;;  %v4922_v27 = vpop.permute.xlu1 %2752 }
 0x5de   :  { %2678 = vadd.xlane.f32.xlu0 %v2644_v33  ;;  %v2116_v1 = vpop.f32.mrb[87].mxu0  ;;  %v2125_v53 = vadd.f32 %v3673_v54, %v4868_v32  ;;  %v2230_v8 = vmax.f32 %v2122_v4, 0.0 }
 0x5df   :  { %v2117_v6 = vadd.f32 %v4868_v32, %v2116_v1  ;;  %v2228_v19 = vmax.f32 %v2114_v10, 0.0  ;;  %v4926_v1 = vpop.permute.xlu0 %2748 }
 0x5e0   :  { %2680 = vadd.xlane.f32.xlu1 %v2645_v12  ;;  %v2231_v57 = vmax.f32 %v2125_v53, 0.0  ;;  %v2270_v2 = vmul.f32 %v4874_v7, %v2230_v8  ;;  %v2648_v50 = vmul.f32 %v4882_v24, %v2230_v8 }
 0x5e1   :  { %v2229_v62 = vmax.f32 %v2117_v6, 0.0  ;;  %v2268_v20 = vmul.f32 %v4874_v7, %v2228_v19  ;;  %v2646_v46 = vmul.f32 %v4882_v24, %v2228_v19 }
 0x5e2   :  { %2296 = vadd.xlane.f32.xlu0 %v2264_v58  ;;  %v2271_v47 = vmul.f32 %v4874_v7, %v2231_v57  ;;  %v2649_v11 = vmul.f32 %v4882_v24, %v2231_v57 }
 0x5e3   :  { %v3676_v17 = vpop.f32.mrb[88].mxu0  ;;  %v2269_v59 = vmul.f32 %v4874_v7, %v2229_v62  ;;  %v2647_v26 = vmul.f32 %v4882_v24, %v2229_v62 }
 0x5e4   :  { %v2129_v44 = vpop.f32.mrb[89].mxu0  ;;  %2298 = vadd.xlane.f32.xlu1 %v2265_v21  ;;  %v2138_v43 = vadd.f32 %v3676_v17, %v4868_v32  ;;  %v4930_v17 = vpop.permute.xlu1 %2815 }
 0x5e5   :  { %v3677_v13 = vpop.f32.mrb[90].mxu0  ;;  %v2130_v18 = vadd.f32 %v4868_v32, %v2129_v44 }
 0x5e6   :  { %v2132_v60 = vpop.f32.mrb[91].mxu0  ;;  %2674 = vadd.xlane.f32.xlu0 %v2642_v35  ;;  %v2141_v29 = vadd.f32 %v3677_v13, %v4868_v32  ;;  %v2234_v45 = vmax.f32 %v2138_v43, 0.0 }
 0x5e7   :  { %v2133_v49 = vadd.f32 %v4868_v32, %v2132_v60  ;;  %v2232_v9 = vmax.f32 %v2130_v18, 0.0  ;;  %v4935_v60 = vpop.permute.xlu0 %2756 }
 0x5e8   :  { %2676 = vadd.xlane.f32.xlu1 %v2643_v23  ;;  %v2235_v38 = vmax.f32 %v2141_v29, 0.0  ;;  %v2274_v0 = vmul.f32 %v4874_v7, %v2234_v45  ;;  %v2652_v30 = vmul.f32 %v4882_v24, %v2234_v45 }
 0x5e9   :  { %v2233_v34 = vmax.f32 %v2133_v49, 0.0  ;;  %v2272_v28 = vmul.f32 %v4874_v7, %v2232_v9  ;;  %v2650_v40 = vmul.f32 %v4882_v24, %v2232_v9 }
 0x5ea   :  { %2308 = vadd.xlane.f32.xlu0 %v2270_v2  ;;  %v2275_v55 = vmul.f32 %v4874_v7, %v2235_v38  ;;  %v2653_v16 = vmul.f32 %v4882_v24, %v2235_v38 }
 0x5eb   :  { %v3680_v3 = vpop.f32.mrb[92].mxu0  ;;  %v2273_v22 = vmul.f32 %v4874_v7, %v2233_v34  ;;  %v2651_v61 = vmul.f32 %v4882_v24, %v2233_v34 }
 0x5ec   :  { %2310 = vadd.xlane.f32.xlu1 %v2271_v47  ;;  %v2145_v36 = vpop.f32.mrb[93].mxu0  ;;  %v2154_v63 = vadd.f32 %v3680_v3, %v4868_v32  ;;  %v4938_v47 = vpop.permute.xlu1 %2819 }
 0x5ed   :  { %v3681_v48 = vpop.f32.mrb[94].mxu0  ;;  %v2146_v41 = vadd.f32 %v4868_v32, %v2145_v36 }
 0x5ee   :  { %2686 = vadd.xlane.f32.xlu0 %v2648_v50  ;;  %v2148_v52 = vpop.f32.mrb[95].mxu0  ;;  %v2157_v25 = vadd.f32 %v3681_v48, %v4868_v32  ;;  %v2238_v5 = vmax.f32 %v2154_v63, 0.0 }
 0x5ef   :  { %v2149_v56 = vadd.f32 %v4868_v32, %v2148_v52  ;;  %v2236_v54 = vmax.f32 %v2146_v41, 0.0  ;;  %v4944_v52 = vpop.permute.xlu0 %2760 }
 0x5f0   :  { %2688 = vadd.xlane.f32.xlu1 %v2649_v11  ;;  %v2239_v14 = vmax.f32 %v2157_v25, 0.0  ;;  %v2278_v39 = vmul.f32 %v4874_v7, %v2238_v5  ;;  %v2656_v33 = vmul.f32 %v4882_v24, %v2238_v5 }
 0x5f1   :  { %v2237_v31 = vmax.f32 %v2149_v56, 0.0  ;;  %v2276_v58 = vmul.f32 %v4874_v7, %v2236_v54  ;;  %v2654_v23 = vmul.f32 %v4882_v24, %v2236_v54 }
 0x5f2   :  { %2304 = vadd.xlane.f32.xlu0 %v2268_v20  ;;  %v2279_v51 = vmul.f32 %v4874_v7, %v2239_v14  ;;  %v2657_v12 = vmul.f32 %v4882_v24, %v2239_v14 }
 0x5f3   :  { %v2277_v35 = vmul.f32 %v4874_v7, %v2237_v31  ;;  %v2655_v2 = vmul.f32 %v4882_v24, %v2237_v31  ;;  %v4952_v18 = vpop.permute.xlu0 %2764 }
 0x5f4   :  { %2306 = vadd.xlane.f32.xlu1 %v2269_v59  ;;  %v4947_v59 = vpop.permute.xlu1 %2823 }
 0x5f6   :  { %2682 = vadd.xlane.f32.xlu0 %v2646_v46 }
 0x5f7   :  { %v4960_v25 = vpop.permute.xlu0 %2768 }
 0x5f8   :  { %2684 = vadd.xlane.f32.xlu1 %v2647_v26 }
 0x5fa   :  { %2316 = vadd.xlane.f32.xlu0 %v2274_v0 }
 0x5fb   :  { %v4969_v31 = vpop.permute.xlu0 %2772 }
 0x5fc   :  { %2318 = vadd.xlane.f32.xlu1 %v2275_v55 }
 0x5fe   :  { %2694 = vadd.xlane.f32.xlu0 %v2652_v30 }
 0x600   :  { %2696 = vadd.xlane.f32.xlu1 %v2653_v16  ;;  %v4956_v16 = vpop.permute.xlu1 %2827 }
 0x602   :  { %2312 = vadd.xlane.f32.xlu0 %v2272_v28 }
 0x604   :  { %2314 = vadd.xlane.f32.xlu1 %v2273_v22 }
 0x606   :  { %2690 = vadd.xlane.f32.xlu0 %v2650_v40 }
 0x608   :  { %2692 = vadd.xlane.f32.xlu1 %v2651_v61 }
 0x60a   :  { %2324 = vadd.xlane.f32.xlu0 %v2278_v39  ;;  %v4964_v39 = vpop.permute.xlu1 %2831 }
 0x60c   :  { %2326 = vadd.xlane.f32.xlu1 %v2279_v51 }
 0x60e   :  { %2702 = vadd.xlane.f32.xlu0 %v2656_v33 }
 0x610   :  { %2704 = vadd.xlane.f32.xlu1 %v2657_v12 }
 0x611   :  { %v3684_v4 = vpop.f32.mrb[96].mxu0 }
 0x612   :  { %v2170_v21 = vadd.f32 %v3684_v4, %v4868_v32  ;;  %v2161_v53 = vpop.f32.mrb[97].mxu0  ;;  %2320 = vadd.xlane.f32.xlu0 %v2276_v58 }
 0x613   :  { %v3685_v8 = vpop.f32.mrb[98].mxu0  ;;  %v2162_v3 = vadd.f32 %v4868_v32, %v2161_v53 }
 0x614   :  { %v2173_v44 = vadd.f32 %v3685_v8, %v4868_v32  ;;  %v2164_v13 = vpop.f32.mrb[99].mxu0  ;;  %v2242_v57 = vmax.f32 %v2170_v21, 0.0  ;;  %2322 = vadd.xlane.f32.xlu1 %v2277_v35  ;;  %v4972_v21 = vpop.permute.xlu1 %2835 }
 0x615   :  { %v2165_v48 = vadd.f32 %v4868_v32, %v2164_v13  ;;  %v2240_v43 = vmax.f32 %v2162_v3, 0.0  ;;  %v4978_v13 = vpop.permute.xlu0 %2776 }
 0x616   :  { %v2243_v10 = vmax.f32 %v2173_v44, 0.0  ;;  %2698 = vadd.xlane.f32.xlu0 %v2654_v23  ;;  %v2282_v6 = vmul.f32 %v4874_v7, %v2242_v57  ;;  %v2660_v20 = vmul.f32 %v4882_v24, %v2242_v57 }
 0x617   :  { %v2241_v46 = vmax.f32 %v2165_v48, 0.0  ;;  %v2280_v45 = vmul.f32 %v4874_v7, %v2240_v43  ;;  %v2658_v34 = vmul.f32 %v4882_v24, %v2240_v43 }
 0x618   :  { %2700 = vadd.xlane.f32.xlu1 %v2655_v2  ;;  %v2283_v36 = vmul.f32 %v4874_v7, %v2243_v10  ;;  %v2661_v29 = vmul.f32 %v4882_v24, %v2243_v10  ;;  %v4981_v2 = vpop.permute.xlu1 %2839 }
 0x619   :  { %v3688_v50 = vpop.f32.mrb[100].mxu0  ;;  %v2281_v55 = vmul.f32 %v4874_v7, %v2241_v46  ;;  %v2659_v63 = vmul.f32 %v4882_v24, %v2241_v46 }
 0x61a   :  { %v2177_v19 = vpop.f32.mrb[101].mxu0  ;;  %2332 = vadd.xlane.f32.xlu0 %v2282_v6  ;;  %v2186_v26 = vadd.f32 %v3688_v50, %v4868_v32 }
 0x61b   :  { %v3689_v11 = vpop.f32.mrb[102].mxu0  ;;  %v2178_v5 = vadd.f32 %v4868_v32, %v2177_v19  ;;  %v4986_v19 = vpop.permute.xlu0 %2780 }
 0x61c   :  { %v2180_v62 = vpop.f32.mrb[103].mxu0  ;;  %2334 = vadd.xlane.f32.xlu1 %v2283_v36  ;;  %v2189_v49 = vadd.f32 %v3689_v11, %v4868_v32  ;;  %v2246_v28 = vmax.f32 %v2186_v26, 0.0  ;;  %v4990_v11 = vpop.permute.xlu1 %2843 }
 0x61d   :  { %v2181_v51 = vadd.f32 %v4868_v32, %v2180_v62  ;;  %v2244_v12 = vmax.f32 %v2178_v5, 0.0 }
 0x61e   :  { %2710 = vadd.xlane.f32.xlu0 %v2660_v20  ;;  %v2247_v22 = vmax.f32 %v2189_v49, 0.0  ;;  %v2286_v40 = vmul.f32 %v4874_v7, %v2246_v28  ;;  %v2664_v54 = vmul.f32 %v4882_v24, %v2246_v28 }
 0x61f   :  { %v2245_v4 = vmax.f32 %v2181_v51, 0.0  ;;  %v2284_v53 = vmul.f32 %v4874_v7, %v2244_v12  ;;  %v2662_v23 = vmul.f32 %v4882_v24, %v2244_v12  ;;  %v4994_v46 = vpop.permute.xlu0 %2784 }
 0x620   :  { %2712 = vadd.xlane.f32.xlu1 %v2661_v29  ;;  %v2287_v41 = vmul.f32 %v4874_v7, %v2247_v22  ;;  %v2665_v58 = vmul.f32 %v4882_v24, %v2247_v22 }
 0x621   :  { %v3692_v38 = vpop.f32.mrb[104].mxu0  ;;  %v2285_v8 = vmul.f32 %v4874_v7, %v2245_v4  ;;  %v2663_v10 = vmul.f32 %v4882_v24, %v2245_v4 }
 0x622   :  { %v2193_v0 = vpop.f32.mrb[105].mxu0  ;;  %2328 = vadd.xlane.f32.xlu0 %v2280_v45  ;;  %v2202_v35 = vadd.f32 %v3692_v38, %v4868_v32  ;;  %v4998_v38 = vpop.permute.xlu1 %2847 }
 0x623   :  { %v3693_v30 = vpop.f32.mrb[106].mxu0  ;;  %v2194_v50 = vadd.f32 %v4868_v32, %v2193_v0 }
 0x624   :  { %v2196_v9 = vpop.f32.mrb[107].mxu0  ;;  %2330 = vadd.xlane.f32.xlu1 %v2281_v55  ;;  %v2205_v44 = vadd.f32 %v3693_v30, %v4868_v32  ;;  %v2250_v57 = vmax.f32 %v2202_v35, 0.0 }
 0x625   :  { %v2197_v48 = vadd.f32 %v4868_v32, %v2196_v9  ;;  %v2248_v20 = vmax.f32 %v2194_v50, 0.0  ;;  %v5003_v9 = vpop.permute.xlu0 %2788 }
 0x626   :  { %2706 = vadd.xlane.f32.xlu0 %v2658_v34  ;;  %v2251_v6 = vmax.f32 %v2205_v44, 0.0  ;;  %v2290_v3 = vmul.f32 %v4874_v7, %v2250_v57  ;;  %v2668_v62 = vmul.f32 %v4882_v24, %v2250_v57 }
 0x627   :  { %v2249_v29 = vmax.f32 %v2197_v48, 0.0  ;;  %v2288_v45 = vmul.f32 %v4874_v7, %v2248_v20  ;;  %v2666_v49 = vmul.f32 %v4882_v24, %v2248_v20 }
 0x628   :  { %2708 = vadd.xlane.f32.xlu1 %v2659_v63  ;;  %v2291_v36 = vmul.f32 %v4874_v7, %v2251_v6  ;;  %v2669_v43 = vmul.f32 %v4882_v24, %v2251_v6  ;;  %v5006_v63 = vpop.permute.xlu1 %2851 }
 0x629   :  { %v3696_v61 = vpop.f32.mrb[108].mxu0  ;;  %v2289_v0 = vmul.f32 %v4874_v7, %v2249_v29  ;;  %v2667_v34 = vmul.f32 %v4882_v24, %v2249_v29  ;;  %5439 = vst [vmem:[#allocation8_spill] sm:$0xff] %v5006_v63 }
 0x62a   :  { %v2209_v14 = vpop.f32.mrb[109].mxu0  ;;  %2340 = vadd.xlane.f32.xlu0 %v2286_v40  ;;  %v2218_v26 = vadd.f32 %v3696_v61, %v4868_v32 }
 0x62b   :  { %v3697_v56 = vpop.f32.mrb[110].mxu0  ;;  %v2210_v40 = vadd.f32 %v4868_v32, %v2209_v14 }
 0x62c   :  { %v2212_v33 = vpop.f32.mrb[111].mxu0  ;;  %2342 = vadd.xlane.f32.xlu1 %v2287_v41  ;;  %v2221_v55 = vadd.f32 %v3697_v56, %v4868_v32  ;;  %v2254_v30 = vmax.f32 %v2218_v26, 0.0  ;;  %v5014_v41 = vpop.permute.xlu0 %2792 }
 0x62d   :  { %v5012_v61 = vadd.f32 %v4868_v32, %v2212_v33  ;;  %v2252_v56 = vmax.f32 %v2210_v40, 0.0 }
 0x62e   :  { %2718 = vadd.xlane.f32.xlu0 %v2664_v54  ;;  %v2255_v28 = vmax.f32 %v2221_v55, 0.0  ;;  %v2294_v22 = vmul.f32 %v4874_v7, %v2254_v30  ;;  %v2672_v51 = vmul.f32 %v4882_v24, %v2254_v30  ;;  %v5017_v54 = vpop.permute.xlu1 %2855 }
 0x62f   :  { %v2292_v14 = vmul.f32 %v4874_v7, %v2252_v56 }
 0x630   :  { %2720 = vadd.xlane.f32.xlu1 %v2665_v58  ;;  %v2295_v5 = vmul.f32 %v4874_v7, %v2255_v28  ;;  %v2673_v12 = vmul.f32 %v4882_v24, %v2255_v28  ;;  %v2253_v58 = vmax.f32 %v5012_v61, 0.0  ;;  %v5022_v4 = vpop.permute.xlu0 %2796 }
 0x632   :  { %2336 = vadd.xlane.f32.xlu0 %v2284_v53  ;;  %v2293_v32 = vmul.f32 %v4874_v7, %v2253_v58  ;;  %v5027_v33 = vpop.permute.xlu1 %2859  ;;  %v2670_v53 = vmul.f32 %v4882_v24, %v2252_v56 }
 0x633   :  { %5440 = vst [vmem:[#allocation9_spill] sm:$0xff] %v5027_v33 }
 0x634   :  { %2338 = vadd.xlane.f32.xlu1 %v2285_v8  ;;  %v5030_v35 = vpop.permute.xlu0 %2800 }
 0x636   :  { %2714 = vadd.xlane.f32.xlu0 %v2662_v23  ;;  %v5032_v8 = vpop.permute.xlu1 %2863 }
 0x637   :  { %5441 = vst [vmem:[#allocation10_spill] sm:$0xff] %v5032_v8 }
 0x638   :  { %2716 = vadd.xlane.f32.xlu1 %v2663_v10  ;;  %v5034_v44 = vpop.permute.xlu0 %2804 }
 0x63a   :  { %2348 = vadd.xlane.f32.xlu0 %v2290_v3  ;;  %v5036_v23 = vpop.permute.xlu1 %2867  ;;  %v5044_v3 = vand.u32 127, %v2427_v15 }
 0x63b   :  { %5442 = vst [vmem:[#allocation11_spill] sm:$0xff] %v5036_v23 }
 0x63c   :  { %2350 = vadd.xlane.f32.xlu1 %v2291_v36  ;;  %v5038_v57 = vpop.permute.xlu0 %2808  ;;  %v2433_v36 = vadd.s32 4294967288, %v5044_v3  ;;  %v2447_v40 = vadd.s32 4294967272, %v5044_v3  ;;  %v2489_v23 = vadd.s32 4294967224, %v5044_v3  ;;  %v2503_v61 = vadd.s32 4294967208, %v5044_v3 }
 0x63e   :  { %2726 = vadd.xlane.f32.xlu0 %v2668_v62  ;;  %v5041_v7 = vpop.permute.xlu1 %2871  ;;  %v5051_v62 = vstv %s2360_s8  ;;  %v5059_v29 = vsub.s32 %v2433_v36, %v4841_v42  ;;  %v2468_v36 = vadd.s32 4294967248, %v5044_v3 }
 0x63f   :  { %5443 = vst [vmem:[#allocation12_spill] sm:$0xff] %v5041_v7 }
 0x640   :  { %2728 = vadd.xlane.f32.xlu1 %v2669_v43 }
 0x642   :  { %2344 = vadd.xlane.f32.xlu0 %v2288_v45 }
 0x644   :  { %2346 = vadd.xlane.f32.xlu1 %v2289_v0 }
 0x646   :  { %2722 = vadd.xlane.f32.xlu0 %v2666_v49 }
 0x648   :  { %2724 = vadd.xlane.f32.xlu1 %v2667_v34  ;;  %v2440_v34 = vadd.s32 4294967280, %v5044_v3 }
 0x64a   :  { %2356 = vadd.xlane.f32.xlu0 %v2294_v22 }
 0x64c   :  { %2358 = vadd.xlane.f32.xlu1 %v2295_v5 }
 0x64e   :  { %2734 = vadd.xlane.f32.xlu0 %v2672_v51  ;;  %v5071_v51 = vsub.s32 %v2440_v34, %v4841_v42 }
 0x650   :  { %2736 = vadd.xlane.f32.xlu1 %v2673_v12  ;;  %v2454_v12 = vadd.s32 4294967264, %v5044_v3 }
 0x652   :  { %2352 = vadd.xlane.f32.xlu0 %v2292_v14 }
 0x654   :  { %2354 = vadd.xlane.f32.xlu1 %v2293_v32  ;;  %v5079_v32 = vsub.s32 %v2447_v40, %v4841_v42 }
 0x656   :  { %2730 = vadd.xlane.f32.xlu0 %v2670_v53 }
 0x665   :  { %2875 = vbcast.lane.b32.xlu1 %v4848_v37, 376  ;;  %v5055_v37 = vsub.s32 %v5044_v3, %v4841_v42 }
 0x667   :  { %v2301_v10 = vpop.xlane.xlu0 %2300 }
 0x668   :  { %v2364_v56 = vadd.f32 %v5051_v62, %v2301_v10  ;;  %v2475_v10 = vadd.s32 4294967240, %v5044_v3 }
 0x669   :  { %v2303_v6 = vpop.xlane.xlu1 %2302 }
 0x66a   :  { %v2365_v53 = vadd.f32 %v5051_v62, %v2303_v6 }
 0x66b   :  { %v5046_v50 = vpop.xlane.xlu0 %2678 }
 0x66c   :  { %v2911_v33 = vmul.f32 %v4935_v60, %v5046_v50 }
 0x66d   :  { %v5049_v48 = vpop.xlane.xlu1 %2680 }
 0x66f   :  { %v2297_v20 = vpop.xlane.xlu0 %2296 }
 0x670   :  { %v2362_v43 = vadd.f32 %v5051_v62, %v2297_v20 }
 0x671   :  { %v2299_v15 = vpop.xlane.xlu1 %2298 }
 0x672   :  { %v2363_v45 = vadd.f32 %v5051_v62, %v2299_v15  ;;  %v2432_v0 = vrot.slane %v2362_v43, %v5055_v37  ;;  %v2444_v43 = vrot.slane %v2364_v56, %v5071_v51  ;;  %v5088_v15 = vsub.s32 %v2454_v12, %v4841_v42 }
 0x673   :  { %v2675_v26 = vpop.xlane.xlu0 %2674  ;;  %v5101_v56 = vsub.s32 %v2475_v10, %v4841_v42 }
 0x674   :  { %v2437_v55 = vrot.slane %v2363_v45, %v5059_v29  ;;  %v2909_v49 = vmul.f32 %v4926_v1, %v2675_v26  ;;  %v2461_v1 = vadd.s32 4294967256, %v5044_v3 }
 0x675   :  { %v5065_v30 = vpop.xlane.xlu1 %2676 }
 0x676   :  { %v2439_v28 = vsel %vm2438_vm9, %v2437_v55, %v2432_v0  ;;  %2974 = vperm.xlu0 %3704, %v2909_v49   ;;  %v5093_v6 = vsub.s32 %v2461_v1, %v4841_v42  ;;  %v2451_v55 = vrot.slane %v2365_v53, %v5079_v32  ;;  %v5097_v49 = vsub.s32 %v2468_v36, %v4841_v42 }
 0x677   :  { %v2309_v22 = vpop.xlane.xlu0 %2308  ;;  %v2446_v26 = vsel %vm2445_vm10, %v2444_v43, %v2439_v28  ;;  %v2910_v50 = vmul.f32 %v4922_v27, %v5065_v30 }
 0x678   :  { %v2368_v34 = vadd.f32 %v5051_v62, %v2309_v22  ;;  %v2453_v1 = vsel %vm2452_vm11, %v2451_v55, %v2446_v26  ;;  %v2671_v26 = vmul.f32 %v4882_v24, %v2253_v58 }
 0x679   :  { %v2311_v5 = vpop.xlane.xlu1 %2310 }
 0x67a   :  { %v2369_v28 = vadd.f32 %v5051_v62, %v2311_v5 }
 0x67b   :  { %v5075_v14 = vpop.xlane.xlu0 %2686 }
 0x67c   :  { %v2479_v5 = vrot.slane %v2369_v28, %v5101_v56  ;;  %v2496_v28 = vadd.s32 4294967216, %v5044_v3 }
 0x67d   :  { %v5083_v20 = vpop.xlane.xlu1 %2688 }
 0x67f   :  { %v2305_v45 = vpop.xlane.xlu0 %2304 }
 0x680   :  { %v2366_v0 = vadd.f32 %v5051_v62, %v2305_v45  ;;  %v2472_v45 = vrot.slane %v2368_v34, %v5097_v49  ;;  %v2482_v34 = vadd.s32 4294967232, %v5044_v3 }
 0x681   :  { %v2307_v40 = vpop.xlane.xlu1 %2306 }
 0x682   :  { %v2458_v12 = vrot.slane %v2366_v0, %v5088_v15  ;;  %v2367_v43 = vadd.f32 %v5051_v62, %v2307_v40  ;;  %v5130_v24 = vsub.s32 %v2482_v34, %v4841_v42 }
 0x683   :  { %v5107_v53 = vpop.xlane.xlu0 %2682 }
 0x684   :  { %v2460_v36 = vsel %vm2459_vm12, %v2458_v12, %v2453_v1  ;;  %v2465_v22 = vrot.slane %v2367_v43, %v5093_v6 }
 0x685   :  { %v5112_v10 = vpop.xlane.xlu1 %2684 }
 0x686   :  { %v2467_v0 = vsel %vm2466_vm13, %v2465_v22, %v2460_v36 }
 0x687   :  { %v2474_v55 = vsel %vm2473_vm14, %v2472_v45, %v2467_v0  ;;  %v2317_v40 = vpop.xlane.xlu0 %2316  ;;  %v5134_v45 = vsub.s32 %v2489_v23, %v4841_v42 }
 0x688   :  { %v2481_v12 = vsel %vm2480_vm15, %v2479_v5, %v2474_v55  ;;  %v5137_v5 = vsub.s32 %v2496_v28, %v4841_v42  ;;  %v2372_v0 = vadd.f32 %v5051_v62, %v2317_v40  ;;  %v5141_v55 = vsub.s32 %v2503_v61, %v4841_v42 }
 0x689   :  { %2732 = vadd.xlane.f32.xlu1 %v2671_v26  ;;  %v2319_v43 = vpop.xlane.xlu1 %2318 }
 0x68a   :  { %5444 = vst [vmem:[#allocation13_spill] sm:$0xff] %v5137_v5  ;;  %v2373_v8 = vadd.f32 %v5051_v62, %v2319_v43  ;;  %v2500_v40 = vrot.slane %v2372_v0, %v5137_v5  ;;  %v2912_v5 = vmul.f32 %v4944_v52, %v5049_v48 }
 0x68b   :  { %v5122_v1 = vpop.xlane.xlu0 %2694 }
 0x68c   :  { %v2507_v61 = vrot.slane %v2373_v8, %v5141_v55  ;;  %v2517_v8 = vadd.s32 4294967192, %v5044_v3 }
 0x68d   :  { %v5126_v36 = vpop.xlane.xlu1 %2696 }
 0x68e   :  { %v5176_v52 = vsub.s32 %v2517_v8, %v4841_v42  ;;  %v2915_v8 = vmul.f32 %v4969_v31, %v5075_v14  ;;  %v2913_v31 = vmul.f32 %v4952_v18, %v5107_v53 }
 0x68f   :  { %v2313_v58 = vpop.xlane.xlu0 %2312 }
 0x690   :  { %v2370_v22 = vadd.f32 %v5051_v62, %v2313_v58 }
 0x691   :  { %v2315_v26 = vpop.xlane.xlu1 %2314 }
 0x692   :  { %v2486_v34 = vrot.slane %v2370_v22, %v5130_v24  ;;  %v2371_v7 = vadd.f32 %v5051_v62, %v2315_v26 }
 0x693   :  { %v5146_v58 = vpop.xlane.xlu0 %2690 }
 0x694   :  { %v2488_v23 = vsel %vm2487_vm0, %v2486_v34, %v2481_v12  ;;  %v2493_v28 = vrot.slane %v2371_v7, %v5134_v45  ;;  %v2510_v7 = vadd.s32 4294967200, %v5044_v3 }
 0x695   :  { %v5151_v63 = vpop.xlane.xlu1 %2692 }
 0x696   :  { %v2495_v43 = vsel %vm2494_vm1, %v2493_v28, %v2488_v23  ;;  %v2524_v23 = vadd.s32 4294967184, %v5044_v3  ;;  %v5170_v60 = vsub.s32 %v2510_v7, %v4841_v42 }
 0x697   :  { %v2502_v22 = vsel %vm2501_vm2, %v2500_v40, %v2495_v43  ;;  %v2325_v26 = vpop.xlane.xlu0 %2324  ;;  %v2531_v40 = vadd.s32 4294967176, %v5044_v3 }
 0x698   :  { %v2509_v12 = vsel %vm2508_vm3, %v2507_v61, %v2502_v22  ;;  %v5179_v48 = vsub.s32 %v2524_v23, %v4841_v42  ;;  %v2376_v43 = vadd.f32 %v5051_v62, %v2325_v26 }
 0x699   :  { %v2327_v34 = vpop.xlane.xlu1 %2326 }
 0x69a   :  { %2980 = vperm.xlu1 %3703, %v2911_v33   ;;  %v2377_v22 = vadd.f32 %v5051_v62, %v2327_v34 }
 0x69b   :  { %v5160_v0 = vpop.xlane.xlu0 %2702 }
 0x69d   :  { %v5166_v28 = vpop.xlane.xlu1 %2704 }
 0x69e   :  { %2983 = vperm.xlu1 %3703, %v2912_v5   ;;  %v5183_v5 = vsub.s32 %v2531_v40, %v4841_v42  ;;  %v2528_v42 = vrot.slane %v2376_v43, %v5179_v48 }
 0x69f   :  { %v2321_v33 = vpop.xlane.xlu0 %2320 }
 0x6a0   :  { %v2374_v61 = vadd.f32 %v5051_v62, %v2321_v33  ;;  %v2535_v34 = vrot.slane %v2377_v22, %v5183_v5 }
 0x6a1   :  { %v2323_v3 = vpop.xlane.xlu1 %2322 }
 0x6a2   :  { %v2514_v7 = vrot.slane %v2374_v61, %v5170_v60  ;;  %v2375_v27 = vadd.f32 %v5051_v62, %v2323_v3  ;;  %2977 = vperm.xlu1 %3703, %v2910_v50   ;;  %v2916_v3 = vmul.f32 %v4978_v13, %v5083_v20  ;;  %v2919_v20 = vmul.f32 %v5003_v9, %v5122_v1 }
 0x6a3   :  { %v5188_v30 = vpop.xlane.xlu0 %2698  ;;  %v2917_v9 = vmul.f32 %v4986_v19, %v5146_v58 }
 0x6a4   :  { %v2516_v26 = vsel %vm2515_vm4, %v2514_v7, %v2509_v12  ;;  %v2521_v23 = vrot.slane %v2375_v27, %v5176_v52 }
 0x6a5   :  { %v5195_v40 = vpop.xlane.xlu1 %2700 }
 0x6a6   :  { %v2523_v33 = vsel %vm5403_vm5, %v2521_v23, %v2516_v26  ;;  %2992 = vperm.xlu1 %3703, %v2915_v8   ;;  %v2914_v8 = vmul.f32 %v4960_v25, %v5112_v10 }
 0x6a7   :  { %v2333_v50 = vpop.xlane.xlu0 %2332  ;;  %v2530_v61 = vsel %vm5404_vm6, %v2528_v42, %v2523_v33 }
 0x6a8   :  { %v5203_v14 = vsel %vm2536_vm7, %v2535_v34, %v2530_v61  ;;  %v2380_v26 = vadd.f32 %v5051_v62, %v2333_v50 }
 0x6a9   :  { %v2335_v12 = vpop.xlane.xlu1 %2334 }
 0x6aa   :  { %2986 = vperm.xlu1 %3703, %v2913_v31   ;;  %v2381_v42 = vadd.f32 %v5051_v62, %v2335_v12 }
 0x6ab   :  { %v2711_v43 = vpop.xlane.xlu0 %2710 }
 0x6ac   :  { %v2927_v22 = vmul.f32 %v4947_v59, %v2711_v43  ;;  %v2555_v33 = vrot.slane %v2381_v42, %v5079_v32 }
 0x6ad   :  { %v2713_v7 = vpop.xlane.xlu1 %2712 }
 0x6ae   :  { %3028 = vperm.xlu0 %3704, %v2927_v22   ;;  %2995 = vperm.xlu1 %3703, %v2916_v3   ;;  %v2928_v18 = vmul.f32 %v4956_v16, %v2713_v7  ;;  %v2550_v16 = vrot.slane %v2380_v26, %v5071_v51  ;;  %v2920_v22 = vmul.f32 %v5014_v41, %v5126_v36 }
 0x6af   :  { %v2329_v27 = vpop.xlane.xlu0 %2328 }
 0x6b0   :  { %v2378_v53 = vadd.f32 %v5051_v62, %v2329_v27 }
 0x6b1   :  { %v2331_v23 = vpop.xlane.xlu1 %2330 }
 0x6b2   :  { %v2379_v13 = vadd.f32 %v5051_v62, %v2331_v23  ;;  %2989 = vperm.xlu1 %3703, %v2914_v8   ;;  %3031 = vperm.xlu0 %3704, %v2928_v18   ;;  %v2541_v34 = vrot.slane %v2378_v53, %v5055_v37  ;;  %v2918_v8 = vmul.f32 %v4994_v46, %v5151_v63 }
 0x6b3   :  { %v2707_v59 = vpop.xlane.xlu0 %2706 }
 0x6b4   :  { %v2545_v25 = vrot.slane %v2379_v13, %v5059_v29  ;;  %v2925_v36 = vmul.f32 %v4930_v17, %v2707_v59  ;;  %v2921_v17 = vmul.f32 %v5022_v4, %v5188_v30  ;;  %v2923_v4 = vmul.f32 %v5034_v44, %v5160_v0 }
 0x6b5   :  { %v2709_v10 = vpop.xlane.xlu1 %2708 }
 0x6b6   :  { %v2546_v50 = vsel %vm2438_vm9, %v2545_v25, %v2541_v34  ;;  %v2926_v61 = vmul.f32 %v4938_v47, %v2709_v10  ;;  %3004 = vperm.xlu1 %3703, %v2919_v20  }
 0x6b7   :  { %v2551_v31 = vsel %vm2445_vm10, %v2550_v16, %v2546_v50  ;;  %v2341_v12 = vpop.xlane.xlu0 %2340  ;;  %v2922_v50 = vmul.f32 %v5030_v35, %v5195_v40 }
 0x6b8   :  { %3025 = vperm.xlu0 %3704, %v2926_v61   ;;  %v2556_v1 = vsel %vm2452_vm11, %v2555_v33, %v2551_v31  ;;  %v2384_v58 = vadd.f32 %v5051_v62, %v2341_v12 }
 0x6b9   :  { %v2343_v43 = vpop.xlane.xlu1 %2342 }
 0x6ba   :  { %2998 = vperm.xlu1 %3703, %v2917_v9   ;;  %v2385_v53 = vadd.f32 %v5051_v62, %v2343_v43  ;;  %v2570_v63 = vrot.slane %v2384_v58, %v5097_v49 }
 0x6bb   :  { %v2719_v3 = vpop.xlane.xlu0 %2718 }
 0x6bc   :  { %v2931_v7 = vmul.f32 %v4981_v2, %v2719_v3  ;;  %v2575_v20 = vrot.slane %v2385_v53, %v5101_v56  ;;  %v2924_v3 = vmul.f32 %v5038_v57, %v5166_v28 }
 0x6bd   :  { %v2721_v27 = vpop.xlane.xlu1 %2720 }
 0x6be   :  { %3007 = vperm.xlu1 %3703, %v2920_v22   ;;  %3040 = vperm.xlu0 %3704, %v2931_v7   ;;  %v2932_v59 = vmul.f32 %v4990_v11, %v2721_v27  ;;  %v5445_v22 = vld [vmem:[#allocation13_spill] sm:$0xff] }
 0x6bf   :  { %v2337_v47 = vpop.xlane.xlu0 %2336 }
 0x6c0   :  { %v2382_v19 = vadd.f32 %v5051_v62, %v2337_v47 }
 0x6c1   :  { %v2339_v18 = vpop.xlane.xlu1 %2338 }
 0x6c2   :  { %v2560_v26 = vrot.slane %v2382_v19, %v5088_v15  ;;  %v2383_v41 = vadd.f32 %v5051_v62, %v2339_v18  ;;  %3001 = vperm.xlu1 %3703, %v2918_v8   ;;  %v5446_v18 = vld [vmem:[#allocation9_spill] sm:$0xff] }
 0x6c3   :  { %v2715_v2 = vpop.xlane.xlu0 %2714 }
 0x6c4   :  { %v2561_v23 = vsel %vm2459_vm12, %v2560_v26, %v2556_v1  ;;  %v2565_v42 = vrot.slane %v2383_v41, %v5093_v6  ;;  %v2929_v46 = vmul.f32 %v4964_v39, %v2715_v2 }
 0x6c5   :  { %v2717_v13 = vpop.xlane.xlu1 %2716 }
 0x6c6   :  { %v2566_v34 = vsel %vm2466_vm13, %v2565_v42, %v2561_v23  ;;  %3022 = vperm.xlu1 %3703, %v2925_v36   ;;  %3034 = vperm.xlu0 %3704, %v2929_v46   ;;  %v2930_v61 = vmul.f32 %v4972_v21, %v2717_v13  ;;  %v5448_v23 = vld [vmem:[#allocation12_spill] sm:$0xff] }
 0x6c7   :  { %v2571_v25 = vsel %vm2473_vm14, %v2570_v63, %v2566_v34  ;;  %v2349_v16 = vpop.xlane.xlu0 %2348 }
 0x6c8   :  { %v2576_v10 = vsel %vm2480_vm15, %v2575_v20, %v2571_v25  ;;  %v2388_v9 = vadd.f32 %v5051_v62, %v2349_v16 }
 0x6c9   :  { %v2351_v39 = vpop.xlane.xlu1 %2350 }
 0x6ca   :  { %3010 = vperm.xlu1 %3703, %v2921_v17   ;;  %3043 = vperm.xlu0 %3704, %v2932_v59   ;;  %v2389_v43 = vadd.f32 %v5051_v62, %v2351_v39  ;;  %v2590_v7 = vrot.slane %v2388_v9, %v5445_v22 }
 0x6cb   :  { %v2727_v33 = vpop.xlane.xlu0 %2726 }
 0x6cc   :  { %v2935_v11 = vmul.f32 %v5017_v54, %v2727_v33  ;;  %v2595_v47 = vrot.slane %v2389_v43, %v5141_v55 }
 0x6cd   :  { %v2729_v31 = vpop.xlane.xlu1 %2728 }
 0x6ce   :  { %3013 = vperm.xlu1 %3703, %v2922_v50   ;;  %3037 = vperm.xlu0 %3704, %v2930_v61   ;;  %v2936_v57 = vmul.f32 %v5446_v18, %v2729_v31 }
 0x6cf   :  { %v2345_v12 = vpop.xlane.xlu0 %2344 }
 0x6d0   :  { %v2386_v30 = vadd.f32 %v5051_v62, %v2345_v12 }
 0x6d1   :  { %v2347_v1 = vpop.xlane.xlu1 %2346 }
 0x6d2   :  { %v2580_v35 = vrot.slane %v2386_v30, %v5130_v24  ;;  %v2387_v21 = vadd.f32 %v5051_v62, %v2347_v1  ;;  %3016 = vperm.xlu1 %3703, %v2923_v4   ;;  %3052 = vperm.xlu0 %3704, %v2935_v11   ;;  %v5450_v30 = vld [vmem:[#allocation11_spill] sm:$0xff] }
 0x6d3   :  { %v2723_v40 = vpop.xlane.xlu0 %2722  ;;  %v5292_v1 = vld [vmem:[%s5389_s1] sm:$0x3]  ;;  %s3310_s1 = sld [smem:[#allocation2 + $0x1]] }
 0x6d4   :  { %v2581_v44 = vsel %vm2487_vm0, %v2580_v35, %v2576_v10  ;;  %v2585_v54 = vrot.slane %v2387_v21, %v5134_v45  ;;  %v2933_v0 = vmul.f32 %v4998_v38, %v2723_v40  ;;  %v5447_v38 = vld [vmem:[#allocation8_spill] sm:$0xff]  ;;  %v5449_v10 = vld [vmem:[#allocation10_spill] sm:$0xff] }
 0x6d5   :  { %v2725_v27 = vpop.xlane.xlu1 %2724 }
 0x6d6   :  { %v2586_v8 = vsel %vm2494_vm1, %v2585_v54, %v2581_v44  ;;  %3019 = vperm.xlu1 %3703, %v2924_v3   ;;  %3046 = vperm.xlu0 %3704, %v2933_v0   ;;  %v2934_v41 = vmul.f32 %v5447_v38, %v2725_v27 }
 0x6d7   :  { %v2591_v19 = vsel %vm2501_vm2, %v2590_v7, %v2586_v8  ;;  %v2357_v58 = vpop.xlane.xlu0 %2356 }
 0x6d8   :  { %v2596_v28 = vsel %vm2508_vm3, %v2595_v47, %v2591_v19  ;;  %v2392_v63 = vadd.f32 %v5051_v62, %v2357_v58 }
 0x6d9   :  { %v2359_v53 = vpop.xlane.xlu1 %2358 }
 0x6da   :  { %3055 = vperm.xlu0 %3704, %v2936_v57   ;;  %v2393_v20 = vadd.f32 %v5051_v62, %v2359_v53  ;;  %v2610_v33 = vrot.slane %v2392_v63, %v5179_v48 }
 0x6db   :  { %v2735_v26 = vpop.xlane.xlu0 %2734 }
 0x6dc   :  { %v2939_v42 = vmul.f32 %v5448_v23, %v2735_v26  ;;  %v2615_v50 = vrot.slane %v2393_v20, %v5183_v5 }
 0x6dd   :  { %v2737_v2 = vpop.xlane.xlu1 %2736 }
 0x6de   :  { %3049 = vperm.xlu0 %3704, %v2934_v41  }
 0x6df   :  { %v2353_v36 = vpop.xlane.xlu0 %2352 }
 0x6e0   :  { %v2390_v46 = vadd.f32 %v5051_v62, %v2353_v36 }
 0x6e1   :  { %v2355_v13 = vpop.xlane.xlu1 %2354 }
 0x6e2   :  { %v2600_v34 = vrot.slane %v2390_v46, %v5170_v60  ;;  %v2391_v25 = vadd.f32 %v5051_v62, %v2355_v13  ;;  %3064 = vperm.xlu0 %3704, %v2939_v42  }
 0x6e3   :  { %v2731_v16 = vpop.xlane.xlu0 %2730 }
 0x6e4   :  { %v2601_v17 = vsel %vm2515_vm4, %v2600_v34, %v2596_v28  ;;  %v2605_v59 = vrot.slane %v2391_v25, %v5176_v52  ;;  %v2937_v39 = vmul.f32 %v5449_v10, %v2731_v16 }
 0x6e5   :  { %v2876_v4 = vpop.permute.xlu1 %2875 }
 0x6e6   :  { %v2606_v61 = vsel %vm5403_vm5, %v2605_v59, %v2601_v17  ;;  %3058 = vperm.xlu0 %3704, %v2937_v39   ;;  %vm2394_vm5 = vcmp.gt.f32.partialorder %v5292_v1, 0.5 }
 0x6e7   :  { %v2611_v31 = vsel %vm5404_vm6, %v2610_v33, %v2606_v61  ;;  %vm2621_vm6 = vcmask 1041408  }
 0x6e8   :  { %v2616_v62 = vsel %vm2536_vm7, %v2615_v50, %v2611_v31 }
 0x6e9   :  { %v2618_v12 = vsel %vm2617_vm8, %v2616_v62, %v5203_v14  ;;  %v2940_v14 = vmul.f32 %v2876_v4, %v2737_v2 }
 0x6ea   :  { %v5295_v43 = vsel %vm2394_vm5, %v2618_v12, -1e+09 }
 0x6eb   :  { %v2622_v35 = vsel %vm2621_vm6, %v5295_v43, -inf }
 0x6f5   :  { %v2975_v44 = vpop.permute.xlu0 %2974 }
 0x6f6   :  { %v3072_v16 = vrot.slane %v2975_v44, %v5055_v37 }
 0x716   :  { %v2733_v11 = vpop.xlane.xlu1 %2732 }
 0x717   :  { %v2938_v9 = vmul.f32 %v5450_v30, %v2733_v11 }
 0x719   :  { %3061 = vperm.xlu0 %3704, %v2938_v9  }
 0x71a   :  { %v2981_v21 = vpop.permute.xlu1 %2980 }
 0x71b   :  { %v3081_v39 = vrot.slane %v2981_v21, %v5071_v51 }
 0x71e   :  { %v2984_v40 = vpop.permute.xlu1 %2983 }
 0x71f   :  { %v3086_v12 = vrot.slane %v2984_v40, %v5079_v32 }
 0x722   :  { %v2978_v3 = vpop.permute.xlu1 %2977 }
 0x723   :  { %v3076_v20 = vrot.slane %v2978_v3, %v5059_v29 }
 0x725   :  { %v3077_v59 = vsel %vm2438_vm9, %v3076_v20, %v3072_v16 }
 0x726   :  { %v2993_v54 = vpop.permute.xlu1 %2992  ;;  %v3082_v31 = vsel %vm2445_vm10, %v3081_v39, %v3077_v59 }
 0x72a   :  { %v2987_v7 = vpop.permute.xlu1 %2986 }
 0x72b   :  { %v3091_v62 = vrot.slane %v2987_v7, %v5088_v15 }
 0x72d   :  { %v3029_v0 = vpop.permute.xlu0 %3028 }
 0x72e   :  { %v2996_v8 = vpop.permute.xlu1 %2995  ;;  %v3160_v25 = vrot.slane %v3029_v0, %v5071_v51  ;;  %v3087_v51 = vsel %vm2452_vm11, %v3086_v12, %v3082_v31 }
 0x72f   :  { %v3092_v9 = vsel %vm2459_vm12, %v3091_v62, %v3087_v51 }
 0x731   :  { %v3032_v27 = vpop.permute.xlu0 %3031 }
 0x732   :  { %v2990_v58 = vpop.permute.xlu1 %2989  ;;  %v3165_v10 = vrot.slane %v3032_v27, %v5079_v32 }
 0x733   :  { %v3096_v4 = vrot.slane %v2990_v58, %v5093_v6 }
 0x735   :  { %v3097_v3 = vsel %vm2466_vm13, %v3096_v4, %v3092_v9 }
 0x736   :  { %v5299_v57 = vpop.permute.xlu1 %3004 }
 0x737   :  { %v3026_v47 = vpop.permute.xlu0 %3025 }
 0x738   :  { %2623 = vmax.xlane.f32.xlu0 %v2622_v35  ;;  %v3155_v63 = vrot.slane %v3026_v47, %v5059_v29  ;;  %v3106_v47 = vrot.slane %v2996_v8, %v5101_v56 }
 0x73a   :  { %v2999_v53 = vpop.permute.xlu1 %2998 }
 0x73b   :  { %v3111_v7 = vrot.slane %v2999_v53, %v5130_v24 }
 0x73d   :  { %v3041_v19 = vpop.permute.xlu0 %3040 }
 0x73e   :  { %v5301_v38 = vpop.permute.xlu1 %3007  ;;  %v3180_v35 = vrot.slane %v3041_v19, %v5097_v49 }
 0x742   :  { %v3002_v2 = vpop.permute.xlu1 %3001 }
 0x743   :  { %v3116_v19 = vrot.slane %v3002_v2, %v5134_v45 }
 0x745   :  { %v3035_v18 = vpop.permute.xlu0 %3034 }
 0x746   :  { %v3023_v23 = vpop.permute.xlu1 %3022 }
 0x747   :  { %v3151_v46 = vrot.slane %v3023_v23, %v5055_v37  ;;  %v3170_v37 = vrot.slane %v3035_v18, %v5088_v15  ;;  %v3101_v15 = vrot.slane %v2993_v54, %v5097_v49 }
 0x749   :  { %v3044_v28 = vpop.permute.xlu0 %3043  ;;  %v3156_v34 = vsel %vm2438_vm9, %v3155_v63, %v3151_v46  ;;  %v3102_v0 = vsel %vm2473_vm14, %v3101_v15, %v3097_v3  ;;  %vm5451_vm9 = vcmask 917312  }
 0x74a   :  { %v3161_v17 = vsel %vm2445_vm10, %v3160_v25, %v3156_v34  ;;  %v3011_v33 = vpop.permute.xlu1 %3010  ;;  %v3185_v40 = vrot.slane %v3044_v28, %v5101_v56  ;;  %v3107_v18 = vsel %vm2480_vm15, %v3106_v47, %v3102_v0  ;;  %vm5452_vm10 = vmmov %vm5451_vm9 }
 0x74b   :  { %v3166_v61 = vsel %vm2452_vm11, %v3165_v10, %v3161_v17  ;;  %vm5453_vm11 = vcmask 982912  }
 0x74c   :  { %v3171_v11 = vsel %vm2459_vm12, %v3170_v37, %v3166_v61  ;;  %vm5454_vm12 = vmmov %vm5453_vm11 }
 0x74d   :  { %v3038_v26 = vpop.permute.xlu0 %3037 }
 0x74e   :  { %3067 = vperm.xlu0 %3704, %v2940_v14   ;;  %v3175_v29 = vrot.slane %v3038_v26, %v5093_v6  ;;  %v3014_v14 = vpop.permute.xlu1 %3013  ;;  %v3112_v26 = vsel %vm2487_vm0, %v3111_v7, %v3107_v18 }
 0x74f   :  { %v3136_v34 = vrot.slane %v3014_v14, %v5176_v52 }
 0x750   :  { %v3176_v30 = vsel %vm2466_vm13, %v3175_v29, %v3171_v11 }
 0x751   :  { %v3053_v41 = vpop.permute.xlu0 %3052  ;;  %v3181_v32 = vsel %vm2473_vm14, %v3180_v35, %v3176_v30  ;;  %v3235_v35 = vstv %s3310_s1 }
 0x752   :  { %v3186_v58 = vsel %vm2480_vm15, %v3185_v40, %v3181_v32  ;;  %v3017_v49 = vpop.permute.xlu1 %3016 }
 0x755   :  { %v3047_v36 = vpop.permute.xlu0 %3046 }
 0x756   :  { %v3190_v6 = vrot.slane %v3047_v36, %v5130_v24  ;;  %v3200_v36 = vrot.slane %v3053_v41, %v5445_v22  ;;  %v3117_v24 = vsel %vm2494_vm1, %v3116_v19, %v3112_v26  ;;  %v3131_v41 = vrot.slane %v3011_v33, %v5170_v60  ;;  %v3020_v20 = vpop.permute.xlu1 %3019 }
 0x757   :  { %v3146_v16 = vrot.slane %v3020_v20, %v5183_v5 }
 0x758   :  { %v3191_v54 = vsel %vm2487_vm0, %v3190_v6, %v3186_v58 }
 0x759   :  { %v3056_v42 = vpop.permute.xlu0 %3055 }
 0x75a   :  { %v3205_v2 = vrot.slane %v3056_v42, %v5141_v55 }
 0x75d   :  { %v3050_v13 = vpop.permute.xlu0 %3049 }
 0x75e   :  { %v3195_v44 = vrot.slane %v3050_v13, %v5134_v45  ;;  %v3121_v45 = vrot.slane %v5299_v57, %v5445_v22  ;;  %v3141_v57 = vrot.slane %v3017_v49, %v5179_v48 }
 0x760   :  { %v3196_v28 = vsel %vm2494_vm1, %v3195_v44, %v3191_v54  ;;  %v3122_v13 = vsel %vm2501_vm2, %v3121_v45, %v3117_v24 }
 0x761   :  { %v3065_v50 = vpop.permute.xlu0 %3064  ;;  %v3201_v8 = vsel %vm2501_vm2, %v3200_v36, %v3196_v28 }
 0x762   :  { %v3206_v22 = vsel %vm2508_vm3, %v3205_v2, %v3201_v8  ;;  %v3220_v59 = vrot.slane %v3065_v50, %v5179_v48 }
 0x765   :  { %v3059_v21 = vpop.permute.xlu0 %3058 }
 0x766   :  { %v3210_v53 = vrot.slane %v3059_v21, %v5170_v60 }
 0x768   :  { %v3211_v42 = vsel %vm2515_vm4, %v3210_v53, %v3206_v22 }
 0x798   :  { %v3062_v27 = vpop.permute.xlu0 %3061 }
 0x799   :  { %v3215_v46 = vrot.slane %v3062_v27, %v5176_v52 }
 0x79b   :  { %v3216_v17 = vsel %vm5451_vm9, %v3215_v46, %v3211_v42 }
 0x79c   :  { %v3221_v39 = vsel %vm5454_vm12, %v3220_v59, %v3216_v17 }
 0x7c5   :  { %v2624_v23 = vpop.xlane.xlu0 %2623 }
 0x7c6   :  { %v2625_v56 = vsub.f32 %v5295_v43, %v2624_v23  ;;  %v3126_v43 = vrot.slane %v5301_v38, %v5141_v55 }
 0x7c8   :  { %v2626_v63 = vmul.f32 1.442695, %v2625_v56  ;;  %v3127_v25 = vsel %vm2508_vm3, %v3126_v43, %v3122_v13 }
 0x7c9   :  { %v3132_v60 = vsel %vm2515_vm4, %v3131_v41, %v3127_v25 }
 0x7ca   :  { %3874 = vpow2.f32 %v2626_v63  ;;  %v3137_v52 = vsel %vm5452_vm10, %v3136_v34, %v3132_v60 }
 0x7cb   :  { %v3142_v10 = vsel %vm5453_vm11, %v3141_v57, %v3137_v52 }
 0x7cc   :  { %v3147_v33 = vsel %vm2536_vm7, %v3146_v16, %v3142_v10 }
 0x7cd   :  { %v3068_v55 = vpop.permute.xlu0 %3067 }
 0x7ce   :  { %v3225_v38 = vrot.slane %v3068_v55, %v5183_v5  ;;  %v2738_v5 = vsel %vm2621_vm6, %v5292_v1, 0.0 }
 0x7d0   :  { %v3226_v61 = vsel %vm2536_vm7, %v3225_v38, %v3221_v39 }
 0x7d1   :  { %v3227_v29 = vsel %vm2617_vm8, %v3226_v61, %v3147_v33 }
 0x7d2   :  { %v3229_v31 = vsel %vm2621_vm6, %v3227_v29, 0.0 }
 0x7d3   :  { %3230 = vadd.xlane.f32.xlu0 %v3229_v31 }
 0x7d4   :  { %v3875_v62 = vpop.eup %3874 }
 0x7d5   :  { %v2628_v48 = vsel %vm2621_vm6, %v3875_v62, 0.0 }
 0x7d6   :  { %2629 = vadd.xlane.f32.xlu1 %v2628_v48 }
 0x7da   :  { %2739 = vadd.xlane.f32.xlu1 %v2738_v5 }
 0x860   :  { %v3231_v9 = vpop.xlane.xlu0 %3230 }
 0x863   :  { %v2630_v50 = vpop.xlane.xlu1 %2629 }
 0x864   :  { %v2631_v37 = vmax.f32 %v2630_v50, 1e-30 }
 0x866   :  { %3876 = vrcp.f32 %v2631_v37 }
 0x867   :  { %v2740_v12 = vpop.xlane.xlu1 %2739 }
 0x868   :  { %v2741_v4 = vmax.f32 %v2740_v12, 1.0 }
 0x86a   :  { %3878 = vrcp.f32 %v2741_v4 }
 0x870   :  { %v3877_v11 = vpop.eup %3876 }
 0x871   :  { %v2633_v51 = vmul.f32 %v3877_v11, %v3875_v62 }
 0x873   :  { %2634 = vst [vmem:[#allocation5] sm:$0x3] %v2633_v51 }
 0x874   :  { %v3879_v30 = vpop.eup %3878 }
 0x875   :  { %3904 = shalt.err (!%p3901_p9)
}
 0x876   :  { %s3905_s17 = scalar_lea.hbm %s5399_s11, 32 }
 0x877   :  { %p3906_p10 = scmp.ne.s32.totalorder %s5399_s11, %s3905_s17  ;;  %p3909_p11 = scmp.lt.u32.totalorder %s3905_s17, %s5399_s11 }
 0x879   :  { %p3911_p12 = pnand %p3909_p11, %p3906_p10 }
 0x87b   :  { %3914 = shalt.err (!%p3911_p12)
}
 0x87c   :  { %3247 = dma.vmem_to_hbm [thread:$0]  %s3245_s2, 32, %s5399_s11, [#allocation3]   ;;  %v3233_v1 = vmul.f32 %v3879_v30, %v3231_v9 }
 0x87e   :  { %v3236_v14 = vadd.f32 %v3235_v35, %v3233_v1 }
 0x880   :  { %3237 = vst [vmem:[%s5400_s12] sm:$0x3] %v3236_v14 }
 0x881   :  { %3917 = dma.done.wait [#allocation3], 32  }
 0x882   :  { %3918 = vsyncadd [#allocation3], 4294967264 }
 0x883   :  { %3255 = vsyncpa [#allocation3], 1 }
 0x884   :  { %3256 = vsyncpa [#allocation4], 1 }

</bundles_post_ra>
